<compile_context>
chip_gen: v7x
topology: tpu7x:2x2x1
jax: 0.10.0
libtpu: 0.0.40
codegen_flags: <defaults>
</compile_context>

<pallas_src>
import jax
import jax.numpy as jnp
from jax import lax
from jax.experimental import pallas as pl
from jax.experimental.pallas import tpu as pltpu

HID = 64                 # LSTM hidden size per direction
EMB = 2 * HID            # 128, attention embed dim
G = 8 * HID              # 512 = 2 directions x 4 gates
NHEADS = 4
HEAD_DIM = EMB // NHEADS
NCLS = 3
CLS_PAD = 128            # lane-dense padded class dimension


# ----------------------------------------------------------------------------
# Fused kernel: BiLSTM -> MHA (mean-pool folded) -> classifier -> softmax
# ----------------------------------------------------------------------------
def risk_alert_kernel(x_ref, wih_ref, whh_ref, b_ref,
                      wqkv_ref, bqkv_ref, wo_ref, bo_ref,
                      w1_ref, b1_ref, w2_ref, b2_ref,
                      out_ref, xg_ref, hist_ref, seq_ref):
    T, TB, _ = x_ref.shape            # time-major batch tile: (T, TB, 2*Din)
    f32 = jnp.float32
    bf16 = jnp.bfloat16

    # ------------------ fused, time-aligned input projection ------------------
    # x_ref = [x_t ; x_{T-1-t}] on the feature axis (built in the wrapper), and
    # wih places fwd weights on the first Din rows / bwd weights on the last Din
    # rows, so xg[t] already holds the time-aligned gate inputs for BOTH
    # directions.  Gate column order: [i_f,i_b,f_f,f_b,o_f,o_b,g_f,g_b].
    x = x_ref[...].reshape(T * TB, x_ref.shape[-1])          # bf16
    xg = (jnp.dot(x, wih_ref[...], preferred_element_type=f32)
          + b_ref[...])                                       # f32 (T*TB, G)
    xg_ref[...] = xg.reshape(T, TB, G)

    whh = whh_ref[...]                # (EMB, G) bf16, block-diagonal recurrent

    # ---------------- BiLSTM recurrence (fwd & bwd interleaved) ----------------
    def step(t, carry):
        hc, cc = carry                # (TB, EMB) f32, [h_fwd|h_bwd], [c_fwd|c_bwd]
        gates = xg_ref[t] + jnp.dot(hc.astype(bf16), whh,
                                    preferred_element_type=f32)
        sig = jax.nn.sigmoid(gates[:, 0:3 * EMB])             # i | f | o, 128-aligned
        i = sig[:, 0:EMB]
        f = sig[:, EMB:2 * EMB]
        o = sig[:, 2 * EMB:3 * EMB]
        g = jnp.tanh(gates[:, 3 * EMB:4 * EMB])
        cc = f * cc + i * g
        hc = o * jnp.tanh(cc)
        hist_ref[t] = hc              # full 128-lane, leading-axis slab store
        return hc, cc

    lax.fori_loop(0, T, step,
                  (jnp.zeros((TB, EMB), f32), jnp.zeros((TB, EMB), f32)),
                  unroll=True)

    # -------- resolve bwd time-reversal + go batch-major (once, off path) -------
    hist = hist_ref[...]                                      # (T, TB, EMB) f32
    hf = hist[:, :, 0:HID]                                    # fwd half, time t
    hb = hist[:, :, HID:EMB]                                  # bwd half, time T-1-t
    for t in range(T):
        row = jnp.concatenate([hf[t], hb[T - 1 - t]], axis=-1)   # (TB, EMB)
        seq_ref[:, t:t + 1, :] = row.reshape(TB, 1, EMB)

    # ------------- multi-head self-attention, mean-pool folded in -------------
    seq2 = seq_ref[...].reshape(TB * T, EMB).astype(bf16)
    qkv = (jnp.dot(seq2, wqkv_ref[...], preferred_element_type=f32)
           + bqkv_ref[...])                                   # (TB*T, 3*EMB) f32
    q = qkv[:, 0:EMB].reshape(TB, T, EMB)                     # scale already folded in
    k = qkv[:, EMB:2 * EMB].reshape(TB, T, EMB)
    v = qkv[:, 2 * EMB:3 * EMB].reshape(TB, T, EMB)

    def stack_heads(a):               # (TB, T, EMB) -> (NHEADS*TB, T, HEAD_DIM)
        return jnp.concatenate(
            [a[:, :, h * HEAD_DIM:(h + 1) * HEAD_DIM] for h in range(NHEADS)],
            axis=0)

    qs = stack_heads(q).astype(bf16)
    ks = stack_heads(k).astype(bf16)
    vs = stack_heads(v).astype(bf16)

    sc = jnp.einsum('bqd,bkd->bqk', qs, ks, preferred_element_type=f32)
    m = jnp.max(sc, axis=-1, keepdims=True)
    p = jnp.exp(sc - m)
    p = p * pl.reciprocal(jnp.sum(p, axis=-1, keepdims=True), approx=True)
    pbar = jnp.mean(p, axis=1, keepdims=True)                 # mean over queries
    ctx = jnp.einsum('bqk,bkd->bqd', pbar.astype(bf16), vs,
                     preferred_element_type=f32)              # (NHEADS*TB, 1, D)
    attn_mean = jnp.concatenate(
        [ctx[h * TB:(h + 1) * TB, 0, :] for h in range(NHEADS)], axis=-1)  # (TB, EMB)

    # mean_t(attn_out) = mean_t(ctx) @ Wo + bo  (Wo applied once per batch row)
    context = (jnp.dot(attn_mean.astype(bf16), wo_ref[...],
                       preferred_element_type=f32) + bo_ref[...])          # (TB, EMB)

    # ------------------------------ classifier ------------------------------
    h1 = jnp.maximum(
        jnp.dot(context.astype(bf16), w1_ref[...], preferred_element_type=f32)
        + b1_ref[...], 0.0)
    # TODO(synk): Dropout(0.2) is identity at inference; skipped intentionally.
    logits = (jnp.dot(h1.astype(bf16), w2_ref[...], preferred_element_type=f32)
              + b2_ref[...])                                  # (TB, CLS_PAD), pads -1e30
    lm = jnp.max(logits, axis=-1, keepdims=True)
    ex = jnp.exp(logits - lm)                                 # padded lanes -> exactly 0
    out_ref[...] = (ex / jnp.sum(ex, axis=-1, keepdims=True)).astype(out_ref.dtype)


# ----------------------------------------------------------------------------
# Wrapper: batch grid, lane-dense output, wrapper-side layout plumbing
# ----------------------------------------------------------------------------
def risk_alert_forward(x, p, *, batch_tile=128):
    """x: (B, T, input_size) float32, batch_first like the PyTorch module."""
    B, T, _ = x.shape
    tb = min(batch_tile, B)
    nb = (B + tb - 1) // tb
    Bp = nb * tb

    # Time-major input with a time-reversed copy appended on the feature axis,
    # so the fused in-kernel input projection is already time-aligned for both
    # LSTM directions (removes the per-step select from the serial chain).
    x_tm = jnp.transpose(x, (1, 0, 2))                        # (T, B, Din)
    x_aug = jnp.concatenate([x_tm, x_tm[::-1]], axis=-1)      # (T, B, 2*Din)
    if Bp != B:
        x_aug = jnp.pad(x_aug, ((0, 0), (0, Bp - B), (0, 0)))
    x_aug = x_aug.astype(jnp.bfloat16)

    def resident(arr):                # weight stays resident across grid steps
        nd = arr.ndim
        return pl.BlockSpec(arr.shape, lambda i: (0,) * nd)

    weights = (p['wih'], p['whh'], p['b'],
               p['wqkv_t'], p['bqkv'], p['wo_t'], p['bo'],
               p['w1_t'], p['b1'], p['w2p'], p['b2p'])

    probs_padded = pl.pallas_call(
        risk_alert_kernel,
        out_shape=jax.ShapeDtypeStruct((Bp, CLS_PAD), jnp.float32),
        grid=(nb,),
        in_specs=[pl.BlockSpec((T, tb, x_aug.shape[-1]), lambda i: (0, i, 0))]
                 + [resident(w) for w in weights],
        out_specs=pl.BlockSpec((tb, CLS_PAD), lambda i: (i, 0)),
        scratch_shapes=[pltpu.VMEM((T, tb, G), jnp.float32),    # time-aligned gate inputs
                        pltpu.VMEM((T, tb, EMB), jnp.float32),  # per-step [h_fwd|h_bwd]
                        pltpu.VMEM((tb, T, EMB), jnp.float32)], # realigned lstm_out
        compiler_params=pltpu.CompilerParams(
            dimension_semantics=("parallel",),
            vmem_limit_bytes=32 * 1024 * 1024),
    )(x_aug, *weights)
    return probs_padded[:B, :NCLS]


# ----------------------------------------------------------------------------
# Parameter construction (PyTorch layouts -> fused kernel layouts)
# ----------------------------------------------------------------------------
def make_params(key, input_size):
    ks = iter(jax.random.split(key, 24))
    bf16 = jnp.bfloat16

    def u(shape, scale=0.1):
        return jax.random.uniform(next(ks), shape, jnp.float32, -scale, scale)

    # LSTM, PyTorch shapes: W_ih (4H, Din), W_hh (4H, H), gate row-order i,f,g,o
    wih_f = u((4 * HID, input_size)); whh_f = u((4 * HID, HID))
    bih_f = u((4 * HID,));            bhh_f = u((4 * HID,))
    wih_b = u((4 * HID, input_size)); whh_b = u((4 * HID, HID))
    bih_b = u((4 * HID,));            bhh_b = u((4 * HID,))

    def gates(w):   # split a PyTorch 4H-stacked tensor into (i, f, g, o)
        return w[0:HID], w[HID:2 * HID], w[2 * HID:3 * HID], w[3 * HID:4 * HID]

    # Augmented input projection (2*Din, 512): rows 0:Din hit the forward-gate
    # columns (fed with x_t), rows Din:2Din hit the backward-gate columns (fed
    # with x_{T-1-t}).  Gate column order [i_f,i_b,f_f,f_b,o_f,o_b,g_f,g_b].
    i_f, f_f, g_f, o_f = gates(wih_f)
    i_b, f_b, g_b, o_b = gates(wih_b)
    zD = jnp.zeros((input_size, HID), jnp.float32)
    wih_top = jnp.concatenate([i_f.T, zD, f_f.T, zD, o_f.T, zD, g_f.T, zD], axis=1)
    wih_bot = jnp.concatenate([zD, i_b.T, zD, f_b.T, zD, o_b.T, zD, g_b.T], axis=1)
    wih = jnp.concatenate([wih_top, wih_bot], axis=0)                  # (2*Din, 512)

    # Block-diagonal recurrent weight: rows 0:H -> fwd hidden, H:2H -> bwd hidden
    hi_f, hf_f, hg_f, ho_f = gates(whh_f)
    hi_b, hf_b, hg_b, ho_b = gates(whh_b)
    z = jnp.zeros((HID, HID), jnp.float32)
    top = jnp.concatenate([hi_f.T, z, hf_f.T, z, ho_f.T, z, hg_f.T, z], axis=1)
    bot = jnp.concatenate([z, hi_b.T, z, hf_b.T, z, ho_b.T, z, hg_b.T], axis=1)
    whh = jnp.concatenate([top, bot], axis=0)                          # (128, 512)

    bf4 = bih_f + bhh_f
    bb4 = bih_b + bhh_b
    bi_f, bf_f, bg_f, bo_f = gates(bf4)
    bi_b, bf_b, bg_b, bo_b = gates(bb4)
    b = jnp.concatenate([bi_f, bi_b, bf_f, bf_b,
                         bo_f, bo_b, bg_f, bg_b]).reshape(1, G)        # (1, 512)

    # MultiheadAttention: in_proj_weight (3E, E), in_proj_bias (3E,), out_proj (E, E)
    in_proj_w = u((3 * EMB, EMB)); in_proj_b = u((3 * EMB,))
    wo = u((EMB, EMB)); bo = u((EMB,))
    scale = 1.0 / (HEAD_DIM ** 0.5)
    wqkv_t = in_proj_w.T                         # (EMB, 3*EMB), cols 0:EMB are Q
    wqkv_t = wqkv_t.at[:, :EMB].multiply(scale)  # fold 1/sqrt(head_dim) into Q
    bqkv = in_proj_b.at[:EMB].multiply(scale).reshape(1, 3 * EMB)

    # Classifier: Linear(128, 32), Linear(32, 3); pad class dim to 128 lanes
    w1 = u((32, EMB)); b1 = u((32,))
    w2 = u((NCLS, 32)); b2 = u((NCLS,))
    w2p = jnp.zeros((32, CLS_PAD), jnp.float32).at[:, :NCLS].set(w2.T)
    b2p = jnp.full((CLS_PAD,), -1e30, jnp.float32).at[:NCLS].set(b2).reshape(1, CLS_PAD)

    # Matmul operands in bf16 (f32 accumulation in-kernel); biases stay f32.
    return {
        'wih': wih.astype(bf16), 'whh': whh.astype(bf16), 'b': b,
        'wqkv_t': wqkv_t.astype(bf16), 'bqkv': bqkv,
        'wo_t': wo.T.astype(bf16), 'bo': bo.reshape(1, EMB),
        'w1_t': w1.T.astype(bf16), 'b1': b1.reshape(1, 32),
        'w2p': w2p.astype(bf16), 'b2p': b2p,
    }


if __name__ == "__main__":
    key = jax.random.PRNGKey(0)
    k_param, k_x = jax.random.split(key)

    B, T, INPUT_SIZE = 2, 8, 16
    params = make_params(k_param, INPUT_SIZE)
    x = jax.random.normal(k_x, (B, T, INPUT_SIZE), jnp.float32)

    probs = jax.jit(risk_alert_forward)(x, params)
    probs = jax.block_until_ready(probs)

    assert probs.shape == (B, NCLS)
    assert bool(jnp.all(jnp.isfinite(probs)))
    assert bool(jnp.allclose(jnp.sum(probs, axis=1), 1.0, atol=1e-5))
    print("KERNEL_OK")
</pallas_src>

<mosaic_0001>
module attributes {stable_mosaic.version = 11 : i64} {
  func.func @risk_alert_kernel(%arg0: i32, %arg1: memref<8x2x32xbf16, #tpu.memory_space<vmem>>, %arg2: memref<32x512xbf16, #tpu.memory_space<vmem>>, %arg3: memref<128x512xbf16, #tpu.memory_space<vmem>>, %arg4: memref<1x512xf32, #tpu.memory_space<vmem>>, %arg5: memref<128x384xbf16, #tpu.memory_space<vmem>>, %arg6: memref<1x384xf32, #tpu.memory_space<vmem>>, %arg7: memref<128x128xbf16, #tpu.memory_space<vmem>>, %arg8: memref<1x128xf32, #tpu.memory_space<vmem>>, %arg9: memref<128x32xbf16, #tpu.memory_space<vmem>>, %arg10: memref<1x32xf32, #tpu.memory_space<vmem>>, %arg11: memref<32x128xbf16, #tpu.memory_space<vmem>>, %arg12: memref<1x128xf32, #tpu.memory_space<vmem>>, %arg13: memref<2x128xf32, #tpu.memory_space<vmem>>, %arg14: memref<8x2x512xf32, #tpu.memory_space<vmem>>, %arg15: memref<8x2x128xf32, #tpu.memory_space<vmem>>, %arg16: memref<2x8x128xf32, #tpu.memory_space<vmem>>) attributes {dimension_semantics = [#tpu.dimension_semantics<parallel>], iteration_bounds = array<i64: 1>, scalar_prefetch = 0 : i64, scratch_operands = 3 : i64, tpu.core_type = #tpu.core_type<tc>, window_params = [{transform_indices = @transform_0, window_bounds = array<i64: 8, 2, 32>}, {pipeline_mode = #tpu.pipeline_mode<synchronous>, transform_indices = @transform_1, window_bounds = array<i64: 32, 512>}, {pipeline_mode = #tpu.pipeline_mode<synchronous>, transform_indices = @transform_2, window_bounds = array<i64: 128, 512>}, {pipeline_mode = #tpu.pipeline_mode<synchronous>, transform_indices = @transform_3, window_bounds = array<i64: 1, 512>}, {pipeline_mode = #tpu.pipeline_mode<synchronous>, transform_indices = @transform_4, window_bounds = array<i64: 128, 384>}, {pipeline_mode = #tpu.pipeline_mode<synchronous>, transform_indices = @transform_5, window_bounds = array<i64: 1, 384>}, {pipeline_mode = #tpu.pipeline_mode<synchronous>, transform_indices = @transform_6, window_bounds = array<i64: 128, 128>}, {pipeline_mode = #tpu.pipeline_mode<synchronous>, transform_indices = @transform_7, window_bounds = array<i64: 1, 128>}, {pipeline_mode = #tpu.pipeline_mode<synchronous>, transform_indices = @transform_8, window_bounds = array<i64: 128, 32>}, {pipeline_mode = #tpu.pipeline_mode<synchronous>, transform_indices = @transform_9, window_bounds = array<i64: 1, 32>}, {pipeline_mode = #tpu.pipeline_mode<synchronous>, transform_indices = @transform_10, window_bounds = array<i64: 32, 128>}, {pipeline_mode = #tpu.pipeline_mode<synchronous>, transform_indices = @transform_11, window_bounds = array<i64: 1, 128>}, {transform_indices = @transform_12, window_bounds = array<i64: 2, 128>}]} {
    %c0 = arith.constant 0 : index
    %c0_0 = arith.constant 0 : index
    %c0_1 = arith.constant 0 : index
    %0 = vector.load %arg1[%c0, %c0_0, %c0_1] : memref<8x2x32xbf16, #tpu.memory_space<vmem>>, vector<8x2x32xbf16>
    %1 = vector.shape_cast %0 : vector<8x2x32xbf16> to vector<16x32xbf16>
    %c0_2 = arith.constant 0 : index
    %c0_3 = arith.constant 0 : index
    %2 = vector.load %arg2[%c0_2, %c0_3] : memref<32x512xbf16, #tpu.memory_space<vmem>>, vector<32x512xbf16>
    %cst = arith.constant dense<0.000000e+00> : vector<16x512xf32>
    %3 = tpu.matmul %1, %2, %cst {dimension_numbers = #tpu.dot_dimension_numbers<[1], [0], [0], [1], [0, 0, 1, 1], [], []>} : vector<16x32xbf16>, vector<32x512xbf16>, vector<16x512xf32> -> vector<16x512xf32>
    %c0_4 = arith.constant 0 : index
    %c0_5 = arith.constant 0 : index
    %4 = vector.load %arg4[%c0_4, %c0_5] : memref<1x512xf32, #tpu.memory_space<vmem>>, vector<1x512xf32>
    %5 = vector.broadcast %4 : vector<1x512xf32> to vector<16x512xf32>
    %6 = arith.addf %3, %5 : vector<16x512xf32>
    %7 = vector.shape_cast %6 : vector<16x512xf32> to vector<8x2x512xf32>
    %c0_6 = arith.constant 0 : index
    %c0_7 = arith.constant 0 : index
    %c0_8 = arith.constant 0 : index
    %8 = vector.load %arg14[%c0_6, %c0_7, %c0_8] : memref<8x2x512xf32, #tpu.memory_space<vmem>>, vector<8x2x512xf32>
    tpu.vector_store %arg14[%c0_6, %c0_7, %c0_8], %7 {strides = array<i32>} : memref<8x2x512xf32, #tpu.memory_space<vmem>>, vector<8x2x512xf32>,
    %c0_9 = arith.constant 0 : index
    %c0_10 = arith.constant 0 : index
    %9 = vector.load %arg3[%c0_9, %c0_10] : memref<128x512xbf16, #tpu.memory_space<vmem>>, vector<128x512xbf16>
    %cst_11 = arith.constant 0.000000e+00 : f32
    %10 = vector.broadcast %cst_11 : f32 to vector<2x128xf32>
    %cst_12 = arith.constant 0.000000e+00 : f32
    %11 = vector.broadcast %cst_12 : f32 to vector<2x128xf32>
    %c0_i32 = arith.constant 0 : i32
    %12 = arith.index_cast %c0_i32 : i32 to index
    %c0_13 = arith.constant 0 : index
    %c0_14 = arith.constant 0 : index
    %13 = vector.load %arg14[%12, %c0_13, %c0_14] : memref<8x2x512xf32, #tpu.memory_space<vmem>>, vector<1x2x512xf32>
    %14 = vector.shape_cast %13 : vector<1x2x512xf32> to vector<2x512xf32>
    %15 = arith.truncf %10 : vector<2x128xf32> to vector<2x128xbf16>
    %cst_15 = arith.constant dense<0.000000e+00> : vector<2x512xf32>
    %16 = tpu.matmul %15, %9, %cst_15 {dimension_numbers = #tpu.dot_dimension_numbers<[1], [0], [0], [1], [0, 0, 1, 1], [], []>} : vector<2x128xbf16>, vector<128x512xbf16>, vector<2x512xf32> -> vector<2x512xf32>
    %17 = arith.addf %14, %16 : vector<2x512xf32>
    %18 = vector.extract_strided_slice %17 {offsets = [0, 0], sizes = [2, 384], strides = [1, 1]} : vector<2x512xf32> to vector<2x384xf32>
    %19 = arith.negf %18 : vector<2x384xf32>
    %20 = math.exp %19 : vector<2x384xf32>
    %cst_16 = arith.constant 1.000000e+00 : f32
    %21 = vector.broadcast %cst_16 : f32 to vector<2x384xf32>
    %22 = arith.addf %21, %20 : vector<2x384xf32>
    %23 = arith.divf %21, %22 : vector<2x384xf32>
    %24 = vector.extract_strided_slice %23 {offsets = [0, 0], sizes = [2, 128], strides = [1, 1]} : vector<2x384xf32> to vector<2x128xf32>
    %25 = vector.extract_strided_slice %23 {offsets = [0, 128], sizes = [2, 128], strides = [1, 1]} : vector<2x384xf32> to vector<2x128xf32>
    %26 = vector.extract_strided_slice %23 {offsets = [0, 256], sizes = [2, 128], strides = [1, 1]} : vector<2x384xf32> to vector<2x128xf32>
    %27 = vector.extract_strided_slice %17 {offsets = [0, 384], sizes = [2, 128], strides = [1, 1]} : vector<2x512xf32> to vector<2x128xf32>
    %28 = math.tanh %27 : vector<2x128xf32>
    %29 = arith.mulf %25, %11 : vector<2x128xf32>
    %30 = arith.mulf %24, %28 : vector<2x128xf32>
    %31 = arith.addf %29, %30 : vector<2x128xf32>
    %32 = math.tanh %31 : vector<2x128xf32>
    %33 = arith.mulf %26, %32 : vector<2x128xf32>
    %34 = arith.index_cast %c0_i32 : i32 to index
    %c0_17 = arith.constant 0 : index
    %c0_18 = arith.constant 0 : index
    %35 = vector.load %arg15[%34, %c0_17, %c0_18] : memref<8x2x128xf32, #tpu.memory_space<vmem>>, vector<1x2x128xf32>
    %36 = vector.shape_cast %35 : vector<1x2x128xf32> to vector<2x128xf32>
    %37 = vector.shape_cast %33 : vector<2x128xf32> to vector<1x2x128xf32>
    tpu.vector_store %arg15[%34, %c0_17, %c0_18], %37 {strides = array<i32>} : memref<8x2x128xf32, #tpu.memory_space<vmem>>, vector<1x2x128xf32>,
    %c1_i32 = arith.constant 1 : i32
    %38 = arith.index_cast %c1_i32 : i32 to index
    %c0_19 = arith.constant 0 : index
    %c0_20 = arith.constant 0 : index
    %39 = vector.load %arg14[%38, %c0_19, %c0_20] : memref<8x2x512xf32, #tpu.memory_space<vmem>>, vector<1x2x512xf32>
    %40 = vector.shape_cast %39 : vector<1x2x512xf32> to vector<2x512xf32>
    %41 = arith.truncf %33 : vector<2x128xf32> to vector<2x128xbf16>
    %cst_21 = arith.constant dense<0.000000e+00> : vector<2x512xf32>
    %42 = tpu.matmul %41, %9, %cst_21 {dimension_numbers = #tpu.dot_dimension_numbers<[1], [0], [0], [1], [0, 0, 1, 1], [], []>} : vector<2x128xbf16>, vector<128x512xbf16>, vector<2x512xf32> -> vector<2x512xf32>
    %43 = arith.addf %40, %42 : vector<2x512xf32>
    %44 = vector.extract_strided_slice %43 {offsets = [0, 0], sizes = [2, 384], strides = [1, 1]} : vector<2x512xf32> to vector<2x384xf32>
    %45 = arith.negf %44 : vector<2x384xf32>
    %46 = math.exp %45 : vector<2x384xf32>
    %cst_22 = arith.constant 1.000000e+00 : f32
    %47 = vector.broadcast %cst_22 : f32 to vector<2x384xf32>
    %48 = arith.addf %47, %46 : vector<2x384xf32>
    %49 = arith.divf %47, %48 : vector<2x384xf32>
    %50 = vector.extract_strided_slice %49 {offsets = [0, 0], sizes = [2, 128], strides = [1, 1]} : vector<2x384xf32> to vector<2x128xf32>
    %51 = vector.extract_strided_slice %49 {offsets = [0, 128], sizes = [2, 128], strides = [1, 1]} : vector<2x384xf32> to vector<2x128xf32>
    %52 = vector.extract_strided_slice %49 {offsets = [0, 256], sizes = [2, 128], strides = [1, 1]} : vector<2x384xf32> to vector<2x128xf32>
    %53 = vector.extract_strided_slice %43 {offsets = [0, 384], sizes = [2, 128], strides = [1, 1]} : vector<2x512xf32> to vector<2x128xf32>
    %54 = math.tanh %53 : vector<2x128xf32>
    %55 = arith.mulf %51, %31 : vector<2x128xf32>
    %56 = arith.mulf %50, %54 : vector<2x128xf32>
    %57 = arith.addf %55, %56 : vector<2x128xf32>
    %58 = math.tanh %57 : vector<2x128xf32>
    %59 = arith.mulf %52, %58 : vector<2x128xf32>
    %60 = arith.index_cast %c1_i32 : i32 to index
    %c0_23 = arith.constant 0 : index
    %c0_24 = arith.constant 0 : index
    %61 = vector.load %arg15[%60, %c0_23, %c0_24] : memref<8x2x128xf32, #tpu.memory_space<vmem>>, vector<1x2x128xf32>
    %62 = vector.shape_cast %61 : vector<1x2x128xf32> to vector<2x128xf32>
    %63 = vector.shape_cast %59 : vector<2x128xf32> to vector<1x2x128xf32>
    tpu.vector_store %arg15[%60, %c0_23, %c0_24], %63 {strides = array<i32>} : memref<8x2x128xf32, #tpu.memory_space<vmem>>, vector<1x2x128xf32>,
    %c2_i32 = arith.constant 2 : i32
    %64 = arith.index_cast %c2_i32 : i32 to index
    %c0_25 = arith.constant 0 : index
    %c0_26 = arith.constant 0 : index
    %65 = vector.load %arg14[%64, %c0_25, %c0_26] : memref<8x2x512xf32, #tpu.memory_space<vmem>>, vector<1x2x512xf32>
    %66 = vector.shape_cast %65 : vector<1x2x512xf32> to vector<2x512xf32>
    %67 = arith.truncf %59 : vector<2x128xf32> to vector<2x128xbf16>
    %cst_27 = arith.constant dense<0.000000e+00> : vector<2x512xf32>
    %68 = tpu.matmul %67, %9, %cst_27 {dimension_numbers = #tpu.dot_dimension_numbers<[1], [0], [0], [1], [0, 0, 1, 1], [], []>} : vector<2x128xbf16>, vector<128x512xbf16>, vector<2x512xf32> -> vector<2x512xf32>
    %69 = arith.addf %66, %68 : vector<2x512xf32>
    %70 = vector.extract_strided_slice %69 {offsets = [0, 0], sizes = [2, 384], strides = [1, 1]} : vector<2x512xf32> to vector<2x384xf32>
    %71 = arith.negf %70 : vector<2x384xf32>
    %72 = math.exp %71 : vector<2x384xf32>
    %cst_28 = arith.constant 1.000000e+00 : f32
    %73 = vector.broadcast %cst_28 : f32 to vector<2x384xf32>
    %74 = arith.addf %73, %72 : vector<2x384xf32>
    %75 = arith.divf %73, %74 : vector<2x384xf32>
    %76 = vector.extract_strided_slice %75 {offsets = [0, 0], sizes = [2, 128], strides = [1, 1]} : vector<2x384xf32> to vector<2x128xf32>
    %77 = vector.extract_strided_slice %75 {offsets = [0, 128], sizes = [2, 128], strides = [1, 1]} : vector<2x384xf32> to vector<2x128xf32>
    %78 = vector.extract_strided_slice %75 {offsets = [0, 256], sizes = [2, 128], strides = [1, 1]} : vector<2x384xf32> to vector<2x128xf32>
    %79 = vector.extract_strided_slice %69 {offsets = [0, 384], sizes = [2, 128], strides = [1, 1]} : vector<2x512xf32> to vector<2x128xf32>
    %80 = math.tanh %79 : vector<2x128xf32>
    %81 = arith.mulf %77, %57 : vector<2x128xf32>
    %82 = arith.mulf %76, %80 : vector<2x128xf32>
    %83 = arith.addf %81, %82 : vector<2x128xf32>
    %84 = math.tanh %83 : vector<2x128xf32>
    %85 = arith.mulf %78, %84 : vector<2x128xf32>
    %86 = arith.index_cast %c2_i32 : i32 to index
    %c0_29 = arith.constant 0 : index
    %c0_30 = arith.constant 0 : index
    %87 = vector.load %arg15[%86, %c0_29, %c0_30] : memref<8x2x128xf32, #tpu.memory_space<vmem>>, vector<1x2x128xf32>
    %88 = vector.shape_cast %87 : vector<1x2x128xf32> to vector<2x128xf32>
    %89 = vector.shape_cast %85 : vector<2x128xf32> to vector<1x2x128xf32>
    tpu.vector_store %arg15[%86, %c0_29, %c0_30], %89 {strides = array<i32>} : memref<8x2x128xf32, #tpu.memory_space<vmem>>, vector<1x2x128xf32>,
    %c3_i32 = arith.constant 3 : i32
    %90 = arith.index_cast %c3_i32 : i32 to index
    %c0_31 = arith.constant 0 : index
    %c0_32 = arith.constant 0 : index
    %91 = vector.load %arg14[%90, %c0_31, %c0_32] : memref<8x2x512xf32, #tpu.memory_space<vmem>>, vector<1x2x512xf32>
    %92 = vector.shape_cast %91 : vector<1x2x512xf32> to vector<2x512xf32>
    %93 = arith.truncf %85 : vector<2x128xf32> to vector<2x128xbf16>
    %cst_33 = arith.constant dense<0.000000e+00> : vector<2x512xf32>
    %94 = tpu.matmul %93, %9, %cst_33 {dimension_numbers = #tpu.dot_dimension_numbers<[1], [0], [0], [1], [0, 0, 1, 1], [], []>} : vector<2x128xbf16>, vector<128x512xbf16>, vector<2x512xf32> -> vector<2x512xf32>
    %95 = arith.addf %92, %94 : vector<2x512xf32>
    %96 = vector.extract_strided_slice %95 {offsets = [0, 0], sizes = [2, 384], strides = [1, 1]} : vector<2x512xf32> to vector<2x384xf32>
    %97 = arith.negf %96 : vector<2x384xf32>
    %98 = math.exp %97 : vector<2x384xf32>
    %cst_34 = arith.constant 1.000000e+00 : f32
    %99 = vector.broadcast %cst_34 : f32 to vector<2x384xf32>
    %100 = arith.addf %99, %98 : vector<2x384xf32>
    %101 = arith.divf %99, %100 : vector<2x384xf32>
    %102 = vector.extract_strided_slice %101 {offsets = [0, 0], sizes = [2, 128], strides = [1, 1]} : vector<2x384xf32> to vector<2x128xf32>
    %103 = vector.extract_strided_slice %101 {offsets = [0, 128], sizes = [2, 128], strides = [1, 1]} : vector<2x384xf32> to vector<2x128xf32>
    %104 = vector.extract_strided_slice %101 {offsets = [0, 256], sizes = [2, 128], strides = [1, 1]} : vector<2x384xf32> to vector<2x128xf32>
    %105 = vector.extract_strided_slice %95 {offsets = [0, 384], sizes = [2, 128], strides = [1, 1]} : vector<2x512xf32> to vector<2x128xf32>
    %106 = math.tanh %105 : vector<2x128xf32>
    %107 = arith.mulf %103, %83 : vector<2x128xf32>
    %108 = arith.mulf %102, %106 : vector<2x128xf32>
    %109 = arith.addf %107, %108 : vector<2x128xf32>
    %110 = math.tanh %109 : vector<2x128xf32>
    %111 = arith.mulf %104, %110 : vector<2x128xf32>
    %112 = arith.index_cast %c3_i32 : i32 to index
    %c0_35 = arith.constant 0 : index
    %c0_36 = arith.constant 0 : index
    %113 = vector.load %arg15[%112, %c0_35, %c0_36] : memref<8x2x128xf32, #tpu.memory_space<vmem>>, vector<1x2x128xf32>
    %114 = vector.shape_cast %113 : vector<1x2x128xf32> to vector<2x128xf32>
    %115 = vector.shape_cast %111 : vector<2x128xf32> to vector<1x2x128xf32>
    tpu.vector_store %arg15[%112, %c0_35, %c0_36], %115 {strides = array<i32>} : memref<8x2x128xf32, #tpu.memory_space<vmem>>, vector<1x2x128xf32>,
    %c4_i32 = arith.constant 4 : i32
    %116 = arith.index_cast %c4_i32 : i32 to index
    %c0_37 = arith.constant 0 : index
    %c0_38 = arith.constant 0 : index
    %117 = vector.load %arg14[%116, %c0_37, %c0_38] : memref<8x2x512xf32, #tpu.memory_space<vmem>>, vector<1x2x512xf32>
    %118 = vector.shape_cast %117 : vector<1x2x512xf32> to vector<2x512xf32>
    %119 = arith.truncf %111 : vector<2x128xf32> to vector<2x128xbf16>
    %cst_39 = arith.constant dense<0.000000e+00> : vector<2x512xf32>
    %120 = tpu.matmul %119, %9, %cst_39 {dimension_numbers = #tpu.dot_dimension_numbers<[1], [0], [0], [1], [0, 0, 1, 1], [], []>} : vector<2x128xbf16>, vector<128x512xbf16>, vector<2x512xf32> -> vector<2x512xf32>
    %121 = arith.addf %118, %120 : vector<2x512xf32>
    %122 = vector.extract_strided_slice %121 {offsets = [0, 0], sizes = [2, 384], strides = [1, 1]} : vector<2x512xf32> to vector<2x384xf32>
    %123 = arith.negf %122 : vector<2x384xf32>
    %124 = math.exp %123 : vector<2x384xf32>
    %cst_40 = arith.constant 1.000000e+00 : f32
    %125 = vector.broadcast %cst_40 : f32 to vector<2x384xf32>
    %126 = arith.addf %125, %124 : vector<2x384xf32>
    %127 = arith.divf %125, %126 : vector<2x384xf32>
    %128 = vector.extract_strided_slice %127 {offsets = [0, 0], sizes = [2, 128], strides = [1, 1]} : vector<2x384xf32> to vector<2x128xf32>
    %129 = vector.extract_strided_slice %127 {offsets = [0, 128], sizes = [2, 128], strides = [1, 1]} : vector<2x384xf32> to vector<2x128xf32>
    %130 = vector.extract_strided_slice %127 {offsets = [0, 256], sizes = [2, 128], strides = [1, 1]} : vector<2x384xf32> to vector<2x128xf32>
    %131 = vector.extract_strided_slice %121 {offsets = [0, 384], sizes = [2, 128], strides = [1, 1]} : vector<2x512xf32> to vector<2x128xf32>
    %132 = math.tanh %131 : vector<2x128xf32>
    %133 = arith.mulf %129, %109 : vector<2x128xf32>
    %134 = arith.mulf %128, %132 : vector<2x128xf32>
    %135 = arith.addf %133, %134 : vector<2x128xf32>
    %136 = math.tanh %135 : vector<2x128xf32>
    %137 = arith.mulf %130, %136 : vector<2x128xf32>
    %138 = arith.index_cast %c4_i32 : i32 to index
    %c0_41 = arith.constant 0 : index
    %c0_42 = arith.constant 0 : index
    %139 = vector.load %arg15[%138, %c0_41, %c0_42] : memref<8x2x128xf32, #tpu.memory_space<vmem>>, vector<1x2x128xf32>
    %140 = vector.shape_cast %139 : vector<1x2x128xf32> to vector<2x128xf32>
    %141 = vector.shape_cast %137 : vector<2x128xf32> to vector<1x2x128xf32>
    tpu.vector_store %arg15[%138, %c0_41, %c0_42], %141 {strides = array<i32>} : memref<8x2x128xf32, #tpu.memory_space<vmem>>, vector<1x2x128xf32>,
    %c5_i32 = arith.constant 5 : i32
    %142 = arith.index_cast %c5_i32 : i32 to index
    %c0_43 = arith.constant 0 : index
    %c0_44 = arith.constant 0 : index
    %143 = vector.load %arg14[%142, %c0_43, %c0_44] : memref<8x2x512xf32, #tpu.memory_space<vmem>>, vector<1x2x512xf32>
    %144 = vector.shape_cast %143 : vector<1x2x512xf32> to vector<2x512xf32>
    %145 = arith.truncf %137 : vector<2x128xf32> to vector<2x128xbf16>
    %cst_45 = arith.constant dense<0.000000e+00> : vector<2x512xf32>
    %146 = tpu.matmul %145, %9, %cst_45 {dimension_numbers = #tpu.dot_dimension_numbers<[1], [0], [0], [1], [0, 0, 1, 1], [], []>} : vector<2x128xbf16>, vector<128x512xbf16>, vector<2x512xf32> -> vector<2x512xf32>
    %147 = arith.addf %144, %146 : vector<2x512xf32>
    %148 = vector.extract_strided_slice %147 {offsets = [0, 0], sizes = [2, 384], strides = [1, 1]} : vector<2x512xf32> to vector<2x384xf32>
    %149 = arith.negf %148 : vector<2x384xf32>
    %150 = math.exp %149 : vector<2x384xf32>
    %cst_46 = arith.constant 1.000000e+00 : f32
    %151 = vector.broadcast %cst_46 : f32 to vector<2x384xf32>
    %152 = arith.addf %151, %150 : vector<2x384xf32>
    %153 = arith.divf %151, %152 : vector<2x384xf32>
    %154 = vector.extract_strided_slice %153 {offsets = [0, 0], sizes = [2, 128], strides = [1, 1]} : vector<2x384xf32> to vector<2x128xf32>
    %155 = vector.extract_strided_slice %153 {offsets = [0, 128], sizes = [2, 128], strides = [1, 1]} : vector<2x384xf32> to vector<2x128xf32>
    %156 = vector.extract_strided_slice %153 {offsets = [0, 256], sizes = [2, 128], strides = [1, 1]} : vector<2x384xf32> to vector<2x128xf32>
    %157 = vector.extract_strided_slice %147 {offsets = [0, 384], sizes = [2, 128], strides = [1, 1]} : vector<2x512xf32> to vector<2x128xf32>
    %158 = math.tanh %157 : vector<2x128xf32>
    %159 = arith.mulf %155, %135 : vector<2x128xf32>
    %160 = arith.mulf %154, %158 : vector<2x128xf32>
    %161 = arith.addf %159, %160 : vector<2x128xf32>
    %162 = math.tanh %161 : vector<2x128xf32>
    %163 = arith.mulf %156, %162 : vector<2x128xf32>
    %164 = arith.index_cast %c5_i32 : i32 to index
    %c0_47 = arith.constant 0 : index
    %c0_48 = arith.constant 0 : index
    %165 = vector.load %arg15[%164, %c0_47, %c0_48] : memref<8x2x128xf32, #tpu.memory_space<vmem>>, vector<1x2x128xf32>
    %166 = vector.shape_cast %165 : vector<1x2x128xf32> to vector<2x128xf32>
    %167 = vector.shape_cast %163 : vector<2x128xf32> to vector<1x2x128xf32>
    tpu.vector_store %arg15[%164, %c0_47, %c0_48], %167 {strides = array<i32>} : memref<8x2x128xf32, #tpu.memory_space<vmem>>, vector<1x2x128xf32>,
    %c6_i32 = arith.constant 6 : i32
    %168 = arith.index_cast %c6_i32 : i32 to index
    %c0_49 = arith.constant 0 : index
    %c0_50 = arith.constant 0 : index
    %169 = vector.load %arg14[%168, %c0_49, %c0_50] : memref<8x2x512xf32, #tpu.memory_space<vmem>>, vector<1x2x512xf32>
    %170 = vector.shape_cast %169 : vector<1x2x512xf32> to vector<2x512xf32>
    %171 = arith.truncf %163 : vector<2x128xf32> to vector<2x128xbf16>
    %cst_51 = arith.constant dense<0.000000e+00> : vector<2x512xf32>
    %172 = tpu.matmul %171, %9, %cst_51 {dimension_numbers = #tpu.dot_dimension_numbers<[1], [0], [0], [1], [0, 0, 1, 1], [], []>} : vector<2x128xbf16>, vector<128x512xbf16>, vector<2x512xf32> -> vector<2x512xf32>
    %173 = arith.addf %170, %172 : vector<2x512xf32>
    %174 = vector.extract_strided_slice %173 {offsets = [0, 0], sizes = [2, 384], strides = [1, 1]} : vector<2x512xf32> to vector<2x384xf32>
    %175 = arith.negf %174 : vector<2x384xf32>
    %176 = math.exp %175 : vector<2x384xf32>
    %cst_52 = arith.constant 1.000000e+00 : f32
    %177 = vector.broadcast %cst_52 : f32 to vector<2x384xf32>
    %178 = arith.addf %177, %176 : vector<2x384xf32>
    %179 = arith.divf %177, %178 : vector<2x384xf32>
    %180 = vector.extract_strided_slice %179 {offsets = [0, 0], sizes = [2, 128], strides = [1, 1]} : vector<2x384xf32> to vector<2x128xf32>
    %181 = vector.extract_strided_slice %179 {offsets = [0, 128], sizes = [2, 128], strides = [1, 1]} : vector<2x384xf32> to vector<2x128xf32>
    %182 = vector.extract_strided_slice %179 {offsets = [0, 256], sizes = [2, 128], strides = [1, 1]} : vector<2x384xf32> to vector<2x128xf32>
    %183 = vector.extract_strided_slice %173 {offsets = [0, 384], sizes = [2, 128], strides = [1, 1]} : vector<2x512xf32> to vector<2x128xf32>
    %184 = math.tanh %183 : vector<2x128xf32>
    %185 = arith.mulf %181, %161 : vector<2x128xf32>
    %186 = arith.mulf %180, %184 : vector<2x128xf32>
    %187 = arith.addf %185, %186 : vector<2x128xf32>
    %188 = math.tanh %187 : vector<2x128xf32>
    %189 = arith.mulf %182, %188 : vector<2x128xf32>
    %190 = arith.index_cast %c6_i32 : i32 to index
    %c0_53 = arith.constant 0 : index
    %c0_54 = arith.constant 0 : index
    %191 = vector.load %arg15[%190, %c0_53, %c0_54] : memref<8x2x128xf32, #tpu.memory_space<vmem>>, vector<1x2x128xf32>
    %192 = vector.shape_cast %191 : vector<1x2x128xf32> to vector<2x128xf32>
    %193 = vector.shape_cast %189 : vector<2x128xf32> to vector<1x2x128xf32>
    tpu.vector_store %arg15[%190, %c0_53, %c0_54], %193 {strides = array<i32>} : memref<8x2x128xf32, #tpu.memory_space<vmem>>, vector<1x2x128xf32>,
    %c7_i32 = arith.constant 7 : i32
    %194 = arith.index_cast %c7_i32 : i32 to index
    %c0_55 = arith.constant 0 : index
    %c0_56 = arith.constant 0 : index
    %195 = vector.load %arg14[%194, %c0_55, %c0_56] : memref<8x2x512xf32, #tpu.memory_space<vmem>>, vector<1x2x512xf32>
    %196 = vector.shape_cast %195 : vector<1x2x512xf32> to vector<2x512xf32>
    %197 = arith.truncf %189 : vector<2x128xf32> to vector<2x128xbf16>
    %cst_57 = arith.constant dense<0.000000e+00> : vector<2x512xf32>
    %198 = tpu.matmul %197, %9, %cst_57 {dimension_numbers = #tpu.dot_dimension_numbers<[1], [0], [0], [1], [0, 0, 1, 1], [], []>} : vector<2x128xbf16>, vector<128x512xbf16>, vector<2x512xf32> -> vector<2x512xf32>
    %199 = arith.addf %196, %198 : vector<2x512xf32>
    %200 = vector.extract_strided_slice %199 {offsets = [0, 0], sizes = [2, 384], strides = [1, 1]} : vector<2x512xf32> to vector<2x384xf32>
    %201 = arith.negf %200 : vector<2x384xf32>
    %202 = math.exp %201 : vector<2x384xf32>
    %cst_58 = arith.constant 1.000000e+00 : f32
    %203 = vector.broadcast %cst_58 : f32 to vector<2x384xf32>
    %204 = arith.addf %203, %202 : vector<2x384xf32>
    %205 = arith.divf %203, %204 : vector<2x384xf32>
    %206 = vector.extract_strided_slice %205 {offsets = [0, 0], sizes = [2, 128], strides = [1, 1]} : vector<2x384xf32> to vector<2x128xf32>
    %207 = vector.extract_strided_slice %205 {offsets = [0, 128], sizes = [2, 128], strides = [1, 1]} : vector<2x384xf32> to vector<2x128xf32>
    %208 = vector.extract_strided_slice %205 {offsets = [0, 256], sizes = [2, 128], strides = [1, 1]} : vector<2x384xf32> to vector<2x128xf32>
    %209 = vector.extract_strided_slice %199 {offsets = [0, 384], sizes = [2, 128], strides = [1, 1]} : vector<2x512xf32> to vector<2x128xf32>
    %210 = math.tanh %209 : vector<2x128xf32>
    %211 = arith.mulf %207, %187 : vector<2x128xf32>
    %212 = arith.mulf %206, %210 : vector<2x128xf32>
    %213 = arith.addf %211, %212 : vector<2x128xf32>
    %214 = math.tanh %213 : vector<2x128xf32>
    %215 = arith.mulf %208, %214 : vector<2x128xf32>
    %216 = arith.index_cast %c7_i32 : i32 to index
    %c0_59 = arith.constant 0 : index
    %c0_60 = arith.constant 0 : index
    %217 = vector.load %arg15[%216, %c0_59, %c0_60] : memref<8x2x128xf32, #tpu.memory_space<vmem>>, vector<1x2x128xf32>
    %218 = vector.shape_cast %217 : vector<1x2x128xf32> to vector<2x128xf32>
    %219 = vector.shape_cast %215 : vector<2x128xf32> to vector<1x2x128xf32>
    tpu.vector_store %arg15[%216, %c0_59, %c0_60], %219 {strides = array<i32>} : memref<8x2x128xf32, #tpu.memory_space<vmem>>, vector<1x2x128xf32>,
    %c8_i32 = arith.constant 8 : i32
    %c0_61 = arith.constant 0 : index
    %c0_62 = arith.constant 0 : index
    %c0_63 = arith.constant 0 : index
    %220 = vector.load %arg15[%c0_61, %c0_62, %c0_63] : memref<8x2x128xf32, #tpu.memory_space<vmem>>, vector<8x2x128xf32>
    %221 = vector.extract_strided_slice %220 {offsets = [0, 0, 0], sizes = [8, 2, 64], strides = [1, 1, 1]} : vector<8x2x128xf32> to vector<8x2x64xf32>
    %222 = vector.extract_strided_slice %220 {offsets = [0, 0, 64], sizes = [8, 2, 64], strides = [1, 1, 1]} : vector<8x2x128xf32> to vector<8x2x64xf32>
    %223 = vector.extract_strided_slice %221 {offsets = [0, 0, 0], sizes = [1, 2, 64], strides = [1, 1, 1]} : vector<8x2x64xf32> to vector<1x2x64xf32>
    %224 = vector.shape_cast %223 : vector<1x2x64xf32> to vector<2x64xf32>
    %225 = vector.extract_strided_slice %222 {offsets = [7, 0, 0], sizes = [1, 2, 64], strides = [1, 1, 1]} : vector<8x2x64xf32> to vector<1x2x64xf32>
    %226 = vector.shape_cast %225 : vector<1x2x64xf32> to vector<2x64xf32>
    %227 = tpu.concatenate %224, %226 in 1 : vector<2x64xf32>, vector<2x64xf32> -> vector<2x128xf32>
    %228 = vector.shape_cast %227 : vector<2x128xf32> to vector<2x1x128xf32>
    %c0_64 = arith.constant 0 : index
    %c0_65 = arith.constant 0 : index
    %c0_66 = arith.constant 0 : index
    %229 = vector.load %arg16[%c0_64, %c0_65, %c0_66] : memref<2x8x128xf32, #tpu.memory_space<vmem>>, vector<2x1x128xf32>
    tpu.vector_store %arg16[%c0_64, %c0_65, %c0_66], %228 {strides = array<i32>} : memref<2x8x128xf32, #tpu.memory_space<vmem>>, vector<2x1x128xf32>,
    %230 = vector.extract_strided_slice %221 {offsets = [1, 0, 0], sizes = [1, 2, 64], strides = [1, 1, 1]} : vector<8x2x64xf32> to vector<1x2x64xf32>
    %231 = vector.shape_cast %230 : vector<1x2x64xf32> to vector<2x64xf32>
    %232 = vector.extract_strided_slice %222 {offsets = [6, 0, 0], sizes = [1, 2, 64], strides = [1, 1, 1]} : vector<8x2x64xf32> to vector<1x2x64xf32>
    %233 = vector.shape_cast %232 : vector<1x2x64xf32> to vector<2x64xf32>
    %234 = tpu.concatenate %231, %233 in 1 : vector<2x64xf32>, vector<2x64xf32> -> vector<2x128xf32>
    %235 = vector.shape_cast %234 : vector<2x128xf32> to vector<2x1x128xf32>
    %c0_67 = arith.constant 0 : index
    %c1 = arith.constant 1 : index
    %c0_68 = arith.constant 0 : index
    %236 = vector.load %arg16[%c0_67, %c1, %c0_68] : memref<2x8x128xf32, #tpu.memory_space<vmem>>, vector<2x1x128xf32>
    tpu.vector_store %arg16[%c0_67, %c1, %c0_68], %235 {strides = array<i32>} : memref<2x8x128xf32, #tpu.memory_space<vmem>>, vector<2x1x128xf32>,
    %237 = vector.extract_strided_slice %221 {offsets = [2, 0, 0], sizes = [1, 2, 64], strides = [1, 1, 1]} : vector<8x2x64xf32> to vector<1x2x64xf32>
    %238 = vector.shape_cast %237 : vector<1x2x64xf32> to vector<2x64xf32>
    %239 = vector.extract_strided_slice %222 {offsets = [5, 0, 0], sizes = [1, 2, 64], strides = [1, 1, 1]} : vector<8x2x64xf32> to vector<1x2x64xf32>
    %240 = vector.shape_cast %239 : vector<1x2x64xf32> to vector<2x64xf32>
    %241 = tpu.concatenate %238, %240 in 1 : vector<2x64xf32>, vector<2x64xf32> -> vector<2x128xf32>
    %242 = vector.shape_cast %241 : vector<2x128xf32> to vector<2x1x128xf32>
    %c0_69 = arith.constant 0 : index
    %c2 = arith.constant 2 : index
    %c0_70 = arith.constant 0 : index
    %243 = vector.load %arg16[%c0_69, %c2, %c0_70] : memref<2x8x128xf32, #tpu.memory_space<vmem>>, vector<2x1x128xf32>
    tpu.vector_store %arg16[%c0_69, %c2, %c0_70], %242 {strides = array<i32>} : memref<2x8x128xf32, #tpu.memory_space<vmem>>, vector<2x1x128xf32>,
    %244 = vector.extract_strided_slice %221 {offsets = [3, 0, 0], sizes = [1, 2, 64], strides = [1, 1, 1]} : vector<8x2x64xf32> to vector<1x2x64xf32>
    %245 = vector.shape_cast %244 : vector<1x2x64xf32> to vector<2x64xf32>
    %246 = vector.extract_strided_slice %222 {offsets = [4, 0, 0], sizes = [1, 2, 64], strides = [1, 1, 1]} : vector<8x2x64xf32> to vector<1x2x64xf32>
    %247 = vector.shape_cast %246 : vector<1x2x64xf32> to vector<2x64xf32>
    %248 = tpu.concatenate %245, %247 in 1 : vector<2x64xf32>, vector<2x64xf32> -> vector<2x128xf32>
    %249 = vector.shape_cast %248 : vector<2x128xf32> to vector<2x1x128xf32>
    %c0_71 = arith.constant 0 : index
    %c3 = arith.constant 3 : index
    %c0_72 = arith.constant 0 : index
    %250 = vector.load %arg16[%c0_71, %c3, %c0_72] : memref<2x8x128xf32, #tpu.memory_space<vmem>>, vector<2x1x128xf32>
    tpu.vector_store %arg16[%c0_71, %c3, %c0_72], %249 {strides = array<i32>} : memref<2x8x128xf32, #tpu.memory_space<vmem>>, vector<2x1x128xf32>,
    %251 = vector.extract_strided_slice %221 {offsets = [4, 0, 0], sizes = [1, 2, 64], strides = [1, 1, 1]} : vector<8x2x64xf32> to vector<1x2x64xf32>
    %252 = vector.shape_cast %251 : vector<1x2x64xf32> to vector<2x64xf32>
    %253 = vector.extract_strided_slice %222 {offsets = [3, 0, 0], sizes = [1, 2, 64], strides = [1, 1, 1]} : vector<8x2x64xf32> to vector<1x2x64xf32>
    %254 = vector.shape_cast %253 : vector<1x2x64xf32> to vector<2x64xf32>
    %255 = tpu.concatenate %252, %254 in 1 : vector<2x64xf32>, vector<2x64xf32> -> vector<2x128xf32>
    %256 = vector.shape_cast %255 : vector<2x128xf32> to vector<2x1x128xf32>
    %c0_73 = arith.constant 0 : index
    %c4 = arith.constant 4 : index
    %c0_74 = arith.constant 0 : index
    %257 = vector.load %arg16[%c0_73, %c4, %c0_74] : memref<2x8x128xf32, #tpu.memory_space<vmem>>, vector<2x1x128xf32>
    tpu.vector_store %arg16[%c0_73, %c4, %c0_74], %256 {strides = array<i32>} : memref<2x8x128xf32, #tpu.memory_space<vmem>>, vector<2x1x128xf32>,
    %258 = vector.extract_strided_slice %221 {offsets = [5, 0, 0], sizes = [1, 2, 64], strides = [1, 1, 1]} : vector<8x2x64xf32> to vector<1x2x64xf32>
    %259 = vector.shape_cast %258 : vector<1x2x64xf32> to vector<2x64xf32>
    %260 = vector.extract_strided_slice %222 {offsets = [2, 0, 0], sizes = [1, 2, 64], strides = [1, 1, 1]} : vector<8x2x64xf32> to vector<1x2x64xf32>
    %261 = vector.shape_cast %260 : vector<1x2x64xf32> to vector<2x64xf32>
    %262 = tpu.concatenate %259, %261 in 1 : vector<2x64xf32>, vector<2x64xf32> -> vector<2x128xf32>
    %263 = vector.shape_cast %262 : vector<2x128xf32> to vector<2x1x128xf32>
    %c0_75 = arith.constant 0 : index
    %c5 = arith.constant 5 : index
    %c0_76 = arith.constant 0 : index
    %264 = vector.load %arg16[%c0_75, %c5, %c0_76] : memref<2x8x128xf32, #tpu.memory_space<vmem>>, vector<2x1x128xf32>
    tpu.vector_store %arg16[%c0_75, %c5, %c0_76], %263 {strides = array<i32>} : memref<2x8x128xf32, #tpu.memory_space<vmem>>, vector<2x1x128xf32>,
    %265 = vector.extract_strided_slice %221 {offsets = [6, 0, 0], sizes = [1, 2, 64], strides = [1, 1, 1]} : vector<8x2x64xf32> to vector<1x2x64xf32>
    %266 = vector.shape_cast %265 : vector<1x2x64xf32> to vector<2x64xf32>
    %267 = vector.extract_strided_slice %222 {offsets = [1, 0, 0], sizes = [1, 2, 64], strides = [1, 1, 1]} : vector<8x2x64xf32> to vector<1x2x64xf32>
    %268 = vector.shape_cast %267 : vector<1x2x64xf32> to vector<2x64xf32>
    %269 = tpu.concatenate %266, %268 in 1 : vector<2x64xf32>, vector<2x64xf32> -> vector<2x128xf32>
    %270 = vector.shape_cast %269 : vector<2x128xf32> to vector<2x1x128xf32>
    %c0_77 = arith.constant 0 : index
    %c6 = arith.constant 6 : index
    %c0_78 = arith.constant 0 : index
    %271 = vector.load %arg16[%c0_77, %c6, %c0_78] : memref<2x8x128xf32, #tpu.memory_space<vmem>>, vector<2x1x128xf32>
    tpu.vector_store %arg16[%c0_77, %c6, %c0_78], %270 {strides = array<i32>} : memref<2x8x128xf32, #tpu.memory_space<vmem>>, vector<2x1x128xf32>,
    %272 = vector.extract_strided_slice %221 {offsets = [7, 0, 0], sizes = [1, 2, 64], strides = [1, 1, 1]} : vector<8x2x64xf32> to vector<1x2x64xf32>
    %273 = vector.shape_cast %272 : vector<1x2x64xf32> to vector<2x64xf32>
    %274 = vector.extract_strided_slice %222 {offsets = [0, 0, 0], sizes = [1, 2, 64], strides = [1, 1, 1]} : vector<8x2x64xf32> to vector<1x2x64xf32>
    %275 = vector.shape_cast %274 : vector<1x2x64xf32> to vector<2x64xf32>
    %276 = tpu.concatenate %273, %275 in 1 : vector<2x64xf32>, vector<2x64xf32> -> vector<2x128xf32>
    %277 = vector.shape_cast %276 : vector<2x128xf32> to vector<2x1x128xf32>
    %c0_79 = arith.constant 0 : index
    %c7 = arith.constant 7 : index
    %c0_80 = arith.constant 0 : index
    %278 = vector.load %arg16[%c0_79, %c7, %c0_80] : memref<2x8x128xf32, #tpu.memory_space<vmem>>, vector<2x1x128xf32>
    tpu.vector_store %arg16[%c0_79, %c7, %c0_80], %277 {strides = array<i32>} : memref<2x8x128xf32, #tpu.memory_space<vmem>>, vector<2x1x128xf32>,
    %c0_81 = arith.constant 0 : index
    %c0_82 = arith.constant 0 : index
    %c0_83 = arith.constant 0 : index
    %279 = vector.load %arg16[%c0_81, %c0_82, %c0_83] : memref<2x8x128xf32, #tpu.memory_space<vmem>>, vector<2x8x128xf32>
    %280 = vector.shape_cast %279 : vector<2x8x128xf32> to vector<16x128xf32>
    %281 = arith.truncf %280 : vector<16x128xf32> to vector<16x128xbf16>
    %c0_84 = arith.constant 0 : index
    %c0_85 = arith.constant 0 : index
    %282 = vector.load %arg5[%c0_84, %c0_85] : memref<128x384xbf16, #tpu.memory_space<vmem>>, vector<128x384xbf16>
    %cst_86 = arith.constant dense<0.000000e+00> : vector<16x384xf32>
    %283 = tpu.matmul %281, %282, %cst_86 {dimension_numbers = #tpu.dot_dimension_numbers<[1], [0], [0], [1], [0, 0, 1, 1], [], []>} : vector<16x128xbf16>, vector<128x384xbf16>, vector<16x384xf32> -> vector<16x384xf32>
    %c0_87 = arith.constant 0 : index
    %c0_88 = arith.constant 0 : index
    %284 = vector.load %arg6[%c0_87, %c0_88] : memref<1x384xf32, #tpu.memory_space<vmem>>, vector<1x384xf32>
    %285 = vector.broadcast %284 : vector<1x384xf32> to vector<16x384xf32>
    %286 = arith.addf %283, %285 : vector<16x384xf32>
    %287 = vector.extract_strided_slice %286 {offsets = [0, 0], sizes = [16, 128], strides = [1, 1]} : vector<16x384xf32> to vector<16x128xf32>
    %288 = vector.shape_cast %287 : vector<16x128xf32> to vector<2x8x128xf32>
    %289 = vector.extract_strided_slice %286 {offsets = [0, 128], sizes = [16, 128], strides = [1, 1]} : vector<16x384xf32> to vector<16x128xf32>
    %290 = vector.shape_cast %289 : vector<16x128xf32> to vector<2x8x128xf32>
    %291 = vector.extract_strided_slice %286 {offsets = [0, 256], sizes = [16, 128], strides = [1, 1]} : vector<16x384xf32> to vector<16x128xf32>
    %292 = vector.shape_cast %291 : vector<16x128xf32> to vector<2x8x128xf32>
    %293 = vector.extract_strided_slice %288 {offsets = [0, 0, 0], sizes = [2, 8, 32], strides = [1, 1, 1]} : vector<2x8x128xf32> to vector<2x8x32xf32>
    %294 = vector.extract_strided_slice %288 {offsets = [0, 0, 32], sizes = [2, 8, 32], strides = [1, 1, 1]} : vector<2x8x128xf32> to vector<2x8x32xf32>
    %295 = vector.extract_strided_slice %288 {offsets = [0, 0, 64], sizes = [2, 8, 32], strides = [1, 1, 1]} : vector<2x8x128xf32> to vector<2x8x32xf32>
    %296 = vector.extract_strided_slice %288 {offsets = [0, 0, 96], sizes = [2, 8, 32], strides = [1, 1, 1]} : vector<2x8x128xf32> to vector<2x8x32xf32>
    %297 = tpu.concatenate %293, %294, %295, %296 in 0 : vector<2x8x32xf32>, vector<2x8x32xf32>, vector<2x8x32xf32>, vector<2x8x32xf32> -> vector<8x8x32xf32>
    %298 = arith.truncf %297 : vector<8x8x32xf32> to vector<8x8x32xbf16>
    %299 = vector.extract_strided_slice %290 {offsets = [0, 0, 0], sizes = [2, 8, 32], strides = [1, 1, 1]} : vector<2x8x128xf32> to vector<2x8x32xf32>
    %300 = vector.extract_strided_slice %290 {offsets = [0, 0, 32], sizes = [2, 8, 32], strides = [1, 1, 1]} : vector<2x8x128xf32> to vector<2x8x32xf32>
    %301 = vector.extract_strided_slice %290 {offsets = [0, 0, 64], sizes = [2, 8, 32], strides = [1, 1, 1]} : vector<2x8x128xf32> to vector<2x8x32xf32>
    %302 = vector.extract_strided_slice %290 {offsets = [0, 0, 96], sizes = [2, 8, 32], strides = [1, 1, 1]} : vector<2x8x128xf32> to vector<2x8x32xf32>
    %303 = tpu.concatenate %299, %300, %301, %302 in 0 : vector<2x8x32xf32>, vector<2x8x32xf32>, vector<2x8x32xf32>, vector<2x8x32xf32> -> vector<8x8x32xf32>
    %304 = arith.truncf %303 : vector<8x8x32xf32> to vector<8x8x32xbf16>
    %305 = vector.extract_strided_slice %292 {offsets = [0, 0, 0], sizes = [2, 8, 32], strides = [1, 1, 1]} : vector<2x8x128xf32> to vector<2x8x32xf32>
    %306 = vector.extract_strided_slice %292 {offsets = [0, 0, 32], sizes = [2, 8, 32], strides = [1, 1, 1]} : vector<2x8x128xf32> to vector<2x8x32xf32>
    %307 = vector.extract_strided_slice %292 {offsets = [0, 0, 64], sizes = [2, 8, 32], strides = [1, 1, 1]} : vector<2x8x128xf32> to vector<2x8x32xf32>
    %308 = vector.extract_strided_slice %292 {offsets = [0, 0, 96], sizes = [2, 8, 32], strides = [1, 1, 1]} : vector<2x8x128xf32> to vector<2x8x32xf32>
    %309 = tpu.concatenate %305, %306, %307, %308 in 0 : vector<2x8x32xf32>, vector<2x8x32xf32>, vector<2x8x32xf32>, vector<2x8x32xf32> -> vector<8x8x32xf32>
    %310 = arith.truncf %309 : vector<8x8x32xf32> to vector<8x8x32xbf16>
    "tpu.trace_start"() <{level = 10 : i32, message = "bqd,bkd->bqk"}> : () -> ()
    %cst_89 = arith.constant dense<0.000000e+00> : vector<8x8x8xf32>
    %311 = tpu.matmul %298, %304, %cst_89 {dimension_numbers = #tpu.dot_dimension_numbers<[2], [2], [1], [1], [0, 0, 0, 1, 1, 1], [0], [0]>} : vector<8x8x32xbf16>, vector<8x8x32xbf16>, vector<8x8x8xf32> -> vector<8x8x8xf32>
    "tpu.trace_stop"() : () -> ()
    %cst_90 = arith.constant dense<0xFF800000> : vector<8x8xf32>
    %312 = vector.multi_reduction <maximumf>, %311, %cst_90 [2] : vector<8x8x8xf32> to vector<8x8xf32>
    %313 = vector.shape_cast %312 : vector<8x8xf32> to vector<8x8x1xf32>
    %314 = vector.broadcast %313 : vector<8x8x1xf32> to vector<8x8x8xf32>
    %315 = arith.subf %311, %314 : vector<8x8x8xf32>
    %316 = math.exp %315 : vector<8x8x8xf32>
    %cst_91 = arith.constant dense<0.000000e+00> : vector<8x8xf32>
    %317 = vector.multi_reduction <add>, %316, %cst_91 [2] : vector<8x8x8xf32> to vector<8x8xf32>
    %318 = vector.shape_cast %317 : vector<8x8xf32> to vector<8x8x1xf32>
    %319 = tpu.reciprocal %318 {approx = true} : vector<8x8x1xf32> -> vector<8x8x1xf32>
    %320 = vector.broadcast %319 : vector<8x8x1xf32> to vector<8x8x8xf32>
    %321 = arith.mulf %316, %320 : vector<8x8x8xf32>
    %cst_92 = arith.constant dense<0.000000e+00> : vector<8x8xf32>
    %322 = vector.multi_reduction <add>, %321, %cst_92 [1] : vector<8x8x8xf32> to vector<8x8xf32>
    %323 = vector.shape_cast %322 : vector<8x8xf32> to vector<8x1x8xf32>
    %cst_93 = arith.constant 8.000000e+00 : f32
    %324 = vector.broadcast %cst_93 : f32 to vector<8x1x8xf32>
    %325 = arith.divf %323, %324 : vector<8x1x8xf32>
    %326 = arith.truncf %325 : vector<8x1x8xf32> to vector<8x1x8xbf16>
    "tpu.trace_start"() <{level = 10 : i32, message = "bqk,bkd->bqd"}> : () -> ()
    %cst_94 = arith.constant dense<0.000000e+00> : vector<8x1x32xf32>
    %327 = tpu.matmul %326, %310, %cst_94 {dimension_numbers = #tpu.dot_dimension_numbers<[2], [1], [1], [2], [0, 0, 0, 1, 1, 2], [0], [0]>} : vector<8x1x8xbf16>, vector<8x8x32xbf16>, vector<8x1x32xf32> -> vector<8x1x32xf32>
    "tpu.trace_stop"() : () -> ()
    %328 = vector.extract_strided_slice %327 {offsets = [0, 0, 0], sizes = [2, 1, 32], strides = [1, 1, 1]} : vector<8x1x32xf32> to vector<2x1x32xf32>
    %329 = vector.shape_cast %328 : vector<2x1x32xf32> to vector<2x32xf32>
    %330 = vector.extract_strided_slice %327 {offsets = [2, 0, 0], sizes = [2, 1, 32], strides = [1, 1, 1]} : vector<8x1x32xf32> to vector<2x1x32xf32>
    %331 = vector.shape_cast %330 : vector<2x1x32xf32> to vector<2x32xf32>
    %332 = vector.extract_strided_slice %327 {offsets = [4, 0, 0], sizes = [2, 1, 32], strides = [1, 1, 1]} : vector<8x1x32xf32> to vector<2x1x32xf32>
    %333 = vector.shape_cast %332 : vector<2x1x32xf32> to vector<2x32xf32>
    %334 = vector.extract_strided_slice %327 {offsets = [6, 0, 0], sizes = [2, 1, 32], strides = [1, 1, 1]} : vector<8x1x32xf32> to vector<2x1x32xf32>
    %335 = vector.shape_cast %334 : vector<2x1x32xf32> to vector<2x32xf32>
    %336 = tpu.concatenate %329, %331, %333, %335 in 1 : vector<2x32xf32>, vector<2x32xf32>, vector<2x32xf32>, vector<2x32xf32> -> vector<2x128xf32>
    %337 = arith.truncf %336 : vector<2x128xf32> to vector<2x128xbf16>
    %c0_95 = arith.constant 0 : index
    %c0_96 = arith.constant 0 : index
    %338 = vector.load %arg7[%c0_95, %c0_96] : memref<128x128xbf16, #tpu.memory_space<vmem>>, vector<128x128xbf16>
    %cst_97 = arith.constant dense<0.000000e+00> : vector<2x128xf32>
    %339 = tpu.matmul %337, %338, %cst_97 {dimension_numbers = #tpu.dot_dimension_numbers<[1], [0], [0], [1], [0, 0, 1, 1], [], []>} : vector<2x128xbf16>, vector<128x128xbf16>, vector<2x128xf32> -> vector<2x128xf32>
    %c0_98 = arith.constant 0 : index
    %c0_99 = arith.constant 0 : index
    %340 = vector.load %arg8[%c0_98, %c0_99] : memref<1x128xf32, #tpu.memory_space<vmem>>, vector<1x128xf32>
    %341 = vector.broadcast %340 : vector<1x128xf32> to vector<2x128xf32>
    %342 = arith.addf %339, %341 : vector<2x128xf32>
    %343 = arith.truncf %342 : vector<2x128xf32> to vector<2x128xbf16>
    %c0_100 = arith.constant 0 : index
    %c0_101 = arith.constant 0 : index
    %344 = vector.load %arg9[%c0_100, %c0_101] : memref<128x32xbf16, #tpu.memory_space<vmem>>, vector<128x32xbf16>
    %cst_102 = arith.constant dense<0.000000e+00> : vector<2x32xf32>
    %345 = tpu.matmul %343, %344, %cst_102 {dimension_numbers = #tpu.dot_dimension_numbers<[1], [0], [0], [1], [0, 0, 1, 1], [], []>} : vector<2x128xbf16>, vector<128x32xbf16>, vector<2x32xf32> -> vector<2x32xf32>
    %c0_103 = arith.constant 0 : index
    %c0_104 = arith.constant 0 : index
    %346 = vector.load %arg10[%c0_103, %c0_104] : memref<1x32xf32, #tpu.memory_space<vmem>>, vector<1x32xf32>
    %347 = vector.broadcast %346 : vector<1x32xf32> to vector<2x32xf32>
    %348 = arith.addf %345, %347 : vector<2x32xf32>
    %cst_105 = arith.constant 0.000000e+00 : f32
    %349 = vector.broadcast %cst_105 : f32 to vector<2x32xf32>
    %350 = arith.maximumf %348, %349 : vector<2x32xf32>
    %351 = arith.truncf %350 : vector<2x32xf32> to vector<2x32xbf16>
    %c0_106 = arith.constant 0 : index
    %c0_107 = arith.constant 0 : index
    %352 = vector.load %arg11[%c0_106, %c0_107] : memref<32x128xbf16, #tpu.memory_space<vmem>>, vector<32x128xbf16>
    %cst_108 = arith.constant dense<0.000000e+00> : vector<2x128xf32>
    %353 = tpu.matmul %351, %352, %cst_108 {dimension_numbers = #tpu.dot_dimension_numbers<[1], [0], [0], [1], [0, 0, 1, 1], [], []>} : vector<2x32xbf16>, vector<32x128xbf16>, vector<2x128xf32> -> vector<2x128xf32>
    %c0_109 = arith.constant 0 : index
    %c0_110 = arith.constant 0 : index
    %354 = vector.load %arg12[%c0_109, %c0_110] : memref<1x128xf32, #tpu.memory_space<vmem>>, vector<1x128xf32>
    %355 = vector.broadcast %354 : vector<1x128xf32> to vector<2x128xf32>
    %356 = arith.addf %353, %355 : vector<2x128xf32>
    %cst_111 = arith.constant dense<0xFF800000> : vector<2xf32>
    %357 = vector.multi_reduction <maximumf>, %356, %cst_111 [1] : vector<2x128xf32> to vector<2xf32>
    %358 = vector.shape_cast %357 : vector<2xf32> to vector<2x1xf32>
    %359 = vector.broadcast %358 : vector<2x1xf32> to vector<2x128xf32>
    %360 = arith.subf %356, %359 : vector<2x128xf32>
    %361 = math.exp %360 : vector<2x128xf32>
    %cst_112 = arith.constant dense<0.000000e+00> : vector<2xf32>
    %362 = vector.multi_reduction <add>, %361, %cst_112 [1] : vector<2x128xf32> to vector<2xf32>
    %363 = vector.shape_cast %362 : vector<2xf32> to vector<2x1xf32>
    %364 = vector.broadcast %363 : vector<2x1xf32> to vector<2x128xf32>
    %365 = arith.divf %361, %364 : vector<2x128xf32>
    %c0_113 = arith.constant 0 : index
    %c0_114 = arith.constant 0 : index
    %366 = vector.load %arg13[%c0_113, %c0_114] : memref<2x128xf32, #tpu.memory_space<vmem>>, vector<2x128xf32>
    tpu.vector_store %arg13[%c0_113, %c0_114], %365 {strides = array<i32>} : memref<2x128xf32, #tpu.memory_space<vmem>>, vector<2x128xf32>,
    return
  }
  func.func @transform_0(%arg0: i32) -> (i32, i32, i32) {
    %c0_i32 = arith.constant 0 : i32
    %c0_i32_0 = arith.constant 0 : i32
    %c0_i32_1 = arith.constant 0 : i32
    return %c0_i32, %arg0, %c0_i32_0 : i32, i32, i32
  }
  func.func @transform_1(%arg0: i32) -> (i32, i32) {
    %c0_i32 = arith.constant 0 : i32
    %c0_i32_0 = arith.constant 0 : i32
    %c0_i32_1 = arith.constant 0 : i32
    return %c0_i32, %c0_i32_0 : i32, i32
  }
  func.func @transform_2(%arg0: i32) -> (i32, i32) {
    %c0_i32 = arith.constant 0 : i32
    %c0_i32_0 = arith.constant 0 : i32
    %c0_i32_1 = arith.constant 0 : i32
    return %c0_i32, %c0_i32_0 : i32, i32
  }
  func.func @transform_3(%arg0: i32) -> (i32, i32) {
    %c0_i32 = arith.constant 0 : i32
    %c0_i32_0 = arith.constant 0 : i32
    %c0_i32_1 = arith.constant 0 : i32
    return %c0_i32, %c0_i32_0 : i32, i32
  }
  func.func @transform_4(%arg0: i32) -> (i32, i32) {
    %c0_i32 = arith.constant 0 : i32
    %c0_i32_0 = arith.constant 0 : i32
    %c0_i32_1 = arith.constant 0 : i32
    return %c0_i32, %c0_i32_0 : i32, i32
  }
  func.func @transform_5(%arg0: i32) -> (i32, i32) {
    %c0_i32 = arith.constant 0 : i32
    %c0_i32_0 = arith.constant 0 : i32
    %c0_i32_1 = arith.constant 0 : i32
    return %c0_i32, %c0_i32_0 : i32, i32
  }
  func.func @transform_6(%arg0: i32) -> (i32, i32) {
    %c0_i32 = arith.constant 0 : i32
    %c0_i32_0 = arith.constant 0 : i32
    %c0_i32_1 = arith.constant 0 : i32
    return %c0_i32, %c0_i32_0 : i32, i32
  }
  func.func @transform_7(%arg0: i32) -> (i32, i32) {
    %c0_i32 = arith.constant 0 : i32
    %c0_i32_0 = arith.constant 0 : i32
    %c0_i32_1 = arith.constant 0 : i32
    return %c0_i32, %c0_i32_0 : i32, i32
  }
  func.func @transform_8(%arg0: i32) -> (i32, i32) {
    %c0_i32 = arith.constant 0 : i32
    %c0_i32_0 = arith.constant 0 : i32
    %c0_i32_1 = arith.constant 0 : i32
    return %c0_i32, %c0_i32_0 : i32, i32
  }
  func.func @transform_9(%arg0: i32) -> (i32, i32) {
    %c0_i32 = arith.constant 0 : i32
    %c0_i32_0 = arith.constant 0 : i32
    %c0_i32_1 = arith.constant 0 : i32
    return %c0_i32, %c0_i32_0 : i32, i32
  }
  func.func @transform_10(%arg0: i32) -> (i32, i32) {
    %c0_i32 = arith.constant 0 : i32
    %c0_i32_0 = arith.constant 0 : i32
    %c0_i32_1 = arith.constant 0 : i32
    return %c0_i32, %c0_i32_0 : i32, i32
  }
  func.func @transform_11(%arg0: i32) -> (i32, i32) {
    %c0_i32 = arith.constant 0 : i32
    %c0_i32_0 = arith.constant 0 : i32
    %c0_i32_1 = arith.constant 0 : i32
    return %c0_i32, %c0_i32_0 : i32, i32
  }
  func.func @transform_12(%arg0: i32) -> (i32, i32) {
    %c0_i32 = arith.constant 0 : i32
    %c0_i32_0 = arith.constant 0 : i32
    return %arg0, %c0_i32 : i32, i32
  }
}

</mosaic_0001>

<bundles_post_ra>
// kernel: risk_alert_forward.1
= control target key start
LH: loop header
LB: loop body
LE: loop exit
PB: predicated region body
PF: predicated region fallthrough
CT: control target
= control target key end

     0   :  { %17 = vsyncpa [#allocation6], 0  ;;  %s5279_s0 = inlined_call_operand.vmem [shape: bf16[8,2,32], index: 0, kind: input, shape index: {}]   ;;  %s5280_s1 = inlined_call_operand.vmem [shape: bf16[32,512], index: 1, kind: input, shape index: {}]   ;;  %s5281_s2 = inlined_call_operand.hbm [shape: bf16[128,512], index: 2, kind: input, shape index: {}]   ;;  %s5282_s3 = inlined_call_operand.hbm [shape: f32[1,512], index: 3, kind: input, shape index: {}]   ;;  %s5283_s4 = inlined_call_operand.hbm [shape: bf16[128,384], index: 4, kind: input, shape index: {}]   ;;  %s5284_s5 = inlined_call_operand.hbm [shape: f32[1,384], index: 5, kind: input, shape index: {}]   ;;  %s5285_s6 = inlined_call_operand.vmem [shape: bf16[128,128], index: 6, kind: input, shape index: {}]   ;;  %s5286_s7 = inlined_call_operand.vmem [shape: f32[1,128], index: 7, kind: input, shape index: {}]   ;;  %s5287_s8 = inlined_call_operand.vmem [shape: bf16[128,32], index: 8, kind: input, shape index: {}]   ;;  %s5288_s9 = inlined_call_operand.vmem [shape: f32[1,32], index: 9, kind: input, shape index: {}]   ;;  %s5289_s10 = inlined_call_operand.vmem [shape: bf16[32,128], index: 10, kind: input, shape index: {}]   ;;  %s5290_s11 = inlined_call_operand.hbm [shape: f32[1,128], index: 11, kind: input, shape index: {}]   ;;  %s5291_s12 = inlined_call_operand.hbm [shape: f32[2,128], index: 12, kind: output, shape index: {}]  }
   0x1   :  { %18 = vsyncpa [#allocation9], 0 }
   0x2   :  { %19 = vsyncpa [#allocation12], 0 }
   0x3   :  { %20 = vsyncpa [#allocation7], 0  ;;  %s4252_s21 = smov [#allocation8]   ;;  %s4253_s23 = smov [#allocation11]  }
   0x4   :  { %s43_s22 = sshll.u32 %s4252_s21, 4  ;;  %s65_s24 = sshll.u32 %s4253_s23, 4  ;;  %s44_s22 = int_to_ptr.vmem [resolvable:$true] %s43_s22  ;;  %s66_s24 = int_to_ptr.vmem [resolvable:$true] %s65_s24 }
   0x5   :  { %s4112_s27 = scalar_lea.hbm %s5282_s3, 64 }
   0x6   :  { %p4113_p0 = scmp.ne.s32.totalorder %s5282_s3, %s4112_s27  ;;  %p4116_p1 = scmp.lt.u32.totalorder %s4112_s27, %s5282_s3 }
   0x8   :  { %p4118_p2 = pnand %p4116_p1, %p4113_p0 }
   0xa   :  { %4121 = shalt.err (!%p4118_p2)
}
   0xb   :  { %s4122_s14 = scalar_lea.vmem %s44_s22, 64  ;;  %p4127_p4 = scmp.lt.s32.totalorder %s44_s22, %s44_s22 }
   0xc   :  { %p4123_p3 = scmp.ne.s32.totalorder %s44_s22, %s4122_s14  ;;  %p4128_p5 = scmp.lt.s32.totalorder %s4122_s14, %s4122_s14 }
   0xe   :  { %p4129_p6 = por %p4128_p5, %p4127_p4 }
  0x10   :  { %p4130_p7 = pnand %p4129_p6, %p4123_p3 }
  0x12   :  { %4133 = shalt.err (!%p4130_p7)
}
  0x13   :  { %46 = dma.hbm_to_vmem [thread:$0]  %s5282_s3, 64, %s44_s22, [#allocation9]  }
  0x14   :  { %s4134_s19 = scalar_lea.hbm %s5284_s5, 48 }
  0x15   :  { %p4135_p8 = scmp.ne.s32.totalorder %s5284_s5, %s4134_s19  ;;  %p4138_p9 = scmp.lt.u32.totalorder %s4134_s19, %s5284_s5 }
  0x17   :  { %p4140_p10 = pnand %p4138_p9, %p4135_p8 }
  0x19   :  { %4143 = shalt.err (!%p4140_p10)
}
  0x1a   :  { %s4144_s26 = scalar_lea.vmem %s66_s24, 48  ;;  %s4148_s27 = scalar_lea.vmem %s66_s24, 64 }
  0x1b   :  { %p4145_p11 = scmp.ne.s32.totalorder %s66_s24, %s4144_s26  ;;  %p4149_p12 = scmp.lt.s32.totalorder %s66_s24, %s66_s24 }
  0x1c   :  { %p4150_p13 = scmp.lt.s32.totalorder %s4148_s27, %s4144_s26 }
  0x1e   :  { %p4151_p0 = por %p4150_p13, %p4149_p12 }
  0x20   :  { %p4152_p1 = pnand %p4151_p0, %p4145_p11 }
  0x22   :  { %4155 = shalt.err (!%p4152_p1)
}
  0x23   :  { %68 = dma.hbm_to_vmem [thread:$0]  %s5284_s5, 48, %s66_s24, [#allocation12]  }
  0x24   :  { %s4254_s28 = smov [#allocation5]   ;;  %s4156_s14 = scalar_lea.hbm %s5281_s2, 4096 }
  0x25   :  { %s30_s29 = sshll.u32 %s4254_s28, 4  ;;  %p4157_p2 = scmp.ne.s32.totalorder %s5281_s2, %s4156_s14  ;;  %s31_s29 = int_to_ptr.vmem [resolvable:$true] %s30_s29 }
  0x26   :  { %p4160_p3 = scmp.lt.u32.totalorder %s4156_s14, %s5281_s2 }
  0x28   :  { %p4162_p4 = pnand %p4160_p3, %p4157_p2 }
  0x2a   :  { %4165 = shalt.err (!%p4162_p4)
}
  0x2b   :  { %s4166_s19 = scalar_lea.vmem %s31_s29, 4096  ;;  %p4171_p6 = scmp.lt.s32.totalorder %s31_s29, %s31_s29 }
  0x2c   :  { %p4167_p5 = scmp.ne.s32.totalorder %s31_s29, %s4166_s19  ;;  %p4172_p7 = scmp.lt.s32.totalorder %s4166_s19, %s4166_s19 }
  0x2e   :  { %p4173_p8 = por %p4172_p7, %p4171_p6 }
  0x30   :  { %p4174_p9 = pnand %p4173_p8, %p4167_p5 }
  0x32   :  { %4177 = shalt.err (!%p4174_p9)
}
  0x33   :  { %s4255_s5 = smov 256   ;;  %s4256_s24 = smov 16  }
  0x34   :  { %36 = dma.hbm_to_vmem [thread:$0]  %s5281_s2, 4096, %s31_s29, [#allocation6], %s4255_s5, %s4255_s5, %s4256_s24  }
  0x35   :  { %s4257_s23 = smov [#allocation10]   ;;  %s4178_s3 = scalar_lea.hbm %s5283_s4, 3072 }
  0x36   :  { %s52_s25 = sshll.u32 %s4257_s23, 4  ;;  %p4179_p10 = scmp.ne.s32.totalorder %s5283_s4, %s4178_s3  ;;  %s53_s25 = int_to_ptr.vmem [resolvable:$true] %s52_s25 }
  0x37   :  { %p4182_p11 = scmp.lt.u32.totalorder %s4178_s3, %s5283_s4 }
  0x39   :  { %p4184_p12 = pnand %p4182_p11, %p4179_p10 }
  0x3b   :  { %4187 = shalt.err (!%p4184_p12)
}
  0x3c   :  { %s4188_s14 = scalar_lea.vmem %s53_s25, 3072  ;;  %p4193_p0 = scmp.lt.s32.totalorder %s53_s25, %s53_s25 }
  0x3d   :  { %p4189_p13 = scmp.ne.s32.totalorder %s53_s25, %s4188_s14  ;;  %p4194_p1 = scmp.lt.s32.totalorder %s4188_s14, %s4188_s14 }
  0x3f   :  { %p4195_p2 = por %p4194_p1, %p4193_p0 }
  0x41   :  { %p4196_p3 = pnand %p4195_p2, %p4189_p13 }
  0x43   :  { %4199 = shalt.err (!%p4196_p3)
}
  0x44   :  { %s4258_s2 = smov 192   ;;  %s4259_s29 = smov 12  }
  0x45   :  { %58 = dma.hbm_to_vmem [thread:$0]  %s5283_s4, 3072, %s53_s25, [#allocation9], %s4258_s2, %s4258_s2, %s4259_s29  }
  0x46   :  { %s4260_s17 = smov [#allocation13]   ;;  %s4200_s24 = scalar_lea.hbm %s5290_s11, 16 }
  0x47   :  { %s85_s18 = sshll.u32 %s4260_s17, 4  ;;  %p4201_p4 = scmp.ne.s32.totalorder %s5290_s11, %s4200_s24  ;;  %s86_s18 = int_to_ptr.vmem [resolvable:$true] %s85_s18 }
  0x48   :  { %p4204_p5 = scmp.lt.u32.totalorder %s4200_s24, %s5290_s11 }
  0x4a   :  { %p4206_p6 = pnand %p4204_p5, %p4201_p4 }
  0x4c   :  { %4209 = shalt.err (!%p4206_p6)
}
  0x4d   :  { %s4210_s27 = scalar_lea.vmem %s86_s18, 16  ;;  %s4214_s4 = scalar_lea.vmem %s86_s18, 32 }
  0x4e   :  { %p4211_p7 = scmp.ne.s32.totalorder %s86_s18, %s4210_s27  ;;  %p4215_p8 = scmp.lt.s32.totalorder %s86_s18, %s86_s18 }
  0x4f   :  { %p4216_p9 = scmp.lt.s32.totalorder %s4214_s4, %s4210_s27 }
  0x51   :  { %p4217_p10 = por %p4216_p9, %p4215_p8 }
  0x53   :  { %p4218_p11 = pnand %p4217_p10, %p4211_p7 }
  0x55   :  { %4221 = shalt.err (!%p4218_p11)
}
  0x56   :  { %88 = dma.hbm_to_vmem [thread:$0]  %s5290_s11, 16, %s86_s18, [#allocation12]  }
  0x57   :  { %4244 = dma.done.wait [#allocation6], 4096  }
  0x58   :  { %4245 = vsyncadd [#allocation6], 4294963200 }
  0x59   :  { %4246 = dma.done.wait [#allocation9], 3136  }
  0x5a   :  { %4247 = vsyncadd [#allocation9], 4294964160 }
  0x5b   :  { %4248 = dma.done.wait [#allocation12], 64  }
  0x5c   :  { %4249 = vsyncadd [#allocation12], 4294967232  ;;  %v4261_v0 = vmov 0   ;;  %v123_v1 = vlaneseq  ;;  %v4262_v2 = vmov 1966171168   ;;  %vm240_vm0 = vcmask 261120  }
  0x5d   :  { %276 = vmatprep.mubr.bf16.mxu0 %v4261_v0  ;;  %319 = vmatprep.mubr.bf16.mxu1 %v4261_v0  ;;  %v156_v3 = vunpack.c.l.s4 %v4262_v2  ;;  %v3870_v4 = vld [vmem:[%s5280_s1 + $0x4] ss:$16 sps:$4 sm:$0xff]   ;;  %v3872_v7 = vld [vmem:[%s5280_s1 + $0xc] ss:$16 sps:$4 sm:$0xff]   ;;  %v3874_v8 = vld [vmem:[%s5280_s1] ss:$16 sps:$4 sm:$0xff]  }
  0x5e   :  { %v4400_v5 = vshrl.u32 %v123_v1, 7  ;;  %244 = vmatprep.subr.bf16.mxu0 %v3870_v4  ;;  %v3875_v9 = vld [vmem:[%s5280_s1 + $0x8] ss:$16 sps:$4 sm:$0xff]   ;;  %287 = vmatprep.subr.bf16.mxu1 %v3872_v7  ;;  %v3876_v10 = vld [vmem:[%s5280_s1 + $0x24] ss:$16 sps:$4 sm:$0xff]   ;;  %vm1663_vm1 = vcmask 523264  }
  0x5f   :  { %v157_v6 = vunpack.c.0.s8 %v156_v3  ;;  %245 = vmatpush1.bf16.msra.mxu0 %v3874_v8  ;;  %288 = vmatpush1.bf16.msra.mxu1 %v3875_v9  ;;  %v3878_v11 = vld [vmem:[%s5280_s1 + $0x2c] ss:$16 sps:$4 sm:$0xff]   ;;  %v3880_v12 = vld [vmem:[%s5280_s1 + $0x20] ss:$16 sps:$4 sm:$0xff]   ;;  %v3881_v14 = vld [vmem:[%s5280_s1 + $0x28] ss:$16 sps:$4 sm:$0xff]  }
  0x60   :  { %246 = vmatprep.subr.bf16.mxu0 %v3876_v10  ;;  %v105_v15 = vld [vmem:[%s5279_s0] sm:$0x1]  ;;  %v106_v16 = vld [vmem:[%s5279_s0 + $0x1] sm:$0x1]  ;;  %289 = vmatprep.subr.bf16.mxu1 %v3878_v11  ;;  %v107_v17 = vld [vmem:[%s5279_s0 + $0x2] sm:$0x1] }
  0x61   :  { %v4421_v13 = vsub.s32 %v157_v6, %v4400_v5  ;;  %v108_v18 = vld [vmem:[%s5279_s0 + $0x3] sm:$0x1]  ;;  %v109_v19 = vld [vmem:[%s5279_s0 + $0x4] sm:$0x1]  ;;  %v151_v20 = vcombine.low %v105_v15, %v106_v16  ;;  %v110_v21 = vld [vmem:[%s5279_s0 + $0x5] sm:$0x1] }
  0x62   :  { %v111_v22 = vld [vmem:[%s5279_s0 + $0x6] sm:$0x1]  ;;  %v112_v23 = vld [vmem:[%s5279_s0 + $0x7] sm:$0x1]  ;;  %v152_v24 = vcombine.low %v107_v17, %v108_v18  ;;  %v153_v25 = vcombine.low %v109_v19, %v110_v21  ;;  %v4454_v30 = vld [vmem:[#allocation5 + $0xc] ss:$16 sps:$4 sm:$0xff]  }
  0x63   :  { %247 = vmatpush1.bf16.msra.mxu0 %v3880_v12  ;;  %290 = vmatpush1.bf16.msra.mxu1 %v3881_v14  ;;  %v154_v26 = vcombine.low %v111_v22, %v112_v23  ;;  %v161_v27 = vrot.slane %v151_v20, %v4421_v13  ;;  %v4451_v28 = vld [vmem:[#allocation5 + $0x4] ss:$16 sps:$4 sm:$0xff]   ;;  %v4462_v37 = vld [vmem:[#allocation5] ss:$16 sps:$4 sm:$0xff]   ;;  %v4464_v38 = vld [vmem:[#allocation5 + $0x8] ss:$16 sps:$4 sm:$0xff]  }
  0x64   :  { %v168_v29 = vrot.slane %v152_v24, %v4421_v13  ;;  %v175_v31 = vrot.slane %v153_v25, %v4421_v13  ;;  %619 = vmatprep.subr.bf16.mxu0 %v4451_v28  ;;  %660 = vmatprep.subr.bf16.mxu1 %v4454_v30  ;;  %v4466_v39 = vld [vmem:[#allocation5 + $0x24] ss:$16 sps:$4 sm:$0xff]   ;;  %v4468_v41 = vld [vmem:[#allocation5 + $0x2c] ss:$16 sps:$4 sm:$0xff]   ;;  %v4472_v42 = vld [vmem:[#allocation5 + $0x20] ss:$16 sps:$4 sm:$0xff]  }
  0x65   :  { %v182_v32 = vrot.slane %v154_v26, %v4421_v13  ;;  %v4476_v43 = vld [vmem:[#allocation5 + $0x28] ss:$16 sps:$4 sm:$0xff]   ;;  %v4480_v44 = vld [vmem:[#allocation5 + $0x44] ss:$16 sps:$4 sm:$0xff]   ;;  %v4482_v45 = vld [vmem:[#allocation5 + $0x4c] ss:$16 sps:$4 sm:$0xff]  }
  0x66   :  { %v183_v33 = vcombine.low %v161_v27, %v168_v29  ;;  %v4488_v46 = vld [vmem:[#allocation5 + $0x40] ss:$16 sps:$4 sm:$0xff]   ;;  %v4490_v47 = vld [vmem:[#allocation5 + $0x48] ss:$16 sps:$4 sm:$0xff]   ;;  %v4492_v48 = vld [vmem:[#allocation5 + $0x64] ss:$16 sps:$4 sm:$0xff]  }
  0x67   :  { %v184_v34 = vcombine.low %v175_v31, %v182_v32  ;;  %v4496_v49 = vld [vmem:[#allocation5 + $0x6c] ss:$16 sps:$4 sm:$0xff]   ;;  %v4498_v50 = vld [vmem:[#allocation5 + $0x60] ss:$16 sps:$4 sm:$0xff]   ;;  %v4502_v51 = vld [vmem:[#allocation5 + $0x68] ss:$16 sps:$4 sm:$0xff]  }
  0x68   :  { %v191_v35 = vrot.slane %v183_v33, %v4421_v13  ;;  %v4506_v52 = vld [vmem:[#allocation5 + $0x84] ss:$16 sps:$4 sm:$0xff]   ;;  %v4508_v53 = vld [vmem:[#allocation5 + $0x8c] ss:$16 sps:$4 sm:$0xff]   ;;  %v4510_v54 = vld [vmem:[#allocation5 + $0x80] ss:$16 sps:$4 sm:$0xff]  }
  0x69   :  { %v198_v36 = vrot.slane %v184_v34, %v4421_v13  ;;  %v4512_v55 = vld [vmem:[#allocation5 + $0x88] ss:$16 sps:$4 sm:$0xff]   ;;  %v4514_v56 = vld [vmem:[#allocation5 + $0xa4] ss:$16 sps:$4 sm:$0xff]   ;;  %v4516_v57 = vld [vmem:[#allocation5 + $0xac] ss:$16 sps:$4 sm:$0xff]  }
  0x6a   :  { %v4522_v58 = vld [vmem:[#allocation5 + $0xa0] ss:$16 sps:$4 sm:$0xff]   ;;  %v4524_v59 = vld [vmem:[#allocation5 + $0xa8] ss:$16 sps:$4 sm:$0xff]   ;;  %v4526_v60 = vld [vmem:[#allocation5 + $0xc4] ss:$16 sps:$4 sm:$0xff]  }
  0x6b   :  { %v199_v40 = vcombine.low %v191_v35, %v198_v36  ;;  %v4528_v61 = vld [vmem:[#allocation5 + $0xcc] ss:$16 sps:$4 sm:$0xff]   ;;  %v4534_v62 = vld [vmem:[#allocation5 + $0xc0] ss:$16 sps:$4 sm:$0xff]   ;;  %v4536_v63 = vld [vmem:[#allocation5 + $0xc8] ss:$16 sps:$4 sm:$0xff]  }
  0x6c   :  { %v4538_v1 = vld [vmem:[#allocation5 + $0xe4] ss:$16 sps:$4 sm:$0xff]   ;;  %v4540_v2 = vld [vmem:[#allocation5 + $0xec] ss:$16 sps:$4 sm:$0xff]   ;;  %v4546_v3 = vld [vmem:[#allocation5 + $0xe0] ss:$16 sps:$4 sm:$0xff]  }
  0x6d   :  { %3496 = vmatmul.mubr.msk.bf16.vlgmr.msra.gmra.mrb[0].mxu0 %vm240_vm0, %v199_v40  ;;  %3497 = vmatmul.mubr.msk.bf16.vlgmr.msra.gmra.mrb[0].mxu1 %vm240_vm0, %v199_v40  ;;  %v4548_v4 = vld [vmem:[#allocation5 + $0xe8] ss:$16 sps:$4 sm:$0xff]   ;;  %v5293_v6 = vsub.s32 0, %v4400_v5  ;;  %v5292_v7 = vsub.s32 2, %v4400_v5  ;;  %v4263_v8 = vmov 1983009808  }
  0x6e   :  { %620 = vmatpush1.bf16.msra.mxu0 %v4462_v37  ;;  %661 = vmatpush1.bf16.msra.mxu1 %v4464_v38  ;;  %v343_v9 = vunpack.c.l.s4 %v4263_v8  ;;  %v121_v10 = vld [vmem:[#allocation8] sm:$0xf]  ;;  %v5294_v11 = vsub.s32 1, %v4400_v5  ;;  %v137_v12 = vsub.s32 3, %v4400_v5  ;;  %vm4265_vm2 = vmmov 0   ;;  %s4266_s0 = smov 96  }
  0x6f   :  { %621 = vmatprep.subr.bf16.mxu0 %v4466_v39  ;;  %662 = vmatprep.subr.bf16.mxu1 %v4468_v41  ;;  %v126_v14 = vrot.slane %v121_v10, %v5293_v6  ;;  %v134_v15 = vrot.slane %v121_v10, %v5292_v7  ;;  %s4267_s15 = smov 64   ;;  %s4268_s16 = smov 32   ;;  %vm2769_vm3 = vcmask 1043456   ;;  %vm2604_vm4 = vcmask 64512  }
  0x70   :  { %651 = vmatprep.mubr.bf16.mxu0 %v4261_v0  ;;  %692 = vmatprep.mubr.bf16.mxu1 %v4261_v0  ;;  %v344_v16 = vunpack.c.0.s8 %v343_v9  ;;  %v130_v17 = vrot.slane %v121_v10, %v5294_v11  ;;  %v138_v18 = vrot.slane %v121_v10, %v137_v12  ;;  %vm3138_vm5 = vcmask 1041409  }
  0x71   :  { %vm3164_vm6 = vcmask 785408   ;;  %vm3458_vm7 = vcmask 1041408  }
  0x72   :  { %622 = vmatpush1.bf16.msra.mxu0 %v4472_v42  ;;  %663 = vmatpush1.bf16.msra.mxu1 %v4476_v43  ;;  %v4605_v25 = vsub.s32 %v344_v16, %v4400_v5 }
  0x73   :  { %623 = vmatprep.subr.bf16.mxu0 %v4480_v44  ;;  %664 = vmatprep.subr.bf16.mxu1 %v4482_v45 }
  0x76   :  { %624 = vmatpush1.bf16.msra.mxu0 %v4488_v46  ;;  %665 = vmatpush1.bf16.msra.mxu1 %v4490_v47 }
  0x77   :  { %625 = vmatprep.subr.bf16.mxu0 %v4492_v48  ;;  %666 = vmatprep.subr.bf16.mxu1 %v4496_v49 }
  0x7a   :  { %626 = vmatpush1.bf16.msra.mxu0 %v4498_v50  ;;  %667 = vmatpush1.bf16.msra.mxu1 %v4502_v51 }
  0x7b   :  { %627 = vmatprep.subr.bf16.mxu0 %v4506_v52  ;;  %668 = vmatprep.subr.bf16.mxu1 %v4508_v53 }
  0x7e   :  { %628 = vmatpush1.bf16.msra.mxu0 %v4510_v54  ;;  %669 = vmatpush1.bf16.msra.mxu1 %v4512_v55 }
  0x7f   :  { %629 = vmatprep.subr.bf16.mxu0 %v4514_v56  ;;  %670 = vmatprep.subr.bf16.mxu1 %v4516_v57 }
  0x82   :  { %630 = vmatpush1.bf16.msra.mxu0 %v4522_v58  ;;  %671 = vmatpush1.bf16.msra.mxu1 %v4524_v59 }
  0x83   :  { %631 = vmatprep.subr.bf16.mxu0 %v4526_v60  ;;  %672 = vmatprep.subr.bf16.mxu1 %v4528_v61 }
  0x86   :  { %632 = vmatpush1.bf16.msra.mxu0 %v4534_v62  ;;  %673 = vmatpush1.bf16.msra.mxu1 %v4536_v63 }
  0x87   :  { %633 = vmatprep.subr.bf16.mxu0 %v4538_v1  ;;  %674 = vmatprep.subr.bf16.mxu1 %v4540_v2 }
  0x8a   :  { %634 = vmatpush1.bf16.msra.mxu0 %v4546_v3  ;;  %675 = vmatpush1.bf16.msra.mxu1 %v4548_v4 }
  0x8b   :  { %748 = vmatprep.subr.bf16.mxu0 %v4451_v28  ;;  %789 = vmatprep.subr.bf16.mxu1 %v4454_v30 }
  0x8d   :  { %652 = vmatmul.mubr.bf16.vlgmr.msra.gmra.mrb[4].mxu0 %v4261_v0  ;;  %693 = vmatmul.mubr.bf16.vlgmr.msra.gmra.mrb[4].mxu1 %v4261_v0 }
  0x8e   :  { %749 = vmatpush1.bf16.msra.mxu0 %v4462_v37  ;;  %790 = vmatpush1.bf16.msra.mxu1 %v4464_v38 }
  0x8f   :  { %750 = vmatprep.subr.bf16.mxu0 %v4466_v39  ;;  %791 = vmatprep.subr.bf16.mxu1 %v4468_v41 }
  0x90   :  { %780 = vmatprep.mubr.bf16.mxu0 %v4261_v0  ;;  %821 = vmatprep.mubr.bf16.mxu1 %v4261_v0 }
  0x92   :  { %751 = vmatpush1.bf16.msra.mxu0 %v4472_v42  ;;  %792 = vmatpush1.bf16.msra.mxu1 %v4476_v43 }
  0x93   :  { %752 = vmatprep.subr.bf16.mxu0 %v4480_v44  ;;  %793 = vmatprep.subr.bf16.mxu1 %v4482_v45 }
  0x96   :  { %753 = vmatpush1.bf16.msra.mxu0 %v4488_v46  ;;  %794 = vmatpush1.bf16.msra.mxu1 %v4490_v47 }
  0x97   :  { %754 = vmatprep.subr.bf16.mxu0 %v4492_v48  ;;  %795 = vmatprep.subr.bf16.mxu1 %v4496_v49 }
  0x9a   :  { %755 = vmatpush1.bf16.msra.mxu0 %v4498_v50  ;;  %796 = vmatpush1.bf16.msra.mxu1 %v4502_v51 }
  0x9b   :  { %756 = vmatprep.subr.bf16.mxu0 %v4506_v52  ;;  %797 = vmatprep.subr.bf16.mxu1 %v4508_v53 }
  0x9e   :  { %757 = vmatpush1.bf16.msra.mxu0 %v4510_v54  ;;  %798 = vmatpush1.bf16.msra.mxu1 %v4512_v55 }
  0x9f   :  { %758 = vmatprep.subr.bf16.mxu0 %v4514_v56  ;;  %799 = vmatprep.subr.bf16.mxu1 %v4516_v57 }
  0xa2   :  { %759 = vmatpush1.bf16.msra.mxu0 %v4522_v58  ;;  %800 = vmatpush1.bf16.msra.mxu1 %v4524_v59 }
  0xa3   :  { %760 = vmatprep.subr.bf16.mxu0 %v4526_v60  ;;  %801 = vmatprep.subr.bf16.mxu1 %v4528_v61 }
  0xa6   :  { %761 = vmatpush1.bf16.msra.mxu0 %v4534_v62  ;;  %802 = vmatpush1.bf16.msra.mxu1 %v4536_v63 }
  0xa7   :  { %762 = vmatprep.subr.bf16.mxu0 %v4538_v1  ;;  %803 = vmatprep.subr.bf16.mxu1 %v4540_v2 }
  0xaa   :  { %763 = vmatpush1.bf16.msra.mxu0 %v4546_v3  ;;  %804 = vmatpush1.bf16.msra.mxu1 %v4548_v4 }
  0xab   :  { %878 = vmatprep.subr.bf16.mxu0 %v4451_v28  ;;  %919 = vmatprep.subr.bf16.mxu1 %v4454_v30 }
 0x140   :  { %v278_v19 = vpop.f32.mrb[0].mxu0  ;;  %v321_v20 = vpop.f32.mrb[0].mxu1 }
 0x141   :  { %v279_v21 = vadd.f32 %v278_v19, %v126_v14  ;;  %v322_v22 = vadd.f32 %v321_v20, %v134_v15  ;;  %v280_v23 = vpop.f32.mrb[1].mxu0  ;;  %v323_v24 = vpop.f32.mrb[1].mxu1 }
 0x142   :  { %v281_v26 = vadd.f32 %v280_v23, %v130_v17  ;;  %v324_v27 = vadd.f32 %v323_v24, %v138_v18  ;;  %v282_v29 = vpop.f32.mrb[2].mxu0  ;;  %v325_v31 = vpop.f32.mrb[2].mxu1 }
 0x143   :  { %v283_v32 = vadd.f32 %v282_v29, %v126_v14  ;;  %v326_v33 = vadd.f32 %v325_v31, %v134_v15  ;;  %v284_v34 = vpop.f32.mrb[3].mxu0  ;;  %v327_v35 = vpop.f32.mrb[3].mxu1 }
 0x144   :  { %v338_v36 = vcombine.low %v279_v21, %v281_v26  ;;  %v339_v40 = vcombine.high %v279_v21, %v281_v26  ;;  %v340_v8 = vcombine.low %v322_v22, %v324_v27  ;;  %v341_v9 = vcombine.high %v322_v22, %v324_v27 }
 0x145   :  { %v285_v10 = vadd.f32 %v284_v34, %v130_v17  ;;  %v328_v12 = vadd.f32 %v327_v35, %v138_v18 }
 0x146   :  { %v4608_v19 = vrot.slane %v338_v36, %v4605_v25  ;;  %v4611_v16 = vrot.slane %v339_v40, %v4605_v25  ;;  %v4614_v20 = vrot.slane %v340_v8, %v4605_v25  ;;  %v4617_v14 = vrot.slane %v341_v9, %v4605_v25 }
 0x147   :  { %v374_v15 = vcombine.low %v283_v32, %v285_v10  ;;  %v375_v23 = vcombine.high %v283_v32, %v285_v10  ;;  %v376_v24 = vcombine.low %v326_v33, %v328_v12  ;;  %v377_v21 = vcombine.high %v326_v33, %v328_v12 }
 0x148   :  { %v370_v17 = vcombine.low %v4608_v19, %v4614_v20 }
 0x149   :  { %v4628_v27 = vrot.slane %v374_v15, %v4605_v25  ;;  %v4631_v29 = vrot.slane %v375_v23, %v4605_v25  ;;  %v4634_v31 = vrot.slane %v376_v24, %v4605_v25  ;;  %v4637_v32 = vrot.slane %v377_v21, %v4605_v25 }
 0x160   :  { %v653_v40 = vpop.f32.mrb[4].mxu0  ;;  %v694_v8 = vpop.f32.mrb[4].mxu1 }
 0x161   :  { %v655_v9 = vpop.f32.mrb[5].mxu0  ;;  %v696_v10 = vpop.f32.mrb[5].mxu1 }
 0x162   :  { %v705_v12 = vcombine.low %v653_v40, %v655_v9  ;;  %v706_v15 = vcombine.low %v694_v8, %v696_v10  ;;  %v657_v23 = vpop.f32.mrb[6].mxu0  ;;  %v698_v24 = vpop.f32.mrb[6].mxu1 }
 0x163   :  { %v658_v21 = vpop.f32.mrb[7].mxu0  ;;  %v699_v7 = vpop.f32.mrb[7].mxu1 }
 0x164   :  { %v713_v6 = vrot.slane %v705_v12, %v4605_v25  ;;  %v720_v11 = vrot.slane %v706_v15, %v4605_v25 }
 0x166   :  { %v721_v34 = vcombine.low %v713_v6, %v720_v11 }
 0x168   :  { %v723_v33 = vadd.f32 %v721_v34, %v370_v17 }
 0x16a   :  { %v3530_v35 = vmul.f32 -1.442695, %v723_v33  ;;  %v731_v22 = vrot.slane %v723_v33, 6 }
 0x16c   :  { %3980 = vpow2.f32 %v3530_v35 }
 0x176   :  { %v3981_v26 = vpop.eup %3980 }
 0x177   :  { %v727_v36 = vadd.f32 1.0, %v3981_v26 }
 0x179   :  { %3982 = vrcp.f32 %v727_v36 }
 0x17a   :  { %3984 = vtanh.f32 %v731_v22 }
 0x183   :  { %v3983_v18 = vpop.eup %3982 }
 0x184   :  { %v735_v40 = vrot.slane %v3983_v18, 2  ;;  %v3985_v8 = vpop.eup %3984  ;;  %v741_v7 = vrot.slane %v3983_v18, 4 }
 0x185   :  { %v738_v10 = vmul.f32 %v3985_v8, %v3983_v18 }
 0x186   :  { %v737_v9 = vmul.f32 0.0, %v735_v40 }
 0x188   :  { %v4649_v23 = vadd.f32 %v738_v10, %v737_v9  ;;  %v5295_v9 = vcombine.high %v4608_v19, %v4614_v20 }
 0x18a   :  { %3986 = vtanh.f32 %v4649_v23 }
 0x194   :  { %v3987_v12 = vpop.eup %3986 }
 0x195   :  { %v743_v6 = vmul.f32 %v3987_v12, %v741_v7 }
 0x197   :  { %744 = vst [vmem:[#allocation3] sm:$0x3] %v743_v6  ;;  %v747_v11 = vpack.c.bf16 %v743_v6, %v743_v6 }
 0x199   :  { %781 = vmatmul.mubr.bf16.vlgmr.msra.gmra.mrb[8].mxu0 %v747_v11  ;;  %822 = vmatmul.mubr.bf16.vlgmr.msra.gmra.mrb[8].mxu1 %v747_v11 }
 0x19a   :  { %879 = vmatpush1.bf16.msra.mxu0 %v4462_v37  ;;  %920 = vmatpush1.bf16.msra.mxu1 %v4464_v38 }
 0x19b   :  { %880 = vmatprep.subr.bf16.mxu0 %v4466_v39  ;;  %921 = vmatprep.subr.bf16.mxu1 %v4468_v41 }
 0x19c   :  { %910 = vmatprep.mubr.bf16.mxu0 %v4261_v0  ;;  %951 = vmatprep.mubr.bf16.mxu1 %v4261_v0 }
 0x19e   :  { %881 = vmatpush1.bf16.msra.mxu0 %v4472_v42  ;;  %922 = vmatpush1.bf16.msra.mxu1 %v4476_v43 }
 0x19f   :  { %882 = vmatprep.subr.bf16.mxu0 %v4480_v44  ;;  %923 = vmatprep.subr.bf16.mxu1 %v4482_v45 }
 0x1a2   :  { %883 = vmatpush1.bf16.msra.mxu0 %v4488_v46  ;;  %924 = vmatpush1.bf16.msra.mxu1 %v4490_v47 }
 0x1a3   :  { %884 = vmatprep.subr.bf16.mxu0 %v4492_v48  ;;  %925 = vmatprep.subr.bf16.mxu1 %v4496_v49 }
 0x1a6   :  { %885 = vmatpush1.bf16.msra.mxu0 %v4498_v50  ;;  %926 = vmatpush1.bf16.msra.mxu1 %v4502_v51 }
 0x1a7   :  { %886 = vmatprep.subr.bf16.mxu0 %v4506_v52  ;;  %927 = vmatprep.subr.bf16.mxu1 %v4508_v53 }
 0x1aa   :  { %887 = vmatpush1.bf16.msra.mxu0 %v4510_v54  ;;  %928 = vmatpush1.bf16.msra.mxu1 %v4512_v55 }
 0x1ab   :  { %888 = vmatprep.subr.bf16.mxu0 %v4514_v56  ;;  %929 = vmatprep.subr.bf16.mxu1 %v4516_v57 }
 0x1ae   :  { %889 = vmatpush1.bf16.msra.mxu0 %v4522_v58  ;;  %930 = vmatpush1.bf16.msra.mxu1 %v4524_v59 }
 0x1af   :  { %890 = vmatprep.subr.bf16.mxu0 %v4526_v60  ;;  %931 = vmatprep.subr.bf16.mxu1 %v4528_v61 }
 0x1b2   :  { %891 = vmatpush1.bf16.msra.mxu0 %v4534_v62  ;;  %932 = vmatpush1.bf16.msra.mxu1 %v4536_v63 }
 0x1b3   :  { %892 = vmatprep.subr.bf16.mxu0 %v4538_v1  ;;  %933 = vmatprep.subr.bf16.mxu1 %v4540_v2 }
 0x1b6   :  { %893 = vmatpush1.bf16.msra.mxu0 %v4546_v3  ;;  %934 = vmatpush1.bf16.msra.mxu1 %v4548_v4 }
 0x1b7   :  { %1008 = vmatprep.subr.bf16.mxu0 %v4451_v28  ;;  %1049 = vmatprep.subr.bf16.mxu1 %v4454_v30 }
 0x26c   :  { %v782_v17 = vpop.f32.mrb[8].mxu0  ;;  %v823_v18 = vpop.f32.mrb[8].mxu1 }
 0x26d   :  { %v784_v22 = vpop.f32.mrb[9].mxu0  ;;  %v825_v26 = vpop.f32.mrb[9].mxu1 }
 0x26e   :  { %v834_v33 = vcombine.low %v782_v17, %v784_v22  ;;  %v835_v34 = vcombine.low %v823_v18, %v825_v26  ;;  %v786_v35 = vpop.f32.mrb[10].mxu0  ;;  %v827_v36 = vpop.f32.mrb[10].mxu1 }
 0x26f   :  { %v787_v15 = vpop.f32.mrb[11].mxu0  ;;  %v828_v24 = vpop.f32.mrb[11].mxu1 }
 0x270   :  { %v842_v21 = vrot.slane %v834_v33, %v4605_v25  ;;  %v849_v40 = vrot.slane %v835_v34, %v4605_v25 }
 0x272   :  { %v850_v8 = vcombine.low %v842_v21, %v849_v40 }
 0x274   :  { %v852_v10 = vadd.f32 %v850_v8, %v5295_v9 }
 0x276   :  { %v3531_v7 = vmul.f32 -1.442695, %v852_v10  ;;  %v860_v11 = vrot.slane %v852_v10, 6 }
 0x278   :  { %3988 = vpow2.f32 %v3531_v7 }
 0x282   :  { %v3989_v12 = vpop.eup %3988 }
 0x283   :  { %v856_v6 = vadd.f32 1.0, %v3989_v12 }
 0x285   :  { %3990 = vrcp.f32 %v856_v6 }
 0x286   :  { %3992 = vtanh.f32 %v860_v11 }
 0x28f   :  { %v3991_v17 = vpop.eup %3990 }
 0x290   :  { %v864_v18 = vrot.slane %v3991_v17, 2  ;;  %v3993_v22 = vpop.eup %3992  ;;  %v870_v34 = vrot.slane %v3991_v17, 4 }
 0x291   :  { %v867_v33 = vmul.f32 %v3993_v22, %v3991_v17 }
 0x292   :  { %v866_v26 = vmul.f32 %v864_v18, %v4649_v23  ;;  %v5296_v18 = vcombine.low %v4611_v16, %v4617_v14 }
 0x294   :  { %v4692_v35 = vadd.f32 %v867_v33, %v866_v26 }
 0x296   :  { %3994 = vtanh.f32 %v4692_v35 }
 0x2a0   :  { %v3995_v19 = vpop.eup %3994 }
 0x2a1   :  { %v872_v20 = vmul.f32 %v3995_v19, %v870_v34 }
 0x2a3   :  { %874 = vst [vmem:[#allocation3 + $0x2] sm:$0x3] %v872_v20  ;;  %v877_v36 = vpack.c.bf16 %v872_v20, %v872_v20 }
 0x2a5   :  { %911 = vmatmul.mubr.bf16.vlgmr.msra.gmra.mrb[12].mxu0 %v877_v36  ;;  %952 = vmatmul.mubr.bf16.vlgmr.msra.gmra.mrb[12].mxu1 %v877_v36 }
 0x2a6   :  { %1009 = vmatpush1.bf16.msra.mxu0 %v4462_v37  ;;  %1050 = vmatpush1.bf16.msra.mxu1 %v4464_v38 }
 0x2a7   :  { %1010 = vmatprep.subr.bf16.mxu0 %v4466_v39  ;;  %1051 = vmatprep.subr.bf16.mxu1 %v4468_v41 }
 0x2a8   :  { %1040 = vmatprep.mubr.bf16.mxu0 %v4261_v0  ;;  %1081 = vmatprep.mubr.bf16.mxu1 %v4261_v0 }
 0x2aa   :  { %1011 = vmatpush1.bf16.msra.mxu0 %v4472_v42  ;;  %1052 = vmatpush1.bf16.msra.mxu1 %v4476_v43 }
 0x2ab   :  { %1012 = vmatprep.subr.bf16.mxu0 %v4480_v44  ;;  %1053 = vmatprep.subr.bf16.mxu1 %v4482_v45 }
 0x2ae   :  { %1013 = vmatpush1.bf16.msra.mxu0 %v4488_v46  ;;  %1054 = vmatpush1.bf16.msra.mxu1 %v4490_v47 }
 0x2af   :  { %1014 = vmatprep.subr.bf16.mxu0 %v4492_v48  ;;  %1055 = vmatprep.subr.bf16.mxu1 %v4496_v49 }
 0x2b2   :  { %1015 = vmatpush1.bf16.msra.mxu0 %v4498_v50  ;;  %1056 = vmatpush1.bf16.msra.mxu1 %v4502_v51 }
 0x2b3   :  { %1016 = vmatprep.subr.bf16.mxu0 %v4506_v52  ;;  %1057 = vmatprep.subr.bf16.mxu1 %v4508_v53 }
 0x2b6   :  { %1017 = vmatpush1.bf16.msra.mxu0 %v4510_v54  ;;  %1058 = vmatpush1.bf16.msra.mxu1 %v4512_v55 }
 0x2b7   :  { %1018 = vmatprep.subr.bf16.mxu0 %v4514_v56  ;;  %1059 = vmatprep.subr.bf16.mxu1 %v4516_v57 }
 0x2ba   :  { %1019 = vmatpush1.bf16.msra.mxu0 %v4522_v58  ;;  %1060 = vmatpush1.bf16.msra.mxu1 %v4524_v59 }
 0x2bb   :  { %1020 = vmatprep.subr.bf16.mxu0 %v4526_v60  ;;  %1061 = vmatprep.subr.bf16.mxu1 %v4528_v61 }
 0x2be   :  { %1021 = vmatpush1.bf16.msra.mxu0 %v4534_v62  ;;  %1062 = vmatpush1.bf16.msra.mxu1 %v4536_v63 }
 0x2bf   :  { %1022 = vmatprep.subr.bf16.mxu0 %v4538_v1  ;;  %1063 = vmatprep.subr.bf16.mxu1 %v4540_v2 }
 0x2c2   :  { %1023 = vmatpush1.bf16.msra.mxu0 %v4546_v3  ;;  %1064 = vmatpush1.bf16.msra.mxu1 %v4548_v4 }
 0x2c3   :  { %1138 = vmatprep.subr.bf16.mxu0 %v4451_v28  ;;  %1179 = vmatprep.subr.bf16.mxu1 %v4454_v30 }
 0x378   :  { %v912_v23 = vpop.f32.mrb[12].mxu0  ;;  %v953_v15 = vpop.f32.mrb[12].mxu1 }
 0x379   :  { %v914_v24 = vpop.f32.mrb[13].mxu0  ;;  %v955_v21 = vpop.f32.mrb[13].mxu1 }
 0x37a   :  { %v964_v40 = vcombine.low %v912_v23, %v914_v24  ;;  %v965_v8 = vcombine.low %v953_v15, %v955_v21  ;;  %v916_v9 = vpop.f32.mrb[14].mxu0  ;;  %v957_v10 = vpop.f32.mrb[14].mxu1 }
 0x37b   :  { %v917_v7 = vpop.f32.mrb[15].mxu0  ;;  %v958_v12 = vpop.f32.mrb[15].mxu1 }
 0x37c   :  { %v972_v6 = vrot.slane %v964_v40, %v4605_v25  ;;  %v979_v11 = vrot.slane %v965_v8, %v4605_v25 }
 0x37e   :  { %v980_v17 = vcombine.low %v972_v6, %v979_v11 }
 0x380   :  { %v982_v22 = vadd.f32 %v980_v17, %v5296_v18 }
 0x382   :  { %v3532_v26 = vmul.f32 -1.442695, %v982_v22  ;;  %v990_v19 = vrot.slane %v982_v22, 6 }
 0x384   :  { %3996 = vpow2.f32 %v3532_v26 }
 0x38e   :  { %v3997_v33 = vpop.eup %3996 }
 0x38f   :  { %v986_v34 = vadd.f32 1.0, %v3997_v33 }
 0x391   :  { %3998 = vrcp.f32 %v986_v34 }
 0x392   :  { %4000 = vtanh.f32 %v990_v19 }
 0x39b   :  { %v3999_v20 = vpop.eup %3998 }
 0x39c   :  { %v994_v36 = vrot.slane %v3999_v20, 2  ;;  %v4001_v23 = vpop.eup %4000  ;;  %v1000_v40 = vrot.slane %v3999_v20, 4 }
 0x39d   :  { %v997_v24 = vmul.f32 %v4001_v23, %v3999_v20 }
 0x39e   :  { %v996_v15 = vmul.f32 %v994_v36, %v4692_v35 }
 0x3a0   :  { %v4735_v21 = vadd.f32 %v997_v24, %v996_v15 }
 0x3a2   :  { %4002 = vtanh.f32 %v4735_v21 }
 0x3ac   :  { %v4003_v8 = vpop.eup %4002 }
 0x3ad   :  { %v1002_v9 = vmul.f32 %v4003_v8, %v1000_v40 }
 0x3af   :  { %1004 = vst [vmem:[#allocation3 + $0x4] sm:$0x3] %v1002_v9  ;;  %v1007_v10 = vpack.c.bf16 %v1002_v9, %v1002_v9 }
 0x3b1   :  { %1041 = vmatmul.mubr.bf16.vlgmr.msra.gmra.mrb[16].mxu0 %v1007_v10  ;;  %1082 = vmatmul.mubr.bf16.vlgmr.msra.gmra.mrb[16].mxu1 %v1007_v10 }
 0x3b2   :  { %1139 = vmatpush1.bf16.msra.mxu0 %v4462_v37  ;;  %1180 = vmatpush1.bf16.msra.mxu1 %v4464_v38 }
 0x3b3   :  { %1140 = vmatprep.subr.bf16.mxu0 %v4466_v39  ;;  %1181 = vmatprep.subr.bf16.mxu1 %v4468_v41 }
 0x3b4   :  { %1170 = vmatprep.mubr.bf16.mxu0 %v4261_v0  ;;  %1211 = vmatprep.mubr.bf16.mxu1 %v4261_v0 }
 0x3b6   :  { %1141 = vmatpush1.bf16.msra.mxu0 %v4472_v42  ;;  %1182 = vmatpush1.bf16.msra.mxu1 %v4476_v43 }
 0x3b7   :  { %1142 = vmatprep.subr.bf16.mxu0 %v4480_v44  ;;  %1183 = vmatprep.subr.bf16.mxu1 %v4482_v45 }
 0x3ba   :  { %1143 = vmatpush1.bf16.msra.mxu0 %v4488_v46  ;;  %1184 = vmatpush1.bf16.msra.mxu1 %v4490_v47 }
 0x3bb   :  { %1144 = vmatprep.subr.bf16.mxu0 %v4492_v48  ;;  %1185 = vmatprep.subr.bf16.mxu1 %v4496_v49 }
 0x3be   :  { %1145 = vmatpush1.bf16.msra.mxu0 %v4498_v50  ;;  %1186 = vmatpush1.bf16.msra.mxu1 %v4502_v51 }
 0x3bf   :  { %1146 = vmatprep.subr.bf16.mxu0 %v4506_v52  ;;  %1187 = vmatprep.subr.bf16.mxu1 %v4508_v53 }
 0x3c2   :  { %1147 = vmatpush1.bf16.msra.mxu0 %v4510_v54  ;;  %1188 = vmatpush1.bf16.msra.mxu1 %v4512_v55 }
 0x3c3   :  { %1148 = vmatprep.subr.bf16.mxu0 %v4514_v56  ;;  %1189 = vmatprep.subr.bf16.mxu1 %v4516_v57 }
 0x3c6   :  { %1149 = vmatpush1.bf16.msra.mxu0 %v4522_v58  ;;  %1190 = vmatpush1.bf16.msra.mxu1 %v4524_v59 }
 0x3c7   :  { %1150 = vmatprep.subr.bf16.mxu0 %v4526_v60  ;;  %1191 = vmatprep.subr.bf16.mxu1 %v4528_v61 }
 0x3ca   :  { %1151 = vmatpush1.bf16.msra.mxu0 %v4534_v62  ;;  %1192 = vmatpush1.bf16.msra.mxu1 %v4536_v63 }
 0x3cb   :  { %1152 = vmatprep.subr.bf16.mxu0 %v4538_v1  ;;  %1193 = vmatprep.subr.bf16.mxu1 %v4540_v2 }
 0x3ce   :  { %1153 = vmatpush1.bf16.msra.mxu0 %v4546_v3  ;;  %1194 = vmatpush1.bf16.msra.mxu1 %v4548_v4 }
 0x3cf   :  { %1268 = vmatprep.subr.bf16.mxu0 %v4451_v28  ;;  %1309 = vmatprep.subr.bf16.mxu1 %v4454_v30  ;;  %v5297_v28 = vcombine.high %v4611_v16, %v4617_v14 }
 0x484   :  { %v1042_v35 = vpop.f32.mrb[16].mxu0  ;;  %v1083_v7 = vpop.f32.mrb[16].mxu1 }
 0x485   :  { %v1044_v12 = vpop.f32.mrb[17].mxu0  ;;  %v1085_v6 = vpop.f32.mrb[17].mxu1 }
 0x486   :  { %v1094_v11 = vcombine.low %v1042_v35, %v1044_v12  ;;  %v1095_v17 = vcombine.low %v1083_v7, %v1085_v6  ;;  %v1046_v18 = vpop.f32.mrb[18].mxu0  ;;  %v1087_v22 = vpop.f32.mrb[18].mxu1 }
 0x487   :  { %v1047_v26 = vpop.f32.mrb[19].mxu0  ;;  %v1088_v33 = vpop.f32.mrb[19].mxu1 }
 0x488   :  { %v1102_v34 = vrot.slane %v1094_v11, %v4605_v25  ;;  %v1109_v19 = vrot.slane %v1095_v17, %v4605_v25 }
 0x48a   :  { %v1110_v20 = vcombine.low %v1102_v34, %v1109_v19  ;;  %v4828_v34 = vld [vmem:[#allocation5] ss:$16 sps:$4 sm:$0xff]   ;;  %v4831_v19 = vld [vmem:[#allocation5 + $0x8] ss:$16 sps:$4 sm:$0xff]  }
 0x48c   :  { %v1112_v36 = vadd.f32 %v1110_v20, %v5297_v28  ;;  %v4834_v20 = vld [vmem:[#allocation5 + $0x24] ss:$16 sps:$4 sm:$0xff]   ;;  %v4837_v28 = vld [vmem:[#allocation5 + $0x2c] ss:$16 sps:$4 sm:$0xff]  }
 0x48e   :  { %v3533_v30 = vmul.f32 -1.442695, %v1112_v36  ;;  %v1120_v24 = vrot.slane %v1112_v36, 6 }
 0x490   :  { %4004 = vpow2.f32 %v3533_v30 }
 0x49a   :  { %v4005_v23 = vpop.eup %4004 }
 0x49b   :  { %v1116_v15 = vadd.f32 1.0, %v4005_v23  ;;  %v4842_v23 = vld [vmem:[#allocation5 + $0x20] ss:$16 sps:$4 sm:$0xff]  }
 0x49d   :  { %4006 = vrcp.f32 %v1116_v15  ;;  %v4845_v15 = vld [vmem:[#allocation5 + $0x28] ss:$16 sps:$4 sm:$0xff]  }
 0x49e   :  { %4008 = vtanh.f32 %v1120_v24  ;;  %v4848_v24 = vld [vmem:[#allocation5 + $0x44] ss:$16 sps:$4 sm:$0xff]  }
 0x4a7   :  { %v4007_v40 = vpop.eup %4006 }
 0x4a8   :  { %v1124_v8 = vrot.slane %v4007_v40, 2  ;;  %v4009_v9 = vpop.eup %4008  ;;  %v1130_v12 = vrot.slane %v4007_v40, 4 }
 0x4a9   :  { %v1127_v35 = vmul.f32 %v4009_v9, %v4007_v40  ;;  %v4851_v40 = vld [vmem:[#allocation5 + $0x4c] ss:$16 sps:$4 sm:$0xff]  }
 0x4aa   :  { %v1126_v10 = vmul.f32 %v1124_v8, %v4735_v21 }
 0x4ac   :  { %v4778_v7 = vadd.f32 %v1127_v35, %v1126_v10 }
 0x4ae   :  { %4010 = vtanh.f32 %v4778_v7 }
 0x4b8   :  { %v4011_v16 = vpop.eup %4010 }
 0x4b9   :  { %v1132_v14 = vmul.f32 %v4011_v16, %v1130_v12  ;;  %v4861_v12 = vld [vmem:[#allocation5 + $0x48] ss:$16 sps:$4 sm:$0xff]  }
 0x4bb   :  { %1134 = vst [vmem:[#allocation3 + $0x6] sm:$0x3] %v1132_v14  ;;  %v1137_v6 = vpack.c.bf16 %v1132_v14, %v1132_v14 }
 0x4bd   :  { %1171 = vmatmul.mubr.bf16.vlgmr.msra.gmra.mrb[20].mxu0 %v1137_v6  ;;  %1212 = vmatmul.mubr.bf16.vlgmr.msra.gmra.mrb[20].mxu1 %v1137_v6  ;;  %v4864_v6 = vld [vmem:[#allocation5 + $0x64] ss:$16 sps:$4 sm:$0xff]  }
 0x4be   :  { %1269 = vmatpush1.bf16.msra.mxu0 %v4462_v37  ;;  %1310 = vmatpush1.bf16.msra.mxu1 %v4464_v38  ;;  %v4813_v37 = vld [vmem:[#allocation5 + $0x4] ss:$16 sps:$4 sm:$0xff]   ;;  %v4816_v38 = vld [vmem:[#allocation5 + $0xc] ss:$16 sps:$4 sm:$0xff]  }
 0x4bf   :  { %1270 = vmatprep.subr.bf16.mxu0 %v4466_v39  ;;  %1311 = vmatprep.subr.bf16.mxu1 %v4468_v41 }
 0x4c0   :  { %1300 = vmatprep.mubr.bf16.mxu0 %v4261_v0  ;;  %1341 = vmatprep.mubr.bf16.mxu1 %v4261_v0 }
 0x4c2   :  { %1271 = vmatpush1.bf16.msra.mxu0 %v4472_v42  ;;  %1312 = vmatpush1.bf16.msra.mxu1 %v4476_v43  ;;  %v1658_v36 = vld [vmem:[#allocation3 + $0x6] sm:$0x3] }
 0x4c3   :  { %1272 = vmatprep.subr.bf16.mxu0 %v4480_v44  ;;  %1313 = vmatprep.subr.bf16.mxu1 %v4482_v45 }
 0x4c6   :  { %1273 = vmatpush1.bf16.msra.mxu0 %v4488_v46  ;;  %1314 = vmatpush1.bf16.msra.mxu1 %v4490_v47 }
 0x4c7   :  { %1274 = vmatprep.subr.bf16.mxu0 %v4492_v48  ;;  %1315 = vmatprep.subr.bf16.mxu1 %v4496_v49 }
 0x4ca   :  { %1275 = vmatpush1.bf16.msra.mxu0 %v4498_v50  ;;  %1316 = vmatpush1.bf16.msra.mxu1 %v4502_v51 }
 0x4cb   :  { %1276 = vmatprep.subr.bf16.mxu0 %v4506_v52  ;;  %1317 = vmatprep.subr.bf16.mxu1 %v4508_v53  ;;  %v5298_v53 = vcombine.low %v4628_v27, %v4634_v31 }
 0x4ce   :  { %1277 = vmatpush1.bf16.msra.mxu0 %v4510_v54  ;;  %1318 = vmatpush1.bf16.msra.mxu1 %v4512_v55 }
 0x4cf   :  { %1278 = vmatprep.subr.bf16.mxu0 %v4514_v56  ;;  %1319 = vmatprep.subr.bf16.mxu1 %v4516_v57 }
 0x4d2   :  { %1279 = vmatpush1.bf16.msra.mxu0 %v4522_v58  ;;  %1320 = vmatpush1.bf16.msra.mxu1 %v4524_v59 }
 0x4d3   :  { %1280 = vmatprep.subr.bf16.mxu0 %v4526_v60  ;;  %1321 = vmatprep.subr.bf16.mxu1 %v4528_v61 }
 0x4d6   :  { %1281 = vmatpush1.bf16.msra.mxu0 %v4534_v62  ;;  %1322 = vmatpush1.bf16.msra.mxu1 %v4536_v63 }
 0x4d7   :  { %1282 = vmatprep.subr.bf16.mxu0 %v4538_v1  ;;  %1323 = vmatprep.subr.bf16.mxu1 %v4540_v2 }
 0x4da   :  { %1283 = vmatpush1.bf16.msra.mxu0 %v4546_v3  ;;  %1324 = vmatpush1.bf16.msra.mxu1 %v4548_v4 }
 0x4db   :  { %1398 = vmatprep.subr.bf16.mxu0 %v4813_v37  ;;  %1439 = vmatprep.subr.bf16.mxu1 %v4816_v38 }
 0x590   :  { %v1172_v39 = vpop.f32.mrb[20].mxu0  ;;  %v1213_v41 = vpop.f32.mrb[20].mxu1 }
 0x591   :  { %v1174_v42 = vpop.f32.mrb[21].mxu0  ;;  %v1215_v43 = vpop.f32.mrb[21].mxu1 }
 0x592   :  { %v1224_v44 = vcombine.low %v1172_v39, %v1174_v42  ;;  %v1225_v45 = vcombine.low %v1213_v41, %v1215_v43  ;;  %v1176_v46 = vpop.f32.mrb[22].mxu0  ;;  %v1217_v47 = vpop.f32.mrb[22].mxu1  ;;  %v4867_v39 = vld [vmem:[#allocation5 + $0x6c] ss:$16 sps:$4 sm:$0xff]   ;;  %v4870_v41 = vld [vmem:[#allocation5 + $0x60] ss:$16 sps:$4 sm:$0xff]  }
 0x593   :  { %v1177_v48 = vpop.f32.mrb[23].mxu0  ;;  %v1218_v49 = vpop.f32.mrb[23].mxu1  ;;  %v4873_v42 = vld [vmem:[#allocation5 + $0x68] ss:$16 sps:$4 sm:$0xff]   ;;  %v4876_v43 = vld [vmem:[#allocation5 + $0x84] ss:$16 sps:$4 sm:$0xff]  }
 0x594   :  { %v1232_v50 = vrot.slane %v1224_v44, %v4605_v25  ;;  %v1239_v51 = vrot.slane %v1225_v45, %v4605_v25  ;;  %v4879_v44 = vld [vmem:[#allocation5 + $0x8c] ss:$16 sps:$4 sm:$0xff]   ;;  %v4882_v45 = vld [vmem:[#allocation5 + $0x80] ss:$16 sps:$4 sm:$0xff]   ;;  %v4885_v46 = vld [vmem:[#allocation5 + $0x88] ss:$16 sps:$4 sm:$0xff]  }
 0x595   :  { %v4888_v47 = vld [vmem:[#allocation5 + $0xa4] ss:$16 sps:$4 sm:$0xff]   ;;  %v4891_v48 = vld [vmem:[#allocation5 + $0xac] ss:$16 sps:$4 sm:$0xff]   ;;  %v4894_v49 = vld [vmem:[#allocation5 + $0xa0] ss:$16 sps:$4 sm:$0xff]  }
 0x596   :  { %v1240_v52 = vcombine.low %v1232_v50, %v1239_v51  ;;  %v4897_v50 = vld [vmem:[#allocation5 + $0xa8] ss:$16 sps:$4 sm:$0xff]   ;;  %v4900_v51 = vld [vmem:[#allocation5 + $0xc4] ss:$16 sps:$4 sm:$0xff]  }
 0x598   :  { %v1242_v54 = vadd.f32 %v1240_v52, %v5298_v53  ;;  %v4903_v52 = vld [vmem:[#allocation5 + $0xcc] ss:$16 sps:$4 sm:$0xff]  }
 0x59a   :  { %v3534_v55 = vmul.f32 -1.442695, %v1242_v54  ;;  %v1250_v58 = vrot.slane %v1242_v54, 6 }
 0x59c   :  { %4012 = vpow2.f32 %v3534_v55 }
 0x5a6   :  { %v4013_v56 = vpop.eup %4012 }
 0x5a7   :  { %v1246_v57 = vadd.f32 1.0, %v4013_v56 }
 0x5a9   :  { %4014 = vrcp.f32 %v1246_v57 }
 0x5aa   :  { %4016 = vtanh.f32 %v1250_v58 }
 0x5b3   :  { %v4015_v59 = vpop.eup %4014 }
 0x5b4   :  { %v1254_v60 = vrot.slane %v4015_v59, 2  ;;  %v4017_v61 = vpop.eup %4016  ;;  %v1260_v18 = vrot.slane %v4015_v59, 4 }
 0x5b5   :  { %v1257_v11 = vmul.f32 %v4017_v61, %v4015_v59 }
 0x5b6   :  { %v1256_v21 = vmul.f32 %v1254_v60, %v4778_v7  ;;  %v4858_v7 = vld [vmem:[#allocation5 + $0x40] ss:$16 sps:$4 sm:$0xff]  }
 0x5b8   :  { %v4825_v17 = vadd.f32 %v1257_v11, %v1256_v21 }
 0x5ba   :  { %4018 = vtanh.f32 %v4825_v17 }
 0x5c4   :  { %v4019_v22 = vpop.eup %4018 }
 0x5c5   :  { %v1262_v26 = vmul.f32 %v4019_v22, %v1260_v18 }
 0x5c7   :  { %1264 = vst [vmem:[#allocation3 + $0x8] sm:$0x3] %v1262_v26  ;;  %v1267_v33 = vpack.c.bf16 %v1262_v26, %v1262_v26 }
 0x5c9   :  { %1301 = vmatmul.mubr.bf16.vlgmr.msra.gmra.mrb[24].mxu0 %v1267_v33  ;;  %1342 = vmatmul.mubr.bf16.vlgmr.msra.gmra.mrb[24].mxu1 %v1267_v33 }
 0x5ca   :  { %1399 = vmatpush1.bf16.msra.mxu0 %v4828_v34  ;;  %1440 = vmatpush1.bf16.msra.mxu1 %v4831_v19 }
 0x5cb   :  { %1400 = vmatprep.subr.bf16.mxu0 %v4834_v20  ;;  %1441 = vmatprep.subr.bf16.mxu1 %v4837_v28 }
 0x5cc   :  { %1430 = vmatprep.mubr.bf16.mxu0 %v4261_v0  ;;  %1471 = vmatprep.mubr.bf16.mxu1 %v4261_v0 }
 0x5ce   :  { %v1659_v30 = vld [vmem:[#allocation3 + $0x8] sm:$0x3]  ;;  %1401 = vmatpush1.bf16.msra.mxu0 %v4842_v23  ;;  %1442 = vmatpush1.bf16.msra.mxu1 %v4845_v15 }
 0x5cf   :  { %1402 = vmatprep.subr.bf16.mxu0 %v4848_v24  ;;  %1443 = vmatprep.subr.bf16.mxu1 %v4851_v40  ;;  %v1748_v8 = vsel %vm1663_vm1, %v1658_v36, %v1659_v30  ;;  %v1776_v9 = vsel %vm1663_vm1, %v1659_v30, %v1658_v36 }
 0x5d0   :  { %v1756_v10 = vrot.slane %v1748_v8, %v4421_v13  ;;  %v1784_v35 = vrot.slane %v1776_v9, %v4421_v13 }
 0x5d2   :  { %1403 = vmatpush1.bf16.msra.mxu0 %v4858_v7  ;;  %1444 = vmatpush1.bf16.msra.mxu1 %v4861_v12  ;;  %v1757_v16 = vcombine.high %v1756_v10, %v1756_v10  ;;  %3544 = vst.sshfl [vmem:[#allocation4 + $0x3] sm:$0x1 pattern:$0x73625140] %v1756_v10  ;;  %v1785_v14 = vcombine.high %v1784_v35, %v1784_v35 }
 0x5d3   :  { %3546 = vst.sshfl [vmem:[#allocation4 + $0x4] sm:$0x1 pattern:$0x73625140] %v1784_v35  ;;  %1404 = vmatprep.subr.bf16.mxu0 %v4864_v6  ;;  %1445 = vmatprep.subr.bf16.mxu1 %v4867_v39 }
 0x5d4   :  { %3545 = vst.sshfl [vmem:[#allocation4 + $0xb] sm:$0x1 pattern:$0x73625140] %v1757_v16  ;;  %v4111_v16 = vld [vmem:[#allocation5 + $0xe8] ss:$16 sps:$4 sm:$0xff]  }
 0x5d5   :  { %3547 = vst.sshfl [vmem:[#allocation4 + $0xc] sm:$0x1 pattern:$0x73625140] %v1785_v14 }
 0x5d6   :  { %1405 = vmatpush1.bf16.msra.mxu0 %v4870_v41  ;;  %1446 = vmatpush1.bf16.msra.mxu1 %v4873_v42 }
 0x5d7   :  { %1406 = vmatprep.subr.bf16.mxu0 %v4876_v43  ;;  %1447 = vmatprep.subr.bf16.mxu1 %v4879_v44 }
 0x5da   :  { %1407 = vmatpush1.bf16.msra.mxu0 %v4882_v45  ;;  %1448 = vmatpush1.bf16.msra.mxu1 %v4885_v46 }
 0x5db   :  { %1408 = vmatprep.subr.bf16.mxu0 %v4888_v47  ;;  %1449 = vmatprep.subr.bf16.mxu1 %v4891_v48 }
 0x5de   :  { %1409 = vmatpush1.bf16.msra.mxu0 %v4894_v49  ;;  %1450 = vmatpush1.bf16.msra.mxu1 %v4897_v50 }
 0x5df   :  { %1410 = vmatprep.subr.bf16.mxu0 %v4900_v51  ;;  %1451 = vmatprep.subr.bf16.mxu1 %v4903_v52 }
 0x5e2   :  { %1411 = vmatpush1.bf16.msra.mxu0 %v4534_v62  ;;  %1452 = vmatpush1.bf16.msra.mxu1 %v4536_v63 }
 0x5e3   :  { %1412 = vmatprep.subr.bf16.mxu0 %v4538_v1  ;;  %1453 = vmatprep.subr.bf16.mxu1 %v4540_v2 }
 0x5e6   :  { %1413 = vmatpush1.bf16.msra.mxu0 %v4546_v3  ;;  %1454 = vmatpush1.bf16.msra.mxu1 %v4548_v4  ;;  %v5299_v4 = vcombine.high %v4628_v27, %v4634_v31 }
 0x5e7   :  { %1528 = vmatprep.subr.bf16.mxu0 %v4813_v37  ;;  %1569 = vmatprep.subr.bf16.mxu1 %v4816_v38 }
 0x69c   :  { %v1302_v53 = vpop.f32.mrb[24].mxu0  ;;  %v1343_v54 = vpop.f32.mrb[24].mxu1 }
 0x69d   :  { %v1304_v55 = vpop.f32.mrb[25].mxu0  ;;  %v1345_v56 = vpop.f32.mrb[25].mxu1 }
 0x69e   :  { %v1354_v57 = vcombine.low %v1302_v53, %v1304_v55  ;;  %v1355_v62 = vcombine.low %v1343_v54, %v1345_v56  ;;  %v1306_v58 = vpop.f32.mrb[26].mxu0  ;;  %v1347_v63 = vpop.f32.mrb[26].mxu1 }
 0x69f   :  { %v1307_v59 = vpop.f32.mrb[27].mxu0  ;;  %v1348_v1 = vpop.f32.mrb[27].mxu1 }
 0x6a0   :  { %v1362_v2 = vrot.slane %v1354_v57, %v4605_v25  ;;  %v1369_v3 = vrot.slane %v1355_v62, %v4605_v25 }
 0x6a2   :  { %v1370_v60 = vcombine.low %v1362_v2, %v1369_v3 }
 0x6a4   :  { %v1372_v37 = vadd.f32 %v1370_v60, %v5299_v4 }
 0x6a6   :  { %v3535_v38 = vmul.f32 -1.442695, %v1372_v37  ;;  %v1380_v11 = vrot.slane %v1372_v37, 6  ;;  %v1656_v37 = vld [vmem:[#allocation3 + $0x2] sm:$0x3] }
 0x6a8   :  { %4020 = vpow2.f32 %v3535_v38 }
 0x6b2   :  { %v4021_v61 = vpop.eup %4020 }
 0x6b3   :  { %v1376_v21 = vadd.f32 1.0, %v4021_v61 }
 0x6b5   :  { %4022 = vrcp.f32 %v1376_v21 }
 0x6b6   :  { %4024 = vtanh.f32 %v1380_v11 }
 0x6bf   :  { %v4023_v18 = vpop.eup %4022 }
 0x6c0   :  { %v1384_v22 = vrot.slane %v4023_v18, 2  ;;  %v4025_v26 = vpop.eup %4024  ;;  %v1390_v8 = vrot.slane %v4023_v18, 4 }
 0x6c1   :  { %v1387_v36 = vmul.f32 %v4025_v26, %v4023_v18 }
 0x6c2   :  { %v1386_v33 = vmul.f32 %v1384_v22, %v4825_v17  ;;  %v1657_v17 = vld [vmem:[#allocation3 + $0x4] sm:$0x3] }
 0x6c4   :  { %v4920_v30 = vadd.f32 %v1387_v36, %v1386_v33  ;;  %v3932_v33 = vld [vmem:[#allocation10 + $0x4] ss:$12 sps:$4 sm:$0xff]   ;;  %v3930_v36 = vld [vmem:[#allocation10] ss:$12 sps:$4 sm:$0xff]  }
 0x6c6   :  { %4026 = vtanh.f32 %v4920_v30 }
 0x6d0   :  { %v4027_v27 = vpop.eup %4026 }
 0x6d1   :  { %v1392_v31 = vmul.f32 %v4027_v27, %v1390_v8  ;;  %v3936_v8 = vld [vmem:[#allocation10 + $0x1c] ss:$12 sps:$4 sm:$0xff]   ;;  %v3934_v27 = vld [vmem:[#allocation10 + $0x18] ss:$12 sps:$4 sm:$0xff]  }
 0x6d3   :  { %1394 = vst [vmem:[#allocation3 + $0xa] sm:$0x3] %v1392_v31  ;;  %v1397_v9 = vpack.c.bf16 %v1392_v31, %v1392_v31  ;;  %v3937_v31 = vld [vmem:[#allocation10 + $0x20] ss:$12 sps:$4 sm:$0xff]  }
 0x6d5   :  { %1431 = vmatmul.mubr.bf16.vlgmr.msra.gmra.mrb[28].mxu0 %v1397_v9  ;;  %1472 = vmatmul.mubr.bf16.vlgmr.msra.gmra.mrb[28].mxu1 %v1397_v9  ;;  %v3940_v9 = vld [vmem:[#allocation10 + $0x34] ss:$12 sps:$4 sm:$0xff]  }
 0x6d6   :  { %1529 = vmatpush1.bf16.msra.mxu0 %v4828_v34  ;;  %1570 = vmatpush1.bf16.msra.mxu1 %v4831_v19 }
 0x6d7   :  { %1530 = vmatprep.subr.bf16.mxu0 %v4834_v20  ;;  %1571 = vmatprep.subr.bf16.mxu1 %v4837_v28 }
 0x6d8   :  { %1560 = vmatprep.mubr.bf16.mxu0 %v4261_v0  ;;  %1601 = vmatprep.mubr.bf16.mxu1 %v4261_v0 }
 0x6da   :  { %v1660_v10 = vld [vmem:[#allocation3 + $0xa] sm:$0x3]  ;;  %1531 = vmatpush1.bf16.msra.mxu0 %v4842_v23  ;;  %1572 = vmatpush1.bf16.msra.mxu1 %v4845_v15  ;;  %v4106_v15 = vld [vmem:[#allocation5 + $0xc0] ss:$16 sps:$4 sm:$0xff]  }
 0x6db   :  { %1532 = vmatprep.subr.bf16.mxu0 %v4848_v24  ;;  %1573 = vmatprep.subr.bf16.mxu1 %v4851_v40  ;;  %v1720_v34 = vsel %vm1663_vm1, %v1657_v17, %v1660_v10  ;;  %v1804_v19 = vsel %vm1663_vm1, %v1660_v10, %v1657_v17  ;;  %v4107_v24 = vld [vmem:[#allocation5 + $0xc8] ss:$16 sps:$4 sm:$0xff]   ;;  %v4108_v40 = vld [vmem:[#allocation5 + $0xe4] ss:$16 sps:$4 sm:$0xff]  }
 0x6dc   :  { %v1728_v20 = vrot.slane %v1720_v34, %v4421_v13  ;;  %v1812_v28 = vrot.slane %v1804_v19, %v4421_v13  ;;  %v3938_v17 = vld [vmem:[#allocation10 + $0x30] ss:$12 sps:$4 sm:$0xff]   ;;  %v3941_v10 = vld [vmem:[#allocation10 + $0x38] ss:$12 sps:$4 sm:$0xff]   ;;  %v3942_v19 = vld [vmem:[#allocation10 + $0x48] ss:$12 sps:$4 sm:$0xff]  }
 0x6dd   :  { %v3944_v34 = vld [vmem:[#allocation10 + $0x4c] ss:$12 sps:$4 sm:$0xff]  }
 0x6de   :  { %1533 = vmatpush1.bf16.msra.mxu0 %v4858_v7  ;;  %1574 = vmatpush1.bf16.msra.mxu1 %v4861_v12  ;;  %v1729_v35 = vcombine.high %v1728_v20, %v1728_v20  ;;  %3542 = vst.sshfl [vmem:[#allocation4 + $0x2] sm:$0x1 pattern:$0x73625140] %v1728_v20  ;;  %v1813_v23 = vcombine.high %v1812_v28, %v1812_v28  ;;  %v4109_v7 = vld [vmem:[#allocation5 + $0xec] ss:$16 sps:$4 sm:$0xff]  }
 0x6df   :  { %3548 = vst.sshfl [vmem:[#allocation4 + $0x5] sm:$0x1 pattern:$0x73625140] %v1812_v28  ;;  %1534 = vmatprep.subr.bf16.mxu0 %v4864_v6  ;;  %1575 = vmatprep.subr.bf16.mxu1 %v4867_v39  ;;  %v4110_v12 = vld [vmem:[#allocation5 + $0xe0] ss:$16 sps:$4 sm:$0xff]  }
 0x6e0   :  { %3543 = vst.sshfl [vmem:[#allocation4 + $0xa] sm:$0x1 pattern:$0x73625140] %v1729_v35  ;;  %v3945_v20 = vld [vmem:[#allocation10 + $0x50] ss:$12 sps:$4 sm:$0xff]  }
 0x6e1   :  { %3549 = vst.sshfl [vmem:[#allocation4 + $0xd] sm:$0x1 pattern:$0x73625140] %v1813_v23  ;;  %v3948_v28 = vld [vmem:[#allocation10 + $0x64] ss:$12 sps:$4 sm:$0xff]  }
 0x6e2   :  { %1535 = vmatpush1.bf16.msra.mxu0 %v4870_v41  ;;  %1576 = vmatpush1.bf16.msra.mxu1 %v4873_v42  ;;  %v3946_v35 = vld [vmem:[#allocation10 + $0x60] ss:$12 sps:$4 sm:$0xff]   ;;  %v3949_v23 = vld [vmem:[#allocation10 + $0x68] ss:$12 sps:$4 sm:$0xff]  }
 0x6e3   :  { %1536 = vmatprep.subr.bf16.mxu0 %v4876_v43  ;;  %1577 = vmatprep.subr.bf16.mxu1 %v4879_v44 }
 0x6e6   :  { %1537 = vmatpush1.bf16.msra.mxu0 %v4882_v45  ;;  %1578 = vmatpush1.bf16.msra.mxu1 %v4885_v46 }
 0x6e7   :  { %1538 = vmatprep.subr.bf16.mxu0 %v4888_v47  ;;  %1579 = vmatprep.subr.bf16.mxu1 %v4891_v48 }
 0x6ea   :  { %1539 = vmatpush1.bf16.msra.mxu0 %v4894_v49  ;;  %1580 = vmatpush1.bf16.msra.mxu1 %v4897_v50 }
 0x6eb   :  { %1540 = vmatprep.subr.bf16.mxu0 %v4900_v51  ;;  %1581 = vmatprep.subr.bf16.mxu1 %v4903_v52  ;;  %v5300_v51 = vcombine.low %v4631_v29, %v4637_v32 }
 0x6ee   :  { %1541 = vmatpush1.bf16.msra.mxu0 %v4106_v15  ;;  %1582 = vmatpush1.bf16.msra.mxu1 %v4107_v24  ;;  %v3952_v15 = vld [vmem:[#allocation10 + $0x7c] ss:$12 sps:$4 sm:$0xff]   ;;  %v3950_v24 = vld [vmem:[#allocation10 + $0x78] ss:$12 sps:$4 sm:$0xff]  }
 0x6ef   :  { %1542 = vmatprep.subr.bf16.mxu0 %v4108_v40  ;;  %1583 = vmatprep.subr.bf16.mxu1 %v4109_v7  ;;  %v3953_v40 = vld [vmem:[#allocation10 + $0x80] ss:$12 sps:$4 sm:$0xff]  }
 0x6f0   :  { %v3956_v7 = vld [vmem:[#allocation10 + $0x94] ss:$12 sps:$4 sm:$0xff]  }
 0x6f2   :  { %1543 = vmatpush1.bf16.msra.mxu0 %v4110_v12  ;;  %1584 = vmatpush1.bf16.msra.mxu1 %v4111_v16  ;;  %v3954_v12 = vld [vmem:[#allocation10 + $0x90] ss:$12 sps:$4 sm:$0xff]   ;;  %v3957_v16 = vld [vmem:[#allocation10 + $0x98] ss:$12 sps:$4 sm:$0xff]  }
 0x6f3   :  { %2068 = vmatprep.subr.bf16.mxu0 %v3932_v33 }
 0x7a8   :  { %v1432_v14 = vpop.f32.mrb[28].mxu0  ;;  %v1473_v6 = vpop.f32.mrb[28].mxu1 }
 0x7a9   :  { %v1434_v39 = vpop.f32.mrb[29].mxu0  ;;  %v1475_v41 = vpop.f32.mrb[29].mxu1 }
 0x7aa   :  { %v1484_v42 = vcombine.low %v1432_v14, %v1434_v39  ;;  %v1485_v43 = vcombine.low %v1473_v6, %v1475_v41  ;;  %v1436_v44 = vpop.f32.mrb[30].mxu0  ;;  %v1477_v45 = vpop.f32.mrb[30].mxu1  ;;  %v3960_v14 = vld [vmem:[#allocation10 + $0xac] ss:$12 sps:$4 sm:$0xff]   ;;  %v3958_v6 = vld [vmem:[#allocation10 + $0xa8] ss:$12 sps:$4 sm:$0xff]  }
 0x7ab   :  { %v1437_v46 = vpop.f32.mrb[31].mxu0  ;;  %v1478_v47 = vpop.f32.mrb[31].mxu1  ;;  %v3961_v39 = vld [vmem:[#allocation10 + $0xb0] ss:$12 sps:$4 sm:$0xff]  }
 0x7ac   :  { %v1492_v48 = vrot.slane %v1484_v42, %v4605_v25  ;;  %v1499_v49 = vrot.slane %v1485_v43, %v4605_v25 }
 0x7ae   :  { %v1500_v50 = vcombine.low %v1492_v48, %v1499_v49 }
 0x7b0   :  { %v1502_v52 = vadd.f32 %v1500_v50, %v5300_v51 }
 0x7b2   :  { %v3536_v53 = vmul.f32 -1.442695, %v1502_v52  ;;  %v1510_v56 = vrot.slane %v1502_v52, 6 }
 0x7b4   :  { %4028 = vpow2.f32 %v3536_v53 }
 0x7be   :  { %v4029_v54 = vpop.eup %4028 }
 0x7bf   :  { %v1506_v55 = vadd.f32 1.0, %v4029_v54  ;;  %v5301_v54 = vcombine.high %v4631_v29, %v4637_v32  ;;  %v1655_v29 = vld [vmem:[#allocation3] sm:$0x3] }
 0x7c1   :  { %4030 = vrcp.f32 %v1506_v55 }
 0x7c2   :  { %4032 = vtanh.f32 %v1510_v56 }
 0x7cb   :  { %v4031_v57 = vpop.eup %4030 }
 0x7cc   :  { %v1514_v62 = vrot.slane %v4031_v57, 2  ;;  %v4033_v58 = vpop.eup %4032  ;;  %v1520_v2 = vrot.slane %v4031_v57, 4 }
 0x7cd   :  { %v1517_v59 = vmul.f32 %v4033_v58, %v4031_v57 }
 0x7ce   :  { %v1516_v63 = vmul.f32 %v1514_v62, %v4920_v30  ;;  %v3933_v30 = vld [vmem:[#allocation10 + $0x8] ss:$12 sps:$4 sm:$0xff]  }
 0x7d0   :  { %v4959_v1 = vadd.f32 %v1517_v59, %v1516_v63 }
 0x7d2   :  { %4034 = vtanh.f32 %v4959_v1 }
 0x7dc   :  { %v4035_v3 = vpop.eup %4034 }
 0x7dd   :  { %v1522_v60 = vmul.f32 %v4035_v3, %v1520_v2 }
 0x7df   :  { %1524 = vst [vmem:[#allocation3 + $0xc] sm:$0x3] %v1522_v60  ;;  %v1527_v4 = vpack.c.bf16 %v1522_v60, %v1522_v60 }
 0x7e1   :  { %1561 = vmatmul.mubr.bf16.vlgmr.msra.gmra.mrb[32].mxu0 %v1527_v4  ;;  %1602 = vmatmul.mubr.bf16.vlgmr.msra.gmra.mrb[32].mxu1 %v1527_v4 }
 0x7e2   :  { %2100 = vmatprep.mubr.bf16.mxu0 %v4261_v0  ;;  %v4264_v0 = vmov 0.0   ;;  %2069 = vmatpush1.bf16.msra.mxu0 %v3930_v36 }
 0x7e3   :  { %3678 = vmatprep.subr.bf16.mxu1 %v4264_v0  ;;  %2070 = vmatprep.subr.bf16.mxu0 %v3936_v8 }
 0x7e4   :  { %3679 = vmatpush3.bf16.msra.mxu1 %v3933_v30  ;;  %3694 = vmatprep.mubr.msk.bf16.mxu1 %vm4265_vm2, %v4264_v0  ;;  %v4993_v30 = vld [vmem:[#allocation11] sm:$0x7] }
 0x7e5   :  { %3680 = vmatprep.subr.bf16.mxu1 %v4264_v0 }
 0x7e6   :  { %v1661_v38 = vld [vmem:[#allocation3 + $0xc] sm:$0x3]  ;;  %2071 = vmatpush1.bf16.msra.mxu0 %v3934_v27  ;;  %v5303_v27 = vsub.s32 0, %v4400_v5 }
 0x7e7   :  { %v1692_v61 = vsel %vm1663_vm1, %v1656_v37, %v1661_v38  ;;  %v1832_v21 = vsel %vm1663_vm1, %v1661_v38, %v1656_v37  ;;  %2072 = vmatprep.subr.bf16.mxu0 %v3940_v9 }
 0x7e8   :  { %v1700_v11 = vrot.slane %v1692_v61, %v4421_v13  ;;  %v1840_v18 = vrot.slane %v1832_v21, %v4421_v13  ;;  %3681 = vmatpush3.bf16.msra.mxu1 %v3937_v31  ;;  %v1928_v31 = vrot.slane %v4993_v30, %v5303_v27 }
 0x7e9   :  { %3682 = vmatprep.subr.bf16.mxu1 %v4264_v0 }
 0x7ea   :  { %v1701_v22 = vcombine.high %v1700_v11, %v1700_v11  ;;  %3540 = vst.sshfl [vmem:[#allocation4 + $0x1] sm:$0x1 pattern:$0x73625140] %v1700_v11  ;;  %v1841_v26 = vcombine.high %v1840_v18, %v1840_v18  ;;  %2073 = vmatpush1.bf16.msra.mxu0 %v3938_v17 }
 0x7eb   :  { %3550 = vst.sshfl [vmem:[#allocation4 + $0x6] sm:$0x1 pattern:$0x73625140] %v1840_v18  ;;  %2074 = vmatprep.subr.bf16.mxu0 %v3944_v34 }
 0x7ec   :  { %3541 = vst.sshfl [vmem:[#allocation4 + $0x9] sm:$0x1 pattern:$0x73625140] %v1701_v22  ;;  %3683 = vmatpush3.bf16.msra.mxu1 %v3941_v10 }
 0x7ed   :  { %3551 = vst.sshfl [vmem:[#allocation4 + $0xe] sm:$0x1 pattern:$0x73625140] %v1841_v26  ;;  %3684 = vmatprep.subr.bf16.mxu1 %v4264_v0 }
 0x7ee   :  { %2075 = vmatpush1.bf16.msra.mxu0 %v3942_v19 }
 0x7ef   :  { %2076 = vmatprep.subr.bf16.mxu0 %v3948_v28 }
 0x7f0   :  { %3685 = vmatpush3.bf16.msra.mxu1 %v3945_v20 }
 0x7f1   :  { %3686 = vmatprep.subr.bf16.mxu1 %v4264_v0 }
 0x7f2   :  { %2077 = vmatpush1.bf16.msra.mxu0 %v3946_v35 }
 0x7f3   :  { %2078 = vmatprep.subr.bf16.mxu0 %v3952_v15 }
 0x7f4   :  { %3687 = vmatpush3.bf16.msra.mxu1 %v3949_v23 }
 0x7f5   :  { %3688 = vmatprep.subr.bf16.mxu1 %v4264_v0 }
 0x7f6   :  { %2079 = vmatpush1.bf16.msra.mxu0 %v3950_v24 }
 0x7f7   :  { %2080 = vmatprep.subr.bf16.mxu0 %v3956_v7 }
 0x7f8   :  { %3689 = vmatpush3.bf16.msra.mxu1 %v3953_v40 }
 0x7f9   :  { %3690 = vmatprep.subr.bf16.mxu1 %v4264_v0 }
 0x7fa   :  { %2081 = vmatpush1.bf16.msra.mxu0 %v3954_v12 }
 0x7fb   :  { %2082 = vmatprep.subr.bf16.mxu0 %v3960_v14 }
 0x7fc   :  { %3691 = vmatpush3.bf16.msra.mxu1 %v3957_v16 }
 0x7fd   :  { %3692 = vmatprep.subr.bf16.mxu1 %v4264_v0 }
 0x7fe   :  { %2083 = vmatpush1.bf16.msra.mxu0 %v3958_v6 }
 0x7ff   :  { %3698 = vmatprep.subr.bf16.mxu0 %v4264_v0 }
 0x800   :  { %3693 = vmatpush3.bf16.msra.mxu1 %v3961_v39 }
 0x801   :  { %3704 = vmatprep.subr.bf16.mxu1 %v4264_v0 }
 0x8b4   :  { %v1562_v41 = vpop.f32.mrb[32].mxu0  ;;  %v1603_v42 = vpop.f32.mrb[32].mxu1 }
 0x8b5   :  { %v1564_v43 = vpop.f32.mrb[33].mxu0  ;;  %v1605_v44 = vpop.f32.mrb[33].mxu1 }
 0x8b6   :  { %v1614_v45 = vcombine.low %v1562_v41, %v1564_v43  ;;  %v1615_v46 = vcombine.low %v1603_v42, %v1605_v44  ;;  %v1566_v47 = vpop.f32.mrb[34].mxu0  ;;  %v1607_v48 = vpop.f32.mrb[34].mxu1 }
 0x8b7   :  { %v1567_v49 = vpop.f32.mrb[35].mxu0  ;;  %v1608_v50 = vpop.f32.mrb[35].mxu1 }
 0x8b8   :  { %v1622_v51 = vrot.slane %v1614_v45, %v4605_v25  ;;  %v1629_v52 = vrot.slane %v1615_v46, %v4605_v25 }
 0x8ba   :  { %v1630_v53 = vcombine.low %v1622_v51, %v1629_v52 }
 0x8bc   :  { %v1632_v55 = vadd.f32 %v1630_v53, %v5301_v54 }
 0x8be   :  { %v3537_v56 = vmul.f32 -1.442695, %v1632_v55  ;;  %v1640_v58 = vrot.slane %v1632_v55, 6 }
 0x8c0   :  { %4036 = vpow2.f32 %v3537_v56 }
 0x8ca   :  { %v4037_v57 = vpop.eup %4036 }
 0x8cb   :  { %v1636_v62 = vadd.f32 1.0, %v4037_v57 }
 0x8cd   :  { %4038 = vrcp.f32 %v1636_v62 }
 0x8ce   :  { %4040 = vtanh.f32 %v1640_v58 }
 0x8d7   :  { %v4039_v63 = vpop.eup %4038 }
 0x8d8   :  { %v1644_v59 = vrot.slane %v4039_v63, 2  ;;  %v4041_v2 = vpop.eup %4040  ;;  %v1650_v25 = vrot.slane %v4039_v63, 4 }
 0x8d9   :  { %v1647_v60 = vmul.f32 %v4041_v2, %v4039_v63 }
 0x8da   :  { %v1646_v3 = vmul.f32 %v1644_v59, %v4959_v1 }
 0x8dc   :  { %v1648_v4 = vadd.f32 %v1647_v60, %v1646_v3  ;;  %v5304_v60 = vsub.s32 2, %v4400_v5 }
 0x8de   :  { %4042 = vtanh.f32 %v1648_v4  ;;  %v1936_v4 = vrot.slane %v4993_v30, %v5304_v60 }
 0x8e8   :  { %v4043_v37 = vpop.eup %4042 }
 0x8e9   :  { %v1652_v38 = vmul.f32 %v4043_v37, %v1650_v25 }
 0x8eb   :  { %1654 = vst [vmem:[#allocation3 + $0xe] sm:$0x3] %v1652_v38 }
 0x8f2   :  { %v1662_v32 = vld [vmem:[#allocation3 + $0xe] sm:$0x3] }
 0x8f3   :  { %v1664_v61 = vsel %vm1663_vm1, %v1655_v29, %v1662_v32  ;;  %v1860_v21 = vsel %vm1663_vm1, %v1662_v32, %v1655_v29 }
 0x8f4   :  { %v1672_v11 = vrot.slane %v1664_v61, %v4421_v13  ;;  %v1868_v18 = vrot.slane %v1860_v21, %v4421_v13  ;;  %v5302_v13 = vsub.s32 1, %v4400_v5 }
 0x8f6   :  { %v1673_v22 = vcombine.high %v1672_v11, %v1672_v11  ;;  %3538 = vst.sshfl [vmem:[#allocation4] sm:$0x1 pattern:$0x73625140] %v1672_v11  ;;  %v1869_v1 = vcombine.high %v1868_v18, %v1868_v18  ;;  %v1932_v8 = vrot.slane %v4993_v30, %v5302_v13 }
 0x8f7   :  { %3552 = vst.sshfl [vmem:[#allocation4 + $0x7] sm:$0x1 pattern:$0x73625140] %v1868_v18 }
 0x8f8   :  { %3539 = vst.sshfl [vmem:[#allocation4 + $0x8] sm:$0x1 pattern:$0x73625140] %v1673_v22 }
 0x8f9   :  { %3553 = vst.sshfl [vmem:[#allocation4 + $0xf] sm:$0x1 pattern:$0x73625140] %v1869_v1 }
 0x8fe   :  { %v1888_v26 = vld [vmem:[#allocation4] sm:$0xff] }
 0x900   :  { %v1889_v33 = vld [vmem:[#allocation4 + $0x8] sm:$0xff] }
 0x901   :  { %v1890_v36 = vpack.c.bf16 %v1889_v33, %v1888_v26 }
 0x903   :  { %2101 = vmatmul.mubr.bf16.vlgmr.msra.gmra.mrb[36].mxu0 %v1890_v36  ;;  %3695 = vmatmul.mubr.bf16.vlgmr.msra.gmra.mrb[36].mxu1 %v1890_v36 }
 0x904   :  { %3700 = vmatprep.mubr.msk.bf16.mxu0 %vm4265_vm2, %v4264_v0  ;;  %3706 = vmatprep.mubr.msk.bf16.mxu1 %vm4265_vm2, %v4264_v0 }
 0x9d6   :  { %v2102_v9 = vpop.f32.mrb[36].mxu0  ;;  %v5001_v17 = vpop.f32.mrb[36].mxu1 }
 0x9d7   :  { %v2104_v10 = vpop.f32.mrb[37].mxu0  ;;  %v3696_v34 = vpop.f32.mrb[37].mxu1  ;;  %v2103_v35 = vadd.f32 %v2102_v9, %v1928_v31  ;;  %v5051_v21 = vadd.f32 %v5001_v17, %v1936_v4 }
 0x9d8   :  { %v2105_v19 = vadd.f32 %v2104_v10, %v1932_v8  ;;  %v2106_v20 = vpop.f32.mrb[38].mxu0  ;;  %v5003_v28 = vpop.f32.mrb[38].mxu1 }
 0x9d9   :  { %v2107_v23 = vadd.f32 %v2106_v20, %v1928_v31  ;;  %v2108_v15 = vpop.f32.mrb[39].mxu0  ;;  %v3697_v24 = vpop.f32.mrb[39].mxu1  ;;  %v2172_v39 = vpack.c.bf16 %v2103_v35, %v2103_v35  ;;  %v5043_v38 = vadd.f32 %v5003_v28, %v1936_v4  ;;  %v2228_v33 = vpack.c.bf16 %v5051_v21, %v5051_v21 }
 0x9da   :  { %v2109_v40 = vadd.f32 %v2108_v15, %v1932_v8  ;;  %v2200_v7 = vpack.c.bf16 %v2105_v19, %v2105_v19 }
 0x9db   :  { %v3860_v12 = vpack.i.bf16 %v2103_v35, %v2107_v23  ;;  %v2173_v41 = vpack.c.bf16 %v2107_v23, %v2107_v23  ;;  %v2229_v18 = vpack.c.bf16 %v5043_v38, %v5043_v38  ;;  %v2771_v30 = vsel %vm2769_vm3, %v2228_v33, 0 }
 0x9dc   :  { %2184 = vrot.lane.b32.xlu0 %v2109_v40, %s4266_s0  ;;  %v2240_v16 = vsel %vm240_vm0, %v2200_v7, 0  ;;  %v2201_v14 = vpack.c.bf16 %v2109_v40, %v2109_v40 }
 0x9dd   :  { %3699 = vmatpush3.bf16.xpose.msra.mxu0 %v2240_v16  ;;  %3861 = vrot.lane.b32.xlu1 %v3860_v12, %s4266_s0  ;;  %v2817_v26 = vsel %vm2769_vm3, %v2229_v18, 0 }
 0x9de   :  { %v2286_v6 = vsel %vm240_vm0, %v2201_v14, 0  ;;  %3710 = vmatprep.subr.bf16.mxu0 %v4264_v0 }
 0x9df   :  { %3705 = vmatpush3.bf16.xpose.msra.mxu1 %v2286_v6 }
 0x9e0   :  { %2182 = vrot.lane.b32.xlu0 %v2105_v19, %s4266_s0  ;;  %3716 = vmatprep.subr.bf16.mxu1 %v4264_v0 }
 0x9e1   :  { %2190 = vrot.lane.b32.xlu1 %v2109_v40, %s4267_s15 }
 0x9e4   :  { %2188 = vrot.lane.b32.xlu0 %v2105_v19, %s4267_s15  ;;  %3701 = vmatmul.mubr.msk.bf16.vlgmr.msra.gmra.mrb[40].mxu0 %vm240_vm0, %v2172_v39 }
 0x9e5   :  { %3866 = vrot.lane.b32.xlu1 %v3860_v12, %s4267_s15  ;;  %3712 = vmatprep.mubr.msk.bf16.mxu0 %vm4265_vm2, %v4264_v0 }
 0x9e6   :  { %3707 = vmatmul.mubr.msk.bf16.vlgmr.msra.gmra.mrb[40].mxu1 %vm240_vm0, %v2173_v41 }
 0x9e7   :  { %3718 = vmatprep.mubr.msk.bf16.mxu1 %vm4265_vm2, %v4264_v0 }
 0x9e8   :  { %2196 = vrot.lane.b32.xlu0 %v2109_v40, %s4268_s16 }
 0x9e9   :  { %2194 = vrot.lane.b32.xlu1 %v2105_v19, %s4268_s16 }
 0x9ec   :  { %2168 = vrot.lane.b32.xlu0 %v2107_v23, %s4268_s16 }
 0x9ed   :  { %2166 = vrot.lane.b32.xlu1 %v2103_v35, %s4268_s16 }
 0xa4e   :  { %v2185_v42 = vpop.permute.xlu0 %2184 }
 0xa4f   :  { %v2203_v43 = vpack.c.bf16 %v2185_v42, %v2185_v42  ;;  %v3862_v44 = vpop.permute.xlu1 %3861 }
 0xa50   :  { %v3863_v47 = vunpack.i.l.bf16 %v3862_v44  ;;  %v3864_v53 = vunpack.i.h.bf16 %v3862_v44 }
 0xa51   :  { %v2378_v45 = vsel %vm240_vm0, %v2203_v43, 0 }
 0xa52   :  { %3717 = vmatpush3.bf16.xpose.msra.mxu1 %v2378_v45  ;;  %v2183_v46 = vpop.permute.xlu0 %2182  ;;  %v2175_v54 = vpack.c.bf16 %v3863_v47, %v3863_v47  ;;  %v2174_v58 = vpack.c.bf16 %v3864_v53, %v3864_v53 }
 0xa53   :  { %v2202_v48 = vpack.c.bf16 %v2183_v46, %v2183_v46  ;;  %v2191_v49 = vpop.permute.xlu1 %2190  ;;  %3728 = vmatprep.subr.bf16.mxu1 %v4264_v0 }
 0xa54   :  { %v2205_v51 = vpack.c.bf16 %v2191_v49, %v2191_v49 }
 0xa55   :  { %v2332_v50 = vsel %vm240_vm0, %v2202_v48, 0 }
 0xa56   :  { %v2189_v52 = vpop.permute.xlu0 %2188  ;;  %3711 = vmatpush3.bf16.xpose.msra.mxu0 %v2332_v50  ;;  %v2470_v56 = vsel %vm240_vm0, %v2205_v51, 0 }
 0xa57   :  { %3722 = vmatprep.subr.bf16.mxu0 %v4264_v0  ;;  %v3867_v55 = vpop.permute.xlu1 %3866  ;;  %v2204_v57 = vpack.c.bf16 %v2189_v52, %v2189_v52 }
 0xa58   :  { %v3868_v63 = vunpack.i.l.bf16 %v3867_v55  ;;  %v3869_v25 = vunpack.i.h.bf16 %v3867_v55 }
 0xa59   :  { %3719 = vmatmul.mubr.msk.bf16.vlgmr.msra.gmra.mrb[44].mxu1 %vm240_vm0, %v2175_v54  ;;  %v2424_v59 = vsel %vm240_vm0, %v2204_v57, 0 }
 0xa5a   :  { %v2197_v62 = vpop.permute.xlu0 %2196  ;;  %3729 = vmatpush3.bf16.xpose.msra.mxu1 %v2470_v56  ;;  %3730 = vmatprep.mubr.msk.bf16.mxu1 %vm4265_vm2, %v4264_v0  ;;  %v2177_v37 = vpack.c.bf16 %v3868_v63, %v3868_v63  ;;  %v2176_v61 = vpack.c.bf16 %v3869_v25, %v3869_v25 }
 0xa5b   :  { %3740 = vmatprep.subr.bf16.mxu1 %v4264_v0  ;;  %v2207_v2 = vpack.c.bf16 %v2197_v62, %v2197_v62  ;;  %v2195_v3 = vpop.permute.xlu1 %2194 }
 0xa5c   :  { %v2206_v32 = vpack.c.bf16 %v2195_v3, %v2195_v3 }
 0xa5d   :  { %3713 = vmatmul.mubr.msk.bf16.vlgmr.msra.gmra.mrb[44].mxu0 %vm240_vm0, %v2174_v58  ;;  %v2562_v29 = vsel %vm240_vm0, %v2207_v2, 0 }
 0xa5e   :  { %3723 = vmatpush3.bf16.xpose.msra.mxu0 %v2424_v59  ;;  %3724 = vmatprep.mubr.msk.bf16.mxu0 %vm4265_vm2, %v4264_v0  ;;  %v2169_v5 = vpop.permute.xlu0 %2168  ;;  %v2516_v11 = vsel %vm240_vm0, %v2206_v32, 0 }
 0xa5f   :  { %3734 = vmatprep.subr.bf16.mxu0 %v4264_v0  ;;  %v2179_v22 = vpack.c.bf16 %v2169_v5, %v2169_v5  ;;  %v2167_v1 = vpop.permute.xlu1 %2166 }
 0xa60   :  { %v2178_v36 = vpack.c.bf16 %v2167_v1, %v2167_v1 }
 0xa61   :  { %3731 = vmatmul.mubr.msk.bf16.vlgmr.msra.gmra.mrb[48].mxu1 %vm240_vm0, %v2177_v37 }
 0xa62   :  { %3741 = vmatpush3.bf16.xpose.msra.mxu1 %v2562_v29  ;;  %3742 = vmatprep.mubr.msk.bf16.mxu1 %vm4265_vm2, %v4264_v0 }
 0xa63   :  { %3752 = vmatprep.subr.bf16.mxu1 %v4264_v0 }
 0xa65   :  { %3725 = vmatmul.mubr.msk.bf16.vlgmr.msra.gmra.mrb[48].mxu0 %vm240_vm0, %v2176_v61 }
 0xa66   :  { %3735 = vmatpush3.bf16.xpose.msra.mxu0 %v2516_v11  ;;  %3736 = vmatprep.mubr.msk.bf16.mxu0 %vm4265_vm2, %v4264_v0 }
 0xa67   :  { %3746 = vmatprep.subr.bf16.mxu0 %v4264_v0 }
 0xa69   :  { %3743 = vmatmul.mubr.msk.bf16.vlgmr.msra.gmra.mrb[52].mxu1 %vm240_vm0, %v2179_v22 }
 0xa6a   :  { %3753 = vmatpush3.bf16.msra.mxu1 %v2817_v26  ;;  %3754 = vmatprep.mubr.msk.bf16.mxu1 %vm4265_vm2, %v4264_v0 }
 0xa6b   :  { %3764 = vmatprep.subr.bf16.mxu1 %v4264_v0 }
 0xa6d   :  { %3737 = vmatmul.mubr.msk.bf16.vlgmr.msra.gmra.mrb[52].mxu0 %vm240_vm0, %v2178_v36 }
 0xa6e   :  { %3747 = vmatpush3.bf16.msra.mxu0 %v2771_v30  ;;  %3748 = vmatprep.mubr.msk.bf16.mxu0 %vm4265_vm2, %v4264_v0 }
 0xa6f   :  { %3758 = vmatprep.subr.bf16.mxu0 %v4264_v0 }
 0xab7   :  { %v2276_v13 = vpop.f32.mrb[40].mxu0 }
 0xab8   :  { %v3702_v8 = vpop.f32.mrb[41].mxu0  ;;  %v2605_v27 = vsel %vm2604_vm4, %v2276_v13, -inf }
 0xab9   :  { %v2322_v31 = vpop.f32.mrb[40].mxu1  ;;  %2606 = vmax.xlane.f32.xlu1 %v2605_v27  ;;  %v2279_v9 = vpop.f32.mrb[42].mxu0 }
 0xaba   :  { %v3703_v17 = vpop.f32.mrb[43].mxu0  ;;  %v3708_v10 = vpop.f32.mrb[41].mxu1  ;;  %v2608_v34 = vsel %vm2604_vm4, %v2322_v31, -inf }
 0xabb   :  { %v2325_v19 = vpop.f32.mrb[42].mxu1  ;;  %2609 = vmax.xlane.f32.xlu0 %v2608_v34 }
 0xabc   :  { %v3709_v20 = vpop.f32.mrb[43].mxu1 }
 0xb2c   :  { %v2414_v28 = vpop.f32.mrb[44].mxu1 }
 0xb2d   :  { %v3720_v35 = vpop.f32.mrb[45].mxu1  ;;  %v2614_v23 = vsel %vm2604_vm4, %v2414_v28, -inf }
 0xb2e   :  { %2615 = vmax.xlane.f32.xlu0 %v2614_v23  ;;  %v2417_v15 = vpop.f32.mrb[46].mxu1 }
 0xb2f   :  { %v3721_v24 = vpop.f32.mrb[47].mxu1 }
 0xb30   :  { %v2368_v40 = vpop.f32.mrb[44].mxu0 }
 0xb31   :  { %v3714_v7 = vpop.f32.mrb[45].mxu0  ;;  %v2611_v12 = vsel %vm2604_vm4, %v2368_v40, -inf }
 0xb32   :  { %2612 = vmax.xlane.f32.xlu0 %v2611_v12  ;;  %v2371_v16 = vpop.f32.mrb[46].mxu0 }
 0xb33   :  { %v3715_v14 = vpop.f32.mrb[47].mxu0 }
 0xb34   :  { %v2506_v6 = vpop.f32.mrb[48].mxu1 }
 0xb35   :  { %v3732_v39 = vpop.f32.mrb[49].mxu1  ;;  %v2620_v41 = vsel %vm2604_vm4, %v2506_v6, -inf }
 0xb36   :  { %v2509_v42 = vpop.f32.mrb[50].mxu1  ;;  %2621 = vmax.xlane.f32.xlu1 %v2620_v41 }
 0xb37   :  { %v3733_v43 = vpop.f32.mrb[51].mxu1 }
 0xb38   :  { %v2460_v44 = vpop.f32.mrb[48].mxu0 }
 0xb39   :  { %v3726_v45 = vpop.f32.mrb[49].mxu0  ;;  %v2617_v46 = vsel %vm2604_vm4, %v2460_v44, -inf }
 0xb3a   :  { %2618 = vmax.xlane.f32.xlu0 %v2617_v46  ;;  %v2463_v47 = vpop.f32.mrb[50].mxu0 }
 0xb3b   :  { %v3727_v48 = vpop.f32.mrb[51].mxu0 }
 0xb3c   :  { %v5078_v49 = vpop.f32.mrb[52].mxu1 }
 0xb3d   :  { %v3744_v50 = vpop.f32.mrb[53].mxu1  ;;  %v2626_v51 = vsel %vm2604_vm4, %v5078_v49, -inf }
 0xb3e   :  { %v2601_v52 = vpop.f32.mrb[54].mxu1  ;;  %2627 = vmax.xlane.f32.xlu1 %v2626_v51 }
 0xb3f   :  { %v3745_v53 = vpop.f32.mrb[55].mxu1 }
 0xb40   :  { %v2552_v54 = vpop.f32.mrb[52].mxu0 }
 0xb41   :  { %v3738_v55 = vpop.f32.mrb[53].mxu0  ;;  %v2623_v56 = vsel %vm2604_vm4, %v2552_v54, -inf }
 0xb42   :  { %2624 = vmax.xlane.f32.xlu0 %v2623_v56  ;;  %v2555_v57 = vpop.f32.mrb[54].mxu0 }
 0xb43   :  { %v3739_v62 = vpop.f32.mrb[55].mxu0 }
 0xb46   :  { %v2607_v58 = vpop.xlane.xlu1 %2606 }
 0xb47   :  { %v2629_v63 = vsub.f32 %v2276_v13, %v2607_v58 }
 0xb48   :  { %v2610_v60 = vpop.xlane.xlu0 %2609 }
 0xb49   :  { %v2637_v59 = vmul.f32 1.442695, %v2629_v63  ;;  %v2630_v4 = vsub.f32 %v2322_v31, %v2610_v60 }
 0xb4b   :  { %4044 = vpow2.f32 %v2637_v59  ;;  %v2639_v25 = vmul.f32 1.442695, %v2630_v4 }
 0xb4d   :  { %4046 = vpow2.f32 %v2639_v25 }
 0xb4f   :  { %2212 = vrot.lane.b32.xlu1 %v5043_v38, %s4266_s0 }
 0xb55   :  { %v4045_v2 = vpop.eup %4044 }
 0xb56   :  { %v2653_v3 = vsel %vm2604_vm4, %v4045_v2, 0.0 }
 0xb57   :  { %2654 = vadd.xlane.f32.xlu0 %v2653_v3  ;;  %v5086_v37 = vpop.eup %4046 }
 0xb58   :  { %v2656_v29 = vsel %vm2604_vm4, %v5086_v37, 0.0 }
 0xb73   :  { %2657 = vadd.xlane.f32.xlu1 %v2656_v29 }
 0xbbb   :  { %v2616_v32 = vpop.xlane.xlu0 %2615 }
 0xbbc   :  { %v2632_v61 = vsub.f32 %v2414_v28, %v2616_v32 }
 0xbbe   :  { %v2643_v5 = vmul.f32 1.442695, %v2632_v61 }
 0xbbf   :  { %v2613_v11 = vpop.xlane.xlu0 %2612 }
 0xbc0   :  { %4048 = vpow2.f32 %v2643_v5  ;;  %v2631_v18 = vsub.f32 %v2368_v40, %v2613_v11 }
 0xbc2   :  { %v2641_v22 = vmul.f32 1.442695, %v2631_v18 }
 0xbc3   :  { %v2622_v1 = vpop.xlane.xlu1 %2621 }
 0xbc4   :  { %4050 = vpow2.f32 %v2641_v22  ;;  %v2634_v26 = vsub.f32 %v2506_v6, %v2622_v1 }
 0xbc6   :  { %v2647_v33 = vmul.f32 1.442695, %v2634_v26 }
 0xbc7   :  { %v2619_v36 = vpop.xlane.xlu0 %2618 }
 0xbc8   :  { %4052 = vpow2.f32 %v2647_v33  ;;  %v2633_v30 = vsub.f32 %v2460_v44, %v2619_v36 }
 0xbca   :  { %v5090_v13 = vpop.eup %4048  ;;  %v2645_v8 = vmul.f32 1.442695, %v2633_v30 }
 0xbcb   :  { %v2662_v27 = vsel %vm2604_vm4, %v5090_v13, 0.0  ;;  %v2628_v7 = vpop.xlane.xlu1 %2627 }
 0xbcc   :  { %4054 = vpow2.f32 %v2645_v8  ;;  %2663 = vadd.xlane.f32.xlu1 %v2662_v27  ;;  %v2636_v14 = vsub.f32 %v5078_v49, %v2628_v7 }
 0xbce   :  { %v5094_v31 = vpop.eup %4050  ;;  %v2651_v41 = vmul.f32 1.442695, %v2636_v14 }
 0xbcf   :  { %v2625_v9 = vpop.xlane.xlu0 %2624  ;;  %v2659_v17 = vsel %vm2604_vm4, %v5094_v31, 0.0  ;;  %v2213_v45 = vpop.permute.xlu1 %2212 }
 0xbd0   :  { %v2635_v10 = vsub.f32 %v2552_v54, %v2625_v9  ;;  %2660 = vadd.xlane.f32.xlu0 %v2659_v17  ;;  %v2231_v63 = vpack.c.bf16 %v2213_v45, %v2213_v45 }
 0xbd2   :  { %v5098_v34 = vpop.eup %4052  ;;  %v2649_v19 = vmul.f32 1.442695, %v2635_v10  ;;  %v2909_v3 = vsel %vm2769_vm3, %v2231_v63, 0 }
 0xbd3   :  { %v2668_v20 = vsel %vm2604_vm4, %v5098_v34, 0.0 }
 0xbd4   :  { %4056 = vpow2.f32 %v2649_v19  ;;  %2669 = vadd.xlane.f32.xlu1 %v2668_v20 }
 0xbd6   :  { %v5102_v28 = vpop.eup %4054 }
 0xbd7   :  { %v2665_v35 = vsel %vm2604_vm4, %v5102_v28, 0.0 }
 0xbd8   :  { %2666 = vadd.xlane.f32.xlu0 %v2665_v35 }
 0xbde   :  { %v5106_v23 = vpop.eup %4056 }
 0xbdf   :  { %v2671_v15 = vsel %vm2604_vm4, %v5106_v23, 0.0 }
 0xbe0   :  { %2672 = vadd.xlane.f32.xlu0 %v2671_v15 }
 0xbe4   :  { %v2655_v24 = vpop.xlane.xlu0 %2654 }
 0xbe5   :  { %4058 = vrcp.f32 %v2655_v24  ;;  %2218 = vrot.lane.b32.xlu1 %v5043_v38, %s4267_s15 }
 0xbe6   :  { %4060 = vpow2.f32 %v2651_v41 }
 0xbef   :  { %v4059_v40 = vpop.eup %4058 }
 0xbf0   :  { %v2685_v12 = vmul.f32 %v4059_v40, %v4045_v2  ;;  %v5121_v49 = vpop.eup %4060 }
 0xbf1   :  { %v2674_v51 = vsel %vm2604_vm4, %v5121_v49, 0.0 }
 0xbf2   :  { %v2693_v16 = vsel %vm2604_vm4, %v2685_v12, 0.0 }
 0xbf3   :  { %v2694_v6 = vrot.slane %v2693_v16, 4 }
 0xbf5   :  { %v2695_v39 = vadd.f32 %v2694_v6, %v2693_v16 }
 0xbf6   :  { %2210 = vrot.lane.b32.xlu0 %v5051_v21, %s4266_s0 }
 0xbf7   :  { %v2696_v42 = vrot.slane %v2695_v39, 2 }
 0xbf9   :  { %v2697_v43 = vadd.f32 %v2696_v42, %v2695_v39 }
 0xbfa   :  { %2224 = vrot.lane.b32.xlu0 %v5043_v38, %s4268_s16 }
 0xbfb   :  { %v2698_v44 = vrot.slane %v2697_v43, 1 }
 0xbfd   :  { %v2699_v46 = vadd.f32 %v2698_v44, %v2697_v43 }
 0xbff   :  { %v2750_v47 = vmul.f32 0.125, %v2699_v46 }
 0xc00   :  { %v2658_v48 = vpop.xlane.xlu1 %2657 }
 0xc01   :  { %4062 = vrcp.f32 %v2658_v48  ;;  %v2758_v50 = vpack.c.bf16 %v2750_v47, %v2750_v47 }
 0xc03   :  { %3749 = vmatmul.mubr.msk.bf16.vlgmr.msra.gmra.mrb[56].mxu0 %vm2604_vm4, %v2758_v50 }
 0xc04   :  { %3760 = vmatprep.mubr.msk.bf16.mxu0 %vm4265_vm2, %v4264_v0 }
 0xc09   :  { %2675 = vadd.xlane.f32.xlu1 %v2674_v51 }
 0xc0b   :  { %v4063_v38 = vpop.eup %4062 }
 0xc0c   :  { %v2686_v52 = vmul.f32 %v4063_v38, %v5086_v37 }
 0xc0e   :  { %v2700_v53 = vsel %vm2604_vm4, %v2686_v52, 0.0 }
 0xc0f   :  { %v2701_v54 = vrot.slane %v2700_v53, 4 }
 0xc11   :  { %v2702_v55 = vadd.f32 %v2701_v54, %v2700_v53 }
 0xc13   :  { %v2703_v56 = vrot.slane %v2702_v55, 2 }
 0xc15   :  { %v2704_v57 = vadd.f32 %v2703_v56, %v2702_v55 }
 0xc17   :  { %v2705_v62 = vrot.slane %v2704_v57, 1 }
 0xc19   :  { %v2706_v58 = vadd.f32 %v2705_v62, %v2704_v57 }
 0xc1a   :  { %2216 = vrot.lane.b32.xlu1 %v5051_v21, %s4267_s15 }
 0xc1b   :  { %v2751_v59 = vmul.f32 0.125, %v2706_v58 }
 0xc1d   :  { %v2759_v2 = vpack.c.bf16 %v2751_v59, %v2751_v59 }
 0xc1e   :  { %2222 = vrot.lane.b32.xlu1 %v5051_v21, %s4268_s16 }
 0xc1f   :  { %3755 = vmatmul.mubr.msk.bf16.vlgmr.msra.gmra.mrb[56].mxu1 %vm2604_vm4, %v2759_v2 }
 0xc20   :  { %3765 = vmatpush3.bf16.msra.mxu1 %v2909_v3  ;;  %3766 = vmatprep.mubr.msk.bf16.mxu1 %vm4265_vm2, %v4264_v0 }
 0xc21   :  { %3776 = vmatprep.subr.bf16.mxu1 %v4264_v0 }
 0xc59   :  { %v2664_v60 = vpop.xlane.xlu1 %2663 }
 0xc5a   :  { %4064 = vrcp.f32 %v2664_v60 }
 0xc5d   :  { %v2661_v4 = vpop.xlane.xlu0 %2660 }
 0xc5e   :  { %4066 = vrcp.f32 %v2661_v4 }
 0xc61   :  { %v2670_v25 = vpop.xlane.xlu1 %2669 }
 0xc62   :  { %4068 = vrcp.f32 %v2670_v25 }
 0xc64   :  { %v4065_v37 = vpop.eup %4064 }
 0xc65   :  { %v2688_v29 = vmul.f32 %v4065_v37, %v5090_v13  ;;  %v2667_v11 = vpop.xlane.xlu0 %2666  ;;  %v2219_v19 = vpop.permute.xlu1 %2218 }
 0xc66   :  { %4070 = vrcp.f32 %v2667_v11  ;;  %v2233_v7 = vpack.c.bf16 %v2219_v19, %v2219_v19 }
 0xc67   :  { %v2714_v21 = vsel %vm2604_vm4, %v2688_v29, 0.0 }
 0xc68   :  { %v4067_v32 = vpop.eup %4066  ;;  %v2715_v61 = vrot.slane %v2714_v21, 4  ;;  %v3001_v41 = vsel %vm2769_vm3, %v2233_v7, 0 }
 0xc69   :  { %v2687_v5 = vmul.f32 %v4067_v32, %v5094_v31 }
 0xc6a   :  { %v2716_v18 = vadd.f32 %v2715_v61, %v2714_v21 }
 0xc6b   :  { %v2707_v22 = vsel %vm2604_vm4, %v2687_v5, 0.0 }
 0xc6c   :  { %v4069_v1 = vpop.eup %4068  ;;  %v2717_v26 = vrot.slane %v2716_v18, 2  ;;  %v2708_v33 = vrot.slane %v2707_v22, 4 }
 0xc6d   :  { %v2690_v36 = vmul.f32 %v4069_v1, %v5098_v34  ;;  %v2673_v30 = vpop.xlane.xlu0 %2672 }
 0xc6e   :  { %v2709_v8 = vadd.f32 %v2708_v33, %v2707_v22  ;;  %v2718_v27 = vadd.f32 %v2717_v26, %v2716_v18  ;;  %4072 = vrcp.f32 %v2673_v30 }
 0xc6f   :  { %v2728_v13 = vsel %vm2604_vm4, %v2690_v36, 0.0 }
 0xc70   :  { %v2710_v9 = vrot.slane %v2709_v8, 2  ;;  %v2729_v17 = vrot.slane %v2728_v13, 4  ;;  %v2719_v10 = vrot.slane %v2718_v27, 1  ;;  %v4071_v43 = vpop.eup %4070 }
 0xc71   :  { %v2211_v31 = vpop.permute.xlu0 %2210  ;;  %v2689_v48 = vmul.f32 %v4071_v43, %v5102_v28 }
 0xc72   :  { %v2730_v20 = vadd.f32 %v2729_v17, %v2728_v13  ;;  %v2230_v35 = vpack.c.bf16 %v2211_v31, %v2211_v31  ;;  %v2720_v15 = vadd.f32 %v2719_v10, %v2718_v27  ;;  %v2711_v24 = vadd.f32 %v2710_v9, %v2709_v8 }
 0xc73   :  { %v2721_v52 = vsel %vm2604_vm4, %v2689_v48, 0.0 }
 0xc74   :  { %v2731_v40 = vrot.slane %v2730_v20, 2  ;;  %v2863_v12 = vsel %vm2769_vm3, %v2230_v35, 0  ;;  %v2753_v34 = vmul.f32 0.125, %v2720_v15  ;;  %v2712_v16 = vrot.slane %v2711_v24, 1 }
 0xc75   :  { %3759 = vmatpush3.bf16.msra.mxu0 %v2863_v12  ;;  %v2225_v44 = vpop.permute.xlu0 %2224  ;;  %v2722_v28 = vrot.slane %v2721_v52, 4 }
 0xc76   :  { %v2761_v14 = vpack.c.bf16 %v2753_v34, %v2753_v34  ;;  %v2732_v6 = vadd.f32 %v2731_v40, %v2730_v20  ;;  %3770 = vmatprep.subr.bf16.mxu0 %v4264_v0  ;;  %v2713_v39 = vadd.f32 %v2712_v16, %v2711_v24  ;;  %v2235_v50 = vpack.c.bf16 %v2225_v44, %v2225_v44 }
 0xc77   :  { %v2723_v56 = vadd.f32 %v2722_v28, %v2721_v52  ;;  %v3965_v28 = vld [vmem:[%s5285_s6 + $0x18] sm:$0xff]  }
 0xc78   :  { %3767 = vmatmul.mubr.msk.bf16.vlgmr.msra.gmra.mrb[60].mxu1 %vm2604_vm4, %v2761_v14  ;;  %v2733_v42 = vrot.slane %v2732_v6, 1  ;;  %v2752_v45 = vmul.f32 0.125, %v2713_v39  ;;  %v3093_v53 = vsel %vm2769_vm3, %v2235_v50, 0  ;;  %v4073_v54 = vpop.eup %4072  ;;  %v3962_v14 = vld [vmem:[%s5285_s6] sm:$0xff]  }
 0xc79   :  { %3777 = vmatpush3.bf16.msra.mxu1 %v3001_v41  ;;  %3778 = vmatprep.mubr.msk.bf16.mxu1 %vm4265_vm2, %v4264_v0  ;;  %v2691_v55 = vmul.f32 %v4073_v54, %v5106_v23  ;;  %v2724_v62 = vrot.slane %v2723_v56, 2  ;;  %v3964_v54 = vld [vmem:[%s5285_s6 + $0x10] sm:$0xff]  }
 0xc7a   :  { %3788 = vmatprep.subr.bf16.mxu1 %v4264_v0  ;;  %v2734_v46 = vadd.f32 %v2733_v42, %v2732_v6  ;;  %v2760_v47 = vpack.c.bf16 %v2752_v45, %v2752_v45  ;;  %v3963_v6 = vld [vmem:[%s5285_s6 + $0x8] sm:$0xff]  }
 0xc7b   :  { %v2735_v57 = vsel %vm2604_vm4, %v2691_v55, 0.0  ;;  %v2725_v59 = vadd.f32 %v2724_v62, %v2723_v56  ;;  %v3966_v55 = vld [vmem:[%s5285_s6 + $0x20] sm:$0xff]  }
 0xc7c   :  { %v2755_v51 = vmul.f32 0.125, %v2734_v46  ;;  %3761 = vmatmul.mubr.msk.bf16.vlgmr.msra.gmra.mrb[60].mxu0 %vm2604_vm4, %v2760_v47  ;;  %v2736_v58 = vrot.slane %v2735_v57, 4 }
 0xc7d   :  { %3772 = vmatprep.mubr.msk.bf16.mxu0 %vm4265_vm2, %v4264_v0  ;;  %v2726_v3 = vrot.slane %v2725_v59, 1 }
 0xc7e   :  { %v2763_v38 = vpack.c.bf16 %v2755_v51, %v2755_v51  ;;  %v2737_v63 = vadd.f32 %v2736_v58, %v2735_v57  ;;  %v3967_v57 = vld [vmem:[%s5285_s6 + $0x28] sm:$0xff]  }
 0xc7f   :  { %v2727_v4 = vadd.f32 %v2726_v3, %v2725_v59  ;;  %v3968_v3 = vld [vmem:[%s5285_s6 + $0x30] sm:$0xff]  }
 0xc80   :  { %3779 = vmatmul.mubr.msk.bf16.vlgmr.msra.gmra.mrb[64].mxu1 %vm2604_vm4, %v2763_v38  ;;  %v2738_v2 = vrot.slane %v2737_v63, 2 }
 0xc81   :  { %3789 = vmatpush3.bf16.msra.mxu1 %v3093_v53  ;;  %3790 = vmatprep.mubr.msk.bf16.mxu1 %vm4265_vm2, %v4264_v0  ;;  %v2754_v21 = vmul.f32 0.125, %v2727_v4 }
 0xc82   :  { %3814 = vmatprep.subr.bf16.mxu1 %v4264_v0  ;;  %v2739_v25 = vadd.f32 %v2738_v2, %v2737_v63 }
 0xc83   :  { %v2762_v11 = vpack.c.bf16 %v2754_v21, %v2754_v21  ;;  %v3970_v21 = vld [vmem:[%s5287_s8] sm:$0xff]  }
 0xc84   :  { %v2740_v32 = vrot.slane %v2739_v25, 1 }
 0xc86   :  { %v2741_v18 = vadd.f32 %v2740_v32, %v2739_v25  ;;  %v3971_v32 = vld [vmem:[%s5287_s8 + $0x8] sm:$0xff]  }
 0xc88   :  { %v2756_v33 = vmul.f32 0.125, %v2741_v18 }
 0xc8a   :  { %v2764_v27 = vpack.c.bf16 %v2756_v33, %v2756_v33  ;;  %v3974_v33 = vld [vmem:[%s5287_s8 + $0x20] sm:$0xff]  }
 0xc96   :  { %v2676_v60 = vpop.xlane.xlu1 %2675 }
 0xc97   :  { %4074 = vrcp.f32 %v2676_v60 }
 0xc9a   :  { %v2217_v37 = vpop.permute.xlu1 %2216 }
 0xc9b   :  { %v2232_v29 = vpack.c.bf16 %v2217_v37, %v2217_v37  ;;  %v3969_v37 = vld [vmem:[%s5285_s6 + $0x38] sm:$0xff]  }
 0xc9d   :  { %v2955_v61 = vsel %vm2769_vm3, %v2232_v29, 0 }
 0xc9e   :  { %v2223_v23 = vpop.permute.xlu1 %2222  ;;  %3771 = vmatpush3.bf16.msra.mxu0 %v2955_v61 }
 0xc9f   :  { %v2234_v5 = vpack.c.bf16 %v2223_v23, %v2223_v23  ;;  %3782 = vmatprep.subr.bf16.mxu0 %v4264_v0  ;;  %v3972_v23 = vld [vmem:[%s5287_s8 + $0x10] sm:$0xff]  }
 0xca1   :  { %v4075_v22 = vpop.eup %4074  ;;  %v3047_v1 = vsel %vm2769_vm3, %v2234_v5, 0  ;;  %3773 = vmatmul.mubr.msk.bf16.vlgmr.msra.gmra.mrb[64].mxu0 %vm2604_vm4, %v2762_v11 }
 0xca2   :  { %v2692_v26 = vmul.f32 %v4075_v22, %v5121_v49  ;;  %3783 = vmatpush3.bf16.msra.mxu0 %v3047_v1  ;;  %3784 = vmatprep.mubr.msk.bf16.mxu0 %vm4265_vm2, %v4264_v0 }
 0xca3   :  { %3794 = vmatprep.subr.bf16.mxu0 %v4264_v0 }
 0xca4   :  { %v2742_v36 = vsel %vm2604_vm4, %v2692_v26, 0.0  ;;  %v3973_v26 = vld [vmem:[%s5287_s8 + $0x18] sm:$0xff]  }
 0xca5   :  { %v2743_v30 = vrot.slane %v2742_v36, 4 }
 0xca7   :  { %v2744_v8 = vadd.f32 %v2743_v30, %v2742_v36  ;;  %v3975_v36 = vld [vmem:[%s5287_s8 + $0x28] sm:$0xff]   ;;  %v3976_v30 = vld [vmem:[%s5287_s8 + $0x30] sm:$0xff]  }
 0xca9   :  { %v2745_v13 = vrot.slane %v2744_v8, 2  ;;  %3785 = vmatmul.mubr.msk.bf16.vlgmr.msra.gmra.mrb[68].mxu0 %vm2604_vm4, %v2764_v27 }
 0xcaa   :  { %3810 = vmatprep.mubr.msk.bf16.mxu0 %vm4265_vm2, %v4264_v0  ;;  %3795 = vmatpush3.bf16.msra.mxu0 %v3962_v14 }
 0xcab   :  { %v2746_v9 = vadd.f32 %v2745_v13, %v2744_v8  ;;  %3796 = vmatprep.subr.bf16.mxu0 %v4264_v0 }
 0xcad   :  { %v2747_v49 = vrot.slane %v2746_v9, 1 }
 0xcae   :  { %3797 = vmatpush3.bf16.msra.mxu0 %v3963_v6 }
 0xcaf   :  { %v2748_v17 = vadd.f32 %v2747_v49, %v2746_v9  ;;  %3798 = vmatprep.subr.bf16.mxu0 %v4264_v0 }
 0xcb1   :  { %v2757_v10 = vmul.f32 0.125, %v2748_v17 }
 0xcb2   :  { %3799 = vmatpush3.bf16.msra.mxu0 %v3964_v54 }
 0xcb3   :  { %v2765_v19 = vpack.c.bf16 %v2757_v10, %v2757_v10  ;;  %3800 = vmatprep.subr.bf16.mxu0 %v4264_v0 }
 0xcb5   :  { %3791 = vmatmul.mubr.msk.bf16.vlgmr.msra.gmra.mrb[68].mxu1 %vm2604_vm4, %v2765_v19  ;;  %v3977_v19 = vld [vmem:[%s5287_s8 + $0x38] sm:$0xff]  }
 0xcb6   :  { %3830 = vmatprep.mubr.msk.bf16.mxu1 %vm4265_vm2, %v4264_v0  ;;  %3801 = vmatpush3.bf16.msra.mxu0 %v3965_v28 }
 0xcb7   :  { %3802 = vmatprep.subr.bf16.mxu0 %v4264_v0  ;;  %3815 = vmatpush3.bf16.msra.mxu1 %v3970_v21 }
 0xcb8   :  { %3816 = vmatprep.subr.bf16.mxu1 %v4264_v0 }
 0xcba   :  { %3803 = vmatpush3.bf16.msra.mxu0 %v3966_v55 }
 0xcbb   :  { %3804 = vmatprep.subr.bf16.mxu0 %v4264_v0  ;;  %3817 = vmatpush3.bf16.msra.mxu1 %v3971_v32 }
 0xcbc   :  { %3818 = vmatprep.subr.bf16.mxu1 %v4264_v0 }
 0xcbe   :  { %3805 = vmatpush3.bf16.msra.mxu0 %v3967_v57 }
 0xcbf   :  { %3806 = vmatprep.subr.bf16.mxu0 %v4264_v0  ;;  %3819 = vmatpush3.bf16.msra.mxu1 %v3972_v23 }
 0xcc0   :  { %3820 = vmatprep.subr.bf16.mxu1 %v4264_v0 }
 0xcc2   :  { %3807 = vmatpush3.bf16.msra.mxu0 %v3968_v3 }
 0xcc3   :  { %3808 = vmatprep.subr.bf16.mxu0 %v4264_v0  ;;  %3821 = vmatpush3.bf16.msra.mxu1 %v3973_v26 }
 0xcc4   :  { %3822 = vmatprep.subr.bf16.mxu1 %v4264_v0 }
 0xcc6   :  { %3809 = vmatpush3.bf16.msra.mxu0 %v3969_v37 }
 0xcc7   :  { %3834 = vmatprep.subr.bf16.mxu0 %v4264_v0  ;;  %3823 = vmatpush3.bf16.msra.mxu1 %v3974_v33 }
 0xcc8   :  { %3824 = vmatprep.subr.bf16.mxu1 %v4264_v0 }
 0xccb   :  { %3825 = vmatpush3.bf16.msra.mxu1 %v3975_v36 }
 0xccc   :  { %3826 = vmatprep.subr.bf16.mxu1 %v4264_v0 }
 0xccf   :  { %3827 = vmatpush3.bf16.msra.mxu1 %v3976_v30 }
 0xcd0   :  { %3828 = vmatprep.subr.bf16.mxu1 %v4264_v0 }
 0xcd3   :  { %3829 = vmatpush3.bf16.msra.mxu1 %v3977_v19 }
 0xcd6   :  { %v2807_v31 = vpop.f32.mrb[56].mxu0 }
 0xcd7   :  { %v3750_v20 = vpop.f32.mrb[57].mxu0 }
 0xcd8   :  { %v2810_v35 = vpop.f32.mrb[58].mxu0 }
 0xcd9   :  { %v3751_v15 = vpop.f32.mrb[59].mxu0 }
 0xcf2   :  { %v2853_v24 = vpop.f32.mrb[56].mxu1 }
 0xcf3   :  { %v3137_v40 = vrot.slane %v2853_v24, 7  ;;  %v3756_v7 = vpop.f32.mrb[57].mxu1 }
 0xcf4   :  { %v2856_v12 = vpop.f32.mrb[58].mxu1 }
 0xcf5   :  { %v3757_v34 = vpop.f32.mrb[59].mxu1  ;;  %v5177_v16 = vsel %vm3138_vm5, %v3137_v40, %v2807_v31  ;;  %v3594_v31 = vld [vmem:[%s5286_s7] ss:$0 sm:$0xff] }
 0xcf6   :  { %v3978_v12 = vld [vmem:[%s5289_s10] sm:$0xff]   ;;  %v3979_v34 = vld [vmem:[%s5289_s10 + $0x8] sm:$0xff]  }
 0xd4b   :  { %v2945_v39 = vpop.f32.mrb[60].mxu1 }
 0xd4c   :  { %v3768_v41 = vpop.f32.mrb[61].mxu1  ;;  %v3143_v44 = vrot.slane %v2945_v39, 7 }
 0xd4d   :  { %v2948_v42 = vpop.f32.mrb[62].mxu1 }
 0xd4e   :  { %v3769_v43 = vpop.f32.mrb[63].mxu1 }
 0xd4f   :  { %v2899_v45 = vpop.f32.mrb[60].mxu0 }
 0xd50   :  { %v3762_v46 = vpop.f32.mrb[61].mxu0  ;;  %v3144_v47 = vsel %vm3138_vm5, %v3143_v44, %v2899_v45  ;;  %v3612_v45 = vld [vmem:[#allocation13] ss:$0 sm:$0xff] }
 0xd51   :  { %3145 = vrot.lane.b32.xlu0 %v3144_v47, %s4268_s16  ;;  %v2902_v48 = vpop.f32.mrb[62].mxu0 }
 0xd52   :  { %v3763_v50 = vpop.f32.mrb[63].mxu0 }
 0xd53   :  { %v3037_v51 = vpop.f32.mrb[64].mxu1 }
 0xd54   :  { %v3780_v38 = vpop.f32.mrb[65].mxu1  ;;  %v3150_v56 = vrot.slane %v3037_v51, 7 }
 0xd55   :  { %v3040_v52 = vpop.f32.mrb[66].mxu1 }
 0xd56   :  { %v3781_v53 = vpop.f32.mrb[67].mxu1 }
 0xd74   :  { %v2991_v62 = vpop.f32.mrb[64].mxu0 }
 0xd75   :  { %v3774_v58 = vpop.f32.mrb[65].mxu0  ;;  %v3151_v63 = vsel %vm3138_vm5, %v3150_v56, %v2991_v62 }
 0xd76   :  { %3152 = vrot.lane.b32.xlu1 %v3151_v63, %s4267_s15  ;;  %v2994_v59 = vpop.f32.mrb[66].mxu0 }
 0xd77   :  { %v3775_v2 = vpop.f32.mrb[67].mxu0 }
 0xd7c   :  { %v3083_v60 = vpop.f32.mrb[68].mxu0 }
 0xd7d   :  { %v3786_v4 = vpop.f32.mrb[69].mxu0 }
 0xd7e   :  { %v3086_v25 = vpop.f32.mrb[70].mxu0 }
 0xd7f   :  { %v3787_v29 = vpop.f32.mrb[71].mxu0 }
 0xd88   :  { %v3129_v61 = vpop.f32.mrb[68].mxu1 }
 0xd89   :  { %v3157_v5 = vrot.slane %v3129_v61, 7  ;;  %v3792_v11 = vpop.f32.mrb[69].mxu1 }
 0xd8a   :  { %v3132_v18 = vpop.f32.mrb[70].mxu1 }
 0xd8b   :  { %v3793_v22 = vpop.f32.mrb[71].mxu1  ;;  %v3158_v1 = vsel %vm3138_vm5, %v3157_v5, %v3083_v60 }
 0xd8c   :  { %3159 = vrot.lane.b32.xlu0 %v3158_v1, %s4266_s0 }
 0xdc3   :  { %v3146_v8 = vpop.permute.xlu0 %3145 }
 0xdc4   :  { %v3162_v13 = vsel %vm240_vm0, %v5177_v16, %v3146_v8  ;;  %v3603_v16 = vld [vmem:[%s5288_s9] ss:$0 sm:$0xff]  ;;  %s4269_s9 = smov [#allocation14]  }
 0xdc5   :  { %s3477_s10 = sshll.u32 %s4269_s9, 4  ;;  %s3478_s10 = int_to_ptr.vmem [resolvable:$true] %s3477_s10 }
 0xdc6   :  { %s4222_s3 = scalar_lea.vmem %s3478_s10, 32  ;;  %p4227_p13 = scmp.lt.s32.totalorder %s3478_s10, %s3478_s10 }
 0xdc7   :  { %p4223_p12 = scmp.ne.s32.totalorder %s3478_s10, %s4222_s3  ;;  %p4228_p0 = scmp.lt.s32.totalorder %s4222_s3, %s4222_s3 }
 0xdc9   :  { %p4229_p1 = por %p4228_p0, %p4227_p13 }
 0xdcb   :  { %p4230_p2 = pnand %p4229_p1, %p4223_p12 }
 0xde8   :  { %v3153_v27 = vpop.permute.xlu1 %3152 }
 0xde9   :  { %v3163_v9 = vsel %vm1663_vm1, %v3162_v13, %v3153_v27 }
 0xdfe   :  { %v3160_v49 = vpop.permute.xlu0 %3159 }
 0xdff   :  { %v3165_v17 = vsel %vm3164_vm6, %v3163_v9, %v3160_v49 }
 0xe00   :  { %v3166_v10 = vpack.c.bf16 %v3165_v17, %v3165_v17 }
 0xe02   :  { %3811 = vmatmul.mubr.bf16.vlgmr.msra.gmra.mrb[72].mxu0 %v3166_v10 }
 0xe03   :  { %3838 = vmatprep.mubr.msk.bf16.mxu0 %vm4265_vm2, %v4264_v0  ;;  %3835 = vmatpush3.bf16.msra.mxu0 %v3978_v12 }
 0xe04   :  { %3836 = vmatprep.subr.bf16.mxu0 %v4264_v0 }
 0xe07   :  { %3837 = vmatpush3.bf16.msra.mxu0 %v3979_v34 }
 0xed5   :  { %v3272_v20 = vpop.f32.mrb[72].mxu0 }
 0xed6   :  { %v3273_v35 = vadd.f32 %v3594_v31, %v3272_v20  ;;  %v3812_v15 = vpop.f32.mrb[73].mxu0 }
 0xed7   :  { %v3275_v24 = vpop.f32.mrb[74].mxu0 }
 0xed8   :  { %v3278_v40 = vpack.c.bf16 %v3273_v35, %v3273_v35  ;;  %v3813_v7 = vpop.f32.mrb[75].mxu0 }
 0xeda   :  { %3831 = vmatmul.mubr.bf16.vlgmr.msra.gmra.mrb[72].mxu1 %v3278_v40 }
 0xfad   :  { %v3384_v14 = vpop.f32.mrb[72].mxu1 }
 0xfae   :  { %v3385_v6 = vadd.f32 %v3603_v16, %v3384_v14  ;;  %v3832_v39 = vpop.f32.mrb[73].mxu1 }
 0xfaf   :  { %v3387_v41 = vpop.f32.mrb[74].mxu1 }
 0xfb0   :  { %v3390_v42 = vmax.f32 %v3385_v6, 0.0  ;;  %v3833_v43 = vpop.f32.mrb[75].mxu1 }
 0xfb2   :  { %v3391_v44 = vpack.c.bf16 %v3390_v42, %v3390_v42 }
 0xfb4   :  { %3839 = vmatmul.mubr.msk.bf16.vlgmr.msra.gmra.mrb[76].mxu0 %vm240_vm0, %v3391_v44 }
0x1087   :  { %v3452_v0 = vpop.f32.mrb[76].mxu0 }
0x1088   :  { %v3453_v46 = vadd.f32 %v3612_v45, %v3452_v0  ;;  %v3840_v47 = vpop.f32.mrb[77].mxu0 }
0x1089   :  { %v3455_v48 = vpop.f32.mrb[78].mxu0 }
0x108a   :  { %v3841_v50 = vpop.f32.mrb[79].mxu0  ;;  %v3459_v51 = vsel %vm3458_vm7, %v3453_v46, -inf }
0x108b   :  { %3460 = vmax.xlane.f32.xlu1 %v3459_v51 }
0x1118   :  { %v3461_v38 = vpop.xlane.xlu1 %3460 }
0x1119   :  { %v3462_v52 = vsub.f32 %v3453_v46, %v3461_v38 }
0x111b   :  { %v3463_v53 = vmul.f32 1.442695, %v3462_v52 }
0x111d   :  { %4076 = vpow2.f32 %v3463_v53 }
0x1127   :  { %v4077_v54 = vpop.eup %4076 }
0x1128   :  { %v3465_v28 = vsel %vm3458_vm7, %v4077_v54, 0.0 }
0x1129   :  { %3466 = vadd.xlane.f32.xlu0 %v3465_v28 }
0x11b6   :  { %v3467_v55 = vpop.xlane.xlu0 %3466 }
0x11b7   :  { %4078 = vrcp.f32 %v3467_v55 }
0x11c1   :  { %v4079_v56 = vpop.eup %4078 }
0x11c2   :  { %v3469_v57 = vmul.f32 %v4079_v56, %v4077_v54 }
0x11c4   :  { %3470 = vst [vmem:[#allocation14] sm:$0x3] %v3469_v57 }
0x11c5   :  { %4233 = shalt.err (!%p4230_p2)
}
0x11c6   :  { %s4234_s11 = scalar_lea.hbm %s5291_s12, 32 }
0x11c7   :  { %p4235_p3 = scmp.ne.s32.totalorder %s5291_s12, %s4234_s11  ;;  %p4238_p4 = scmp.lt.u32.totalorder %s4234_s11, %s5291_s12 }
0x11c9   :  { %p4240_p5 = pnand %p4238_p4, %p4235_p3 }
0x11cb   :  { %4243 = shalt.err (!%p4240_p5)
}
0x11cc   :  { %3480 = dma.vmem_to_hbm [thread:$0]  %s3478_s10, 32, %s5291_s12, [#allocation7]  }
0x11cd   :  { %4250 = dma.done.wait [#allocation7], 32  }
0x11ce   :  { %4251 = vsyncadd [#allocation7], 4294967264 }
0x11cf   :  { %3484 = vsyncpa [#allocation6], 1 }
0x11d0   :  { %3485 = vsyncpa [#allocation9], 1 }
0x11d1   :  { %3486 = vsyncpa [#allocation12], 1 }
0x11d2   :  { %3487 = vsyncpa [#allocation7], 1 }

</bundles_post_ra>
